<compile_context>
chip_gen: v7x
topology: tpu7x:2x2x1
jax: 0.10.0
libtpu: 0.0.40
codegen_flags: <defaults>
</compile_context>

<pallas_src>
import functools
import math

import jax
import jax.numpy as jnp
from jax import lax
from jax.experimental import pallas as pl
from jax.experimental.pallas import tpu as pltpu

# ---- Config (mirrors the PyTorch module constants) --------------------------
VOCAB = 1000
VOCAB_PAD = 1024             # vocab rounded up to a multiple of 128 (lane-dense output)
EMB = 64
HID = 64                     # hidden_sizes[0]
BID = 2 * HID                # bidirectional size = 128
NUM_HEADS = 2
HEAD_DIM = BID // NUM_HEADS  # 64
LN_EPS = 1e-5


def _vmem():
    return pl.BlockSpec(memory_space=pltpu.MemorySpace.VMEM)


# =============================================================================
# Single fused kernel: bi-GRU -> MHA -> LN1 -> memory buffer -> proj -> LN2 -> head
# Row layout is time-major flattened: row = t * B + b.
# =============================================================================
def arnet_fused_kernel(emb_ref, len_ref,
                       wi_ref, bi_ref, wh_ref, bh_ref,
                       wq_ref, bq_ref, wk_ref, bk_ref, wv_ref, bv_ref,
                       wo_ref, bo_ref, g1_ref, be1_ref, mem_ref,
                       wp_ref, bp_ref, g2_ref, be2_ref,
                       hw1_ref, hb1_ref, lnhg_ref, lnhb_ref, hw2_ref, hb2_ref,
                       hid_ref, pred_ref, *, seq, batch):
    T, B = seq, batch
    H = HID
    H2 = 2 * H      # 128
    H6 = 6 * H      # 384

    # -------------------- bidirectional GRU ---------------------------------
    # Hoisted input projection (both directions, all gates) in ONE matmul.
    emb = emb_ref[...]                                                      # (T*B, E)
    gi_all = jnp.dot(emb, wi_ref[...],
                     preferred_element_type=jnp.float32) + bi_ref[...]      # (T*B, 6H)

    wh = wh_ref[...]                                                        # (2H, 6H) block-diag
    bh = jnp.broadcast_to(bh_ref[...], (B, H6))                             # hoisted broadcast
    len_v = len_ref[...]                                                    # (B, 1) int32

    lane6 = lax.broadcasted_iota(jnp.int32, (1, H6), 1)
    is_fwd6 = (lane6 % H2) < H                                              # fwd-direction gate lanes
    lane2 = lax.broadcasted_iota(jnp.int32, (1, H2), 1)
    is_fwd2 = lane2 < H

    h = jnp.zeros((B, H2), jnp.float32)          # [h_fwd | h_bwd] stacked along lanes
    fwd_out = []
    bwd_out = []
    for i in range(T):                           # fully unrolled; fwd at t=i, bwd at t=T-1-i
        rt = T - 1 - i
        gi = jnp.where(is_fwd6,
                       gi_all[i * B:(i + 1) * B, :],
                       gi_all[rt * B:(rt + 1) * B, :])                      # (B, 6H)
        gh = jnp.dot(h, wh, preferred_element_type=jnp.float32) + bh        # (B, 6H)
        r = jax.nn.sigmoid(gi[:, 0:H2] + gh[:, 0:H2])
        z = jax.nn.sigmoid(gi[:, H2:2 * H2] + gh[:, H2:2 * H2])
        n = jnp.tanh(gi[:, 2 * H2:3 * H2] + r * gh[:, 2 * H2:3 * H2])
        h_cand = (1.0 - z) * n + z * h
        m_f = (len_v > i).astype(jnp.float32)                               # (B, 1)
        m_b = (len_v > rt).astype(jnp.float32)
        m = jnp.where(is_fwd2, m_f, m_b)                                    # (B, 2H)
        h = m * h_cand + (1.0 - m) * h
        fwd_out.append(m_f * h[:, 0:H])          # padded positions -> 0 (pad_packed_sequence)
        bwd_out.append(m_b * h[:, H:H2])

    xf = jnp.concatenate(fwd_out, axis=0)                                   # (T*B, H)
    xb = jnp.concatenate(bwd_out[::-1], axis=0)                             # back to time order
    x = jnp.concatenate([xf, xb], axis=-1)                                  # (T*B, 2H)

    # -------------------- self-attention (2 heads) ---------------------------
    xh = x.astype(jnp.bfloat16)
    q = jnp.dot(xh, wq_ref[...], preferred_element_type=jnp.float32) + bq_ref[...]
    k = jnp.dot(xh, wk_ref[...], preferred_element_type=jnp.float32) + bk_ref[...]
    v = jnp.dot(xh, wv_ref[...], preferred_element_type=jnp.float32) + bv_ref[...]
    q = q * (1.0 / math.sqrt(HEAD_DIM))

    N = T * B
    row_b = lax.broadcasted_iota(jnp.int32, (N, N), 0) % B
    col_b = lax.broadcasted_iota(jnp.int32, (N, N), 1) % B
    same_batch = row_b == col_b
    neg = jnp.float32(-1e30)

    heads = []
    for hh in range(NUM_HEADS):
        s, e = hh * HEAD_DIM, (hh + 1) * HEAD_DIM
        sc = jnp.dot(q[:, s:e], k[:, s:e].T, preferred_element_type=jnp.float32)
        sc = jnp.where(same_batch, sc, neg)       # keep only same-sequence key positions
        w = jax.nn.softmax(sc, axis=-1)
        heads.append(jnp.dot(w, v[:, s:e], preferred_element_type=jnp.float32))
    ctx = jnp.concatenate(heads, axis=-1)                                    # (T*B, 2H)
    attn = jnp.dot(ctx.astype(jnp.bfloat16), wo_ref[...],
                   preferred_element_type=jnp.float32) + bo_ref[...]

    # residual + LayerNorm1
    y = attn + x
    mu = jnp.mean(y, axis=-1, keepdims=True)
    var = jnp.mean((y - mu) ** 2, axis=-1, keepdims=True)
    y = (y - mu) * lax.rsqrt(var + LN_EPS) * g1_ref[...] + be1_ref[...]

    # memory buffer: new = 0.9*old + 0.1*mean_b(y[:, -1, :]); output += mean_rows(new)
    mem_mean = jnp.mean(mem_ref[...], axis=0, keepdims=True)                 # (1, 2H)
    last_mean = jnp.mean(y[(T - 1) * B:, :], axis=0, keepdims=True)          # (1, 2H)
    y = y + (0.9 * mem_mean + 0.1 * last_mean)

    # projection + LayerNorm2 -> hidden
    p = jnp.dot(y.astype(jnp.bfloat16), wp_ref[...],
                preferred_element_type=jnp.float32) + bp_ref[...]            # (T*B, H)
    mu2 = jnp.mean(p, axis=-1, keepdims=True)
    var2 = jnp.mean((p - mu2) ** 2, axis=-1, keepdims=True)
    hid = (p - mu2) * lax.rsqrt(var2 + LN_EPS) * g2_ref[...] + be2_ref[...]
    hid_ref[...] = hid

    # output head: Linear -> LayerNorm -> (Dropout=id) -> ReLU -> Linear(VOCAB padded to 1024)
    h1 = jnp.dot(hid.astype(jnp.bfloat16), hw1_ref[...],
                 preferred_element_type=jnp.float32) + hb1_ref[...]
    mu3 = jnp.mean(h1, axis=-1, keepdims=True)
    var3 = jnp.mean((h1 - mu3) ** 2, axis=-1, keepdims=True)
    h1 = (h1 - mu3) * lax.rsqrt(var3 + LN_EPS) * lnhg_ref[...] + lnhb_ref[...]
    h1 = jnp.maximum(h1, 0.0)
    pred_ref[...] = jnp.dot(h1.astype(jnp.bfloat16), hw2_ref[...],
                            preferred_element_type=jnp.float32) + hb2_ref[...]


def run_fused(emb_flat, len_col, pp, *, seq, batch):
    kernel = functools.partial(arnet_fused_kernel, seq=seq, batch=batch)
    n_in = 27
    hid2d, logits = pl.pallas_call(
        kernel,
        out_shape=(jax.ShapeDtypeStruct((seq * batch, HID), jnp.float32),
                   jax.ShapeDtypeStruct((seq * batch, VOCAB_PAD), jnp.float32)),
        in_specs=[_vmem() for _ in range(n_in)],
        out_specs=(_vmem(), _vmem()),
    )(emb_flat, len_col,
      pp['wi'], pp['bi'], pp['wh'], pp['bh'],
      pp['wq'], pp['bq'], pp['wk'], pp['bk'], pp['wv'], pp['bv'],
      pp['wo'], pp['bo'], pp['ln1_g'], pp['ln1_b'], pp['mem'],
      pp['wp'], pp['bp'], pp['ln2_g'], pp['ln2_b'],
      pp['hw1'], pp['hb1'], pp['lnh_g'], pp['lnh_b'], pp['hw2'], pp['hb2'])
    return hid2d, logits


# =============================================================================
# Parameter init (deterministic, synthetic) + packing into kernel layout
# =============================================================================
def init_params(seed=0):
    key = jax.random.PRNGKey(seed)
    names_shapes = [
        ('embedding', (VOCAB, EMB)),
        ('w_ih_f', (EMB, 3 * HID)), ('w_hh_f', (HID, 3 * HID)),
        ('b_ih_f', (1, 3 * HID)), ('b_hh_f', (1, 3 * HID)),
        ('w_ih_b', (EMB, 3 * HID)), ('w_hh_b', (HID, 3 * HID)),
        ('b_ih_b', (1, 3 * HID)), ('b_hh_b', (1, 3 * HID)),
        ('wq', (BID, BID)), ('wk', (BID, BID)), ('wv', (BID, BID)),
        ('bq', (1, BID)), ('bk', (1, BID)), ('bv', (1, BID)),
        ('wo', (BID, BID)), ('bo', (1, BID)),
        ('memory_buffer', (5, BID)),
        ('wp', (BID, HID)), ('bp', (1, HID)),
        ('head_w1', (HID, HID)), ('head_b1', (1, HID)),
        ('head_w2', (HID, VOCAB)), ('head_b2', (1, VOCAB)),
    ]
    keys = jax.random.split(key, len(names_shapes))
    params = {}
    for (name, shape), k in zip(names_shapes, keys):
        params[name] = 0.1 * jax.random.uniform(k, shape, jnp.float32, -1.0, 1.0)
    params['embedding'] = params['embedding'].at[0].set(0.0)   # padding_idx=0
    # LayerNorm params (PyTorch default init: gamma=1, beta=0)
    params['ln1_g'] = jnp.ones((1, BID), jnp.float32)
    params['ln1_b'] = jnp.zeros((1, BID), jnp.float32)
    params['ln2_g'] = jnp.ones((1, HID), jnp.float32)
    params['ln2_b'] = jnp.zeros((1, HID), jnp.float32)
    params['lnh_g'] = jnp.ones((1, HID), jnp.float32)
    params['lnh_b'] = jnp.zeros((1, HID), jnp.float32)
    return params


def pack_params(p):
    """Build the fused/aligned kernel-layout parameters (done once, outside jit)."""
    H = HID

    def fuse_gate_cols(f, b):
        # (*, 3H)+(*, 3H) -> (*, 6H) laid out [r_f r_b | z_f z_b | n_f n_b]
        # so every gate slice in-kernel is 128-lane aligned.
        return jnp.concatenate([f[:, 0:H], b[:, 0:H],
                                f[:, H:2 * H], b[:, H:2 * H],
                                f[:, 2 * H:3 * H], b[:, 2 * H:3 * H]], axis=1)

    zero_hh = jnp.zeros((H, H), jnp.float32)

    def blockdiag(fcol, bcol):
        top = jnp.concatenate([fcol, zero_hh], axis=1)
        bot = jnp.concatenate([zero_hh, bcol], axis=1)
        return jnp.concatenate([top, bot], axis=0)          # (2H, 2H)

    whf, whb = p['w_hh_f'], p['w_hh_b']
    wh_fused = jnp.concatenate(
        [blockdiag(whf[:, 0:H], whb[:, 0:H]),
         blockdiag(whf[:, H:2 * H], whb[:, H:2 * H]),
         blockdiag(whf[:, 2 * H:3 * H], whb[:, 2 * H:3 * H])], axis=1)   # (2H, 6H)

    bf16 = jnp.bfloat16
    pad = VOCAB_PAD - VOCAB
    return {
        'embedding': p['embedding'],
        'wi': fuse_gate_cols(p['w_ih_f'], p['w_ih_b']),      # (E, 6H)
        'bi': fuse_gate_cols(p['b_ih_f'], p['b_ih_b']),      # (1, 6H)
        'wh': wh_fused,                                      # (2H, 6H)
        'bh': fuse_gate_cols(p['b_hh_f'], p['b_hh_b']),      # (1, 6H)
        'wq': p['wq'].astype(bf16), 'bq': p['bq'],
        'wk': p['wk'].astype(bf16), 'bk': p['bk'],
        'wv': p['wv'].astype(bf16), 'bv': p['bv'],
        'wo': p['wo'].astype(bf16), 'bo': p['bo'],
        'ln1_g': p['ln1_g'], 'ln1_b': p['ln1_b'],
        'mem': p['memory_buffer'],
        'wp': p['wp'].astype(bf16), 'bp': p['bp'],
        'ln2_g': p['ln2_g'], 'ln2_b': p['ln2_b'],
        'hw1': p['head_w1'].astype(bf16), 'hb1': p['head_b1'],
        'lnh_g': p['lnh_g'], 'lnh_b': p['lnh_b'],
        'hw2': jnp.pad(p['head_w2'], ((0, 0), (0, pad))).astype(bf16),   # (H, 1024)
        'hb2': jnp.pad(p['head_b2'], ((0, 0), (0, pad))),                # (1, 1024)
    }


# =============================================================================
# ARNetLM forward (single ResonanceModule layer)
# =============================================================================
def arnet_lm_forward(pp, x_tokens, lengths):
    B, T = x_tokens.shape
    # Embedding lookup (dropout = identity in eval); time-major flattened rows (t, b).
    emb = jnp.take(pp['embedding'], x_tokens.T, axis=0)          # (T, B, E)
    emb_flat = emb.reshape(T * B, EMB)
    len_col = lengths.astype(jnp.int32).reshape(B, 1)

    hid2d, logits = run_fused(emb_flat, len_col, pp, seq=T, batch=B)

    predictions = logits[:, :VOCAB].reshape(T, B, VOCAB).transpose(1, 0, 2)   # (B, T, V)
    hidden = hid2d.reshape(T, B, HID).transpose(1, 0, 2)                      # (B, T, H)
    # ARNetLM: x = prediction.argmax(-1) would feed the next layer; only one layer here.
    return [predictions], [hidden]


if __name__ == "__main__":
    raw_params = init_params(0)
    params = pack_params(raw_params)

    key = jax.random.PRNGKey(0)
    B, T = 2, 8
    x = jax.random.randint(key, (B, T), 0, VOCAB, dtype=jnp.int32)
    lengths = jnp.array([8, 6], dtype=jnp.int32)

    fwd = jax.jit(arnet_lm_forward)
    preds, hiddens = fwd(params, x, lengths)
    jax.block_until_ready((preds, hiddens))

    assert preds[0].shape == (B, T, VOCAB)
    assert hiddens[0].shape == (B, T, HID)
    assert preds[0].dtype == jnp.float32
    assert bool(jnp.all(jnp.isfinite(preds[0])))
    print("KERNEL_OK")
</pallas_src>

<mosaic_0001>
module attributes {stable_mosaic.version = 11 : i64} {
  func.func @arnet_fused_kernel(%arg0: memref<16x64xf32, #tpu.memory_space<vmem>>, %arg1: memref<2x1xi32, #tpu.memory_space<vmem>>, %arg2: memref<64x384xf32, #tpu.memory_space<vmem>>, %arg3: memref<1x384xf32, #tpu.memory_space<vmem>>, %arg4: memref<128x384xf32, #tpu.memory_space<vmem>>, %arg5: memref<1x384xf32, #tpu.memory_space<vmem>>, %arg6: memref<128x128xbf16, #tpu.memory_space<vmem>>, %arg7: memref<1x128xf32, #tpu.memory_space<vmem>>, %arg8: memref<128x128xbf16, #tpu.memory_space<vmem>>, %arg9: memref<1x128xf32, #tpu.memory_space<vmem>>, %arg10: memref<128x128xbf16, #tpu.memory_space<vmem>>, %arg11: memref<1x128xf32, #tpu.memory_space<vmem>>, %arg12: memref<128x128xbf16, #tpu.memory_space<vmem>>, %arg13: memref<1x128xf32, #tpu.memory_space<vmem>>, %arg14: memref<1x128xf32, #tpu.memory_space<vmem>>, %arg15: memref<1x128xf32, #tpu.memory_space<vmem>>, %arg16: memref<5x128xf32, #tpu.memory_space<vmem>>, %arg17: memref<128x64xbf16, #tpu.memory_space<vmem>>, %arg18: memref<1x64xf32, #tpu.memory_space<vmem>>, %arg19: memref<1x64xf32, #tpu.memory_space<vmem>>, %arg20: memref<1x64xf32, #tpu.memory_space<vmem>>, %arg21: memref<64x64xbf16, #tpu.memory_space<vmem>>, %arg22: memref<1x64xf32, #tpu.memory_space<vmem>>, %arg23: memref<1x64xf32, #tpu.memory_space<vmem>>, %arg24: memref<1x64xf32, #tpu.memory_space<vmem>>, %arg25: memref<64x1024xbf16, #tpu.memory_space<vmem>>, %arg26: memref<1x1024xf32, #tpu.memory_space<vmem>>, %arg27: memref<16x64xf32, #tpu.memory_space<vmem>>, %arg28: memref<16x1024xf32, #tpu.memory_space<vmem>>) attributes {dimension_semantics = [], scalar_prefetch = 0 : i64, scratch_operands = 0 : i64, tpu.core_type = #tpu.core_type<tc>} {
    %c0 = arith.constant 0 : index
    %c0_0 = arith.constant 0 : index
    %0 = vector.load %arg0[%c0, %c0_0] : memref<16x64xf32, #tpu.memory_space<vmem>>, vector<16x64xf32>
    %c0_1 = arith.constant 0 : index
    %c0_2 = arith.constant 0 : index
    %1 = vector.load %arg2[%c0_1, %c0_2] : memref<64x384xf32, #tpu.memory_space<vmem>>, vector<64x384xf32>
    %cst = arith.constant dense<0.000000e+00> : vector<16x384xf32>
    %2 = tpu.matmul %0, %1, %cst {dimension_numbers = #tpu.dot_dimension_numbers<[1], [0], [0], [1], [0, 0, 1, 1], [], []>} : vector<16x64xf32>, vector<64x384xf32>, vector<16x384xf32> -> vector<16x384xf32>
    %c0_3 = arith.constant 0 : index
    %c0_4 = arith.constant 0 : index
    %3 = vector.load %arg3[%c0_3, %c0_4] : memref<1x384xf32, #tpu.memory_space<vmem>>, vector<1x384xf32>
    %4 = vector.broadcast %3 : vector<1x384xf32> to vector<16x384xf32>
    %5 = arith.addf %2, %4 : vector<16x384xf32>
    %c0_5 = arith.constant 0 : index
    %c0_6 = arith.constant 0 : index
    %6 = vector.load %arg4[%c0_5, %c0_6] : memref<128x384xf32, #tpu.memory_space<vmem>>, vector<128x384xf32>
    %c0_7 = arith.constant 0 : index
    %c0_8 = arith.constant 0 : index
    %7 = vector.load %arg5[%c0_7, %c0_8] : memref<1x384xf32, #tpu.memory_space<vmem>>, vector<1x384xf32>
    %8 = vector.shape_cast %7 : vector<1x384xf32> to vector<1x384xf32>
    %9 = vector.broadcast %8 : vector<1x384xf32> to vector<2x384xf32>
    %c0_9 = arith.constant 0 : index
    %c0_10 = arith.constant 0 : index
    %10 = vector.load %arg1[%c0_9, %c0_10] : memref<2x1xi32, #tpu.memory_space<vmem>>, vector<2x1xi32>
    %11 = tpu.iota {dimensions = array<i32: 1>} : vector<1x384xi32>
    %c128_i32 = arith.constant 128 : i32
    %c0_i32 = arith.constant 0 : i32
    %12 = arith.cmpi eq, %c128_i32, %c0_i32 : i32
    %c1_i32 = arith.constant 1 : i32
    %13 = arith.select %12, %c1_i32, %c128_i32 : i32
    %14 = vector.broadcast %13 : i32 to vector<1x384xi32>
    %15 = arith.remsi %11, %14 : vector<1x384xi32>
    %c0_i32_11 = arith.constant 0 : i32
    %16 = vector.broadcast %c0_i32_11 : i32 to vector<1x384xi32>
    %17 = arith.cmpi ne, %15, %16 : vector<1x384xi32>
    %c0_i32_12 = arith.constant 0 : i32
    %18 = vector.broadcast %c0_i32_12 : i32 to vector<1x384xi32>
    %19 = arith.cmpi slt, %15, %18 : vector<1x384xi32>
    %c0_i32_13 = arith.constant 0 : i32
    %20 = arith.cmpi slt, %13, %c0_i32_13 : i32
    %21 = vector.broadcast %20 : i1 to vector<1x384xi1>
    %22 = vector.broadcast %21 : vector<1x384xi1> to vector<1x384xi1>
    %23 = arith.xori %19, %22 : vector<1x384xi1>
    %24 = arith.andi %23, %17 : vector<1x384xi1>
    %25 = vector.broadcast %13 : i32 to vector<1x384xi32>
    %26 = arith.addi %15, %25 : vector<1x384xi32>
    %27 = arith.select %24, %26, %15 : vector<1x384xi1>, vector<1x384xi32>
    %c64_i32 = arith.constant 64 : i32
    %28 = vector.broadcast %c64_i32 : i32 to vector<1x384xi32>
    %29 = arith.cmpi slt, %27, %28 : vector<1x384xi32>
    %30 = tpu.iota {dimensions = array<i32: 1>} : vector<1x128xi32>
    %c64_i32_14 = arith.constant 64 : i32
    %31 = vector.broadcast %c64_i32_14 : i32 to vector<1x128xi32>
    %32 = arith.cmpi slt, %30, %31 : vector<1x128xi32>
    %cst_15 = arith.constant 0.000000e+00 : f32
    %33 = vector.broadcast %cst_15 : f32 to vector<2x128xf32>
    %34 = vector.extract_strided_slice %5 {offsets = [0, 0], sizes = [2, 384], strides = [1, 1]} : vector<16x384xf32> to vector<2x384xf32>
    %35 = vector.extract_strided_slice %5 {offsets = [14, 0], sizes = [2, 384], strides = [1, 1]} : vector<16x384xf32> to vector<2x384xf32>
    %36 = vector.shape_cast %29 : vector<1x384xi1> to vector<1x384xi1>
    %37 = vector.broadcast %36 : vector<1x384xi1> to vector<2x384xi1>
    %38 = arith.select %37, %34, %35 : vector<2x384xi1>, vector<2x384xf32>
    %cst_16 = arith.constant dense<0.000000e+00> : vector<2x384xf32>
    %39 = tpu.matmul %33, %6, %cst_16 {dimension_numbers = #tpu.dot_dimension_numbers<[1], [0], [0], [1], [0, 0, 1, 1], [], []>} : vector<2x128xf32>, vector<128x384xf32>, vector<2x384xf32> -> vector<2x384xf32>
    %40 = arith.addf %39, %9 : vector<2x384xf32>
    %41 = vector.extract_strided_slice %38 {offsets = [0, 0], sizes = [2, 128], strides = [1, 1]} : vector<2x384xf32> to vector<2x128xf32>
    %42 = vector.extract_strided_slice %40 {offsets = [0, 0], sizes = [2, 128], strides = [1, 1]} : vector<2x384xf32> to vector<2x128xf32>
    %43 = arith.addf %41, %42 : vector<2x128xf32>
    %44 = arith.negf %43 : vector<2x128xf32>
    %45 = math.exp %44 : vector<2x128xf32>
    %cst_17 = arith.constant 1.000000e+00 : f32
    %46 = vector.broadcast %cst_17 : f32 to vector<2x128xf32>
    %47 = arith.addf %46, %45 : vector<2x128xf32>
    %48 = arith.divf %46, %47 : vector<2x128xf32>
    %49 = vector.extract_strided_slice %38 {offsets = [0, 128], sizes = [2, 128], strides = [1, 1]} : vector<2x384xf32> to vector<2x128xf32>
    %50 = vector.extract_strided_slice %40 {offsets = [0, 128], sizes = [2, 128], strides = [1, 1]} : vector<2x384xf32> to vector<2x128xf32>
    %51 = arith.addf %49, %50 : vector<2x128xf32>
    %52 = arith.negf %51 : vector<2x128xf32>
    %53 = math.exp %52 : vector<2x128xf32>
    %cst_18 = arith.constant 1.000000e+00 : f32
    %54 = vector.broadcast %cst_18 : f32 to vector<2x128xf32>
    %55 = arith.addf %54, %53 : vector<2x128xf32>
    %56 = arith.divf %54, %55 : vector<2x128xf32>
    %57 = vector.extract_strided_slice %38 {offsets = [0, 256], sizes = [2, 128], strides = [1, 1]} : vector<2x384xf32> to vector<2x128xf32>
    %58 = vector.extract_strided_slice %40 {offsets = [0, 256], sizes = [2, 128], strides = [1, 1]} : vector<2x384xf32> to vector<2x128xf32>
    %59 = arith.mulf %48, %58 : vector<2x128xf32>
    %60 = arith.addf %57, %59 : vector<2x128xf32>
    %61 = math.tanh %60 : vector<2x128xf32>
    %cst_19 = arith.constant 1.000000e+00 : f32
    %62 = vector.broadcast %cst_19 : f32 to vector<2x128xf32>
    %63 = arith.subf %62, %56 : vector<2x128xf32>
    %64 = arith.mulf %63, %61 : vector<2x128xf32>
    %65 = arith.mulf %56, %33 : vector<2x128xf32>
    %66 = arith.addf %64, %65 : vector<2x128xf32>
    %c0_i32_20 = arith.constant 0 : i32
    %67 = vector.broadcast %c0_i32_20 : i32 to vector<2x1xi32>
    %68 = arith.cmpi sgt, %10, %67 : vector<2x1xi32>
    %69 = arith.extui %68 : vector<2x1xi1> to vector<2x1xi32>
    %70 = arith.sitofp %69 : vector<2x1xi32> to vector<2x1xf32>
    %c7_i32 = arith.constant 7 : i32
    %71 = vector.broadcast %c7_i32 : i32 to vector<2x1xi32>
    %72 = arith.cmpi sgt, %10, %71 : vector<2x1xi32>
    %73 = arith.extui %72 : vector<2x1xi1> to vector<2x1xi32>
    %74 = arith.sitofp %73 : vector<2x1xi32> to vector<2x1xf32>
    %75 = vector.shape_cast %32 : vector<1x128xi1> to vector<1x128xi1>
    %76 = vector.broadcast %75 : vector<1x128xi1> to vector<2x128xi1>
    %77 = vector.shape_cast %70 : vector<2x1xf32> to vector<2x1xf32>
    %78 = vector.broadcast %77 : vector<2x1xf32> to vector<2x128xf32>
    %79 = vector.shape_cast %74 : vector<2x1xf32> to vector<2x1xf32>
    %80 = vector.broadcast %79 : vector<2x1xf32> to vector<2x128xf32>
    %81 = arith.select %76, %78, %80 : vector<2x128xi1>, vector<2x128xf32>
    %82 = arith.mulf %81, %66 : vector<2x128xf32>
    %cst_21 = arith.constant 1.000000e+00 : f32
    %83 = vector.broadcast %cst_21 : f32 to vector<2x128xf32>
    %84 = arith.subf %83, %81 : vector<2x128xf32>
    %85 = arith.mulf %84, %33 : vector<2x128xf32>
    %86 = arith.addf %82, %85 : vector<2x128xf32>
    %87 = vector.extract_strided_slice %86 {offsets = [0, 0], sizes = [2, 64], strides = [1, 1]} : vector<2x128xf32> to vector<2x64xf32>
    %88 = vector.broadcast %70 : vector<2x1xf32> to vector<2x64xf32>
    %89 = arith.mulf %88, %87 : vector<2x64xf32>
    %90 = vector.extract_strided_slice %86 {offsets = [0, 64], sizes = [2, 64], strides = [1, 1]} : vector<2x128xf32> to vector<2x64xf32>
    %91 = vector.broadcast %74 : vector<2x1xf32> to vector<2x64xf32>
    %92 = arith.mulf %91, %90 : vector<2x64xf32>
    %93 = vector.extract_strided_slice %5 {offsets = [2, 0], sizes = [2, 384], strides = [1, 1]} : vector<16x384xf32> to vector<2x384xf32>
    %94 = vector.extract_strided_slice %5 {offsets = [12, 0], sizes = [2, 384], strides = [1, 1]} : vector<16x384xf32> to vector<2x384xf32>
    %95 = vector.shape_cast %29 : vector<1x384xi1> to vector<1x384xi1>
    %96 = vector.broadcast %95 : vector<1x384xi1> to vector<2x384xi1>
    %97 = arith.select %96, %93, %94 : vector<2x384xi1>, vector<2x384xf32>
    %cst_22 = arith.constant dense<0.000000e+00> : vector<2x384xf32>
    %98 = tpu.matmul %86, %6, %cst_22 {dimension_numbers = #tpu.dot_dimension_numbers<[1], [0], [0], [1], [0, 0, 1, 1], [], []>} : vector<2x128xf32>, vector<128x384xf32>, vector<2x384xf32> -> vector<2x384xf32>
    %99 = arith.addf %98, %9 : vector<2x384xf32>
    %100 = vector.extract_strided_slice %97 {offsets = [0, 0], sizes = [2, 128], strides = [1, 1]} : vector<2x384xf32> to vector<2x128xf32>
    %101 = vector.extract_strided_slice %99 {offsets = [0, 0], sizes = [2, 128], strides = [1, 1]} : vector<2x384xf32> to vector<2x128xf32>
    %102 = arith.addf %100, %101 : vector<2x128xf32>
    %103 = arith.negf %102 : vector<2x128xf32>
    %104 = math.exp %103 : vector<2x128xf32>
    %cst_23 = arith.constant 1.000000e+00 : f32
    %105 = vector.broadcast %cst_23 : f32 to vector<2x128xf32>
    %106 = arith.addf %105, %104 : vector<2x128xf32>
    %107 = arith.divf %105, %106 : vector<2x128xf32>
    %108 = vector.extract_strided_slice %97 {offsets = [0, 128], sizes = [2, 128], strides = [1, 1]} : vector<2x384xf32> to vector<2x128xf32>
    %109 = vector.extract_strided_slice %99 {offsets = [0, 128], sizes = [2, 128], strides = [1, 1]} : vector<2x384xf32> to vector<2x128xf32>
    %110 = arith.addf %108, %109 : vector<2x128xf32>
    %111 = arith.negf %110 : vector<2x128xf32>
    %112 = math.exp %111 : vector<2x128xf32>
    %cst_24 = arith.constant 1.000000e+00 : f32
    %113 = vector.broadcast %cst_24 : f32 to vector<2x128xf32>
    %114 = arith.addf %113, %112 : vector<2x128xf32>
    %115 = arith.divf %113, %114 : vector<2x128xf32>
    %116 = vector.extract_strided_slice %97 {offsets = [0, 256], sizes = [2, 128], strides = [1, 1]} : vector<2x384xf32> to vector<2x128xf32>
    %117 = vector.extract_strided_slice %99 {offsets = [0, 256], sizes = [2, 128], strides = [1, 1]} : vector<2x384xf32> to vector<2x128xf32>
    %118 = arith.mulf %107, %117 : vector<2x128xf32>
    %119 = arith.addf %116, %118 : vector<2x128xf32>
    %120 = math.tanh %119 : vector<2x128xf32>
    %cst_25 = arith.constant 1.000000e+00 : f32
    %121 = vector.broadcast %cst_25 : f32 to vector<2x128xf32>
    %122 = arith.subf %121, %115 : vector<2x128xf32>
    %123 = arith.mulf %122, %120 : vector<2x128xf32>
    %124 = arith.mulf %115, %86 : vector<2x128xf32>
    %125 = arith.addf %123, %124 : vector<2x128xf32>
    %c1_i32_26 = arith.constant 1 : i32
    %126 = vector.broadcast %c1_i32_26 : i32 to vector<2x1xi32>
    %127 = arith.cmpi sgt, %10, %126 : vector<2x1xi32>
    %128 = arith.extui %127 : vector<2x1xi1> to vector<2x1xi32>
    %129 = arith.sitofp %128 : vector<2x1xi32> to vector<2x1xf32>
    %c6_i32 = arith.constant 6 : i32
    %130 = vector.broadcast %c6_i32 : i32 to vector<2x1xi32>
    %131 = arith.cmpi sgt, %10, %130 : vector<2x1xi32>
    %132 = arith.extui %131 : vector<2x1xi1> to vector<2x1xi32>
    %133 = arith.sitofp %132 : vector<2x1xi32> to vector<2x1xf32>
    %134 = vector.shape_cast %32 : vector<1x128xi1> to vector<1x128xi1>
    %135 = vector.broadcast %134 : vector<1x128xi1> to vector<2x128xi1>
    %136 = vector.shape_cast %129 : vector<2x1xf32> to vector<2x1xf32>
    %137 = vector.broadcast %136 : vector<2x1xf32> to vector<2x128xf32>
    %138 = vector.shape_cast %133 : vector<2x1xf32> to vector<2x1xf32>
    %139 = vector.broadcast %138 : vector<2x1xf32> to vector<2x128xf32>
    %140 = arith.select %135, %137, %139 : vector<2x128xi1>, vector<2x128xf32>
    %141 = arith.mulf %140, %125 : vector<2x128xf32>
    %cst_27 = arith.constant 1.000000e+00 : f32
    %142 = vector.broadcast %cst_27 : f32 to vector<2x128xf32>
    %143 = arith.subf %142, %140 : vector<2x128xf32>
    %144 = arith.mulf %143, %86 : vector<2x128xf32>
    %145 = arith.addf %141, %144 : vector<2x128xf32>
    %146 = vector.extract_strided_slice %145 {offsets = [0, 0], sizes = [2, 64], strides = [1, 1]} : vector<2x128xf32> to vector<2x64xf32>
    %147 = vector.broadcast %129 : vector<2x1xf32> to vector<2x64xf32>
    %148 = arith.mulf %147, %146 : vector<2x64xf32>
    %149 = vector.extract_strided_slice %145 {offsets = [0, 64], sizes = [2, 64], strides = [1, 1]} : vector<2x128xf32> to vector<2x64xf32>
    %150 = vector.broadcast %133 : vector<2x1xf32> to vector<2x64xf32>
    %151 = arith.mulf %150, %149 : vector<2x64xf32>
    %152 = vector.extract_strided_slice %5 {offsets = [4, 0], sizes = [2, 384], strides = [1, 1]} : vector<16x384xf32> to vector<2x384xf32>
    %153 = vector.extract_strided_slice %5 {offsets = [10, 0], sizes = [2, 384], strides = [1, 1]} : vector<16x384xf32> to vector<2x384xf32>
    %154 = vector.shape_cast %29 : vector<1x384xi1> to vector<1x384xi1>
    %155 = vector.broadcast %154 : vector<1x384xi1> to vector<2x384xi1>
    %156 = arith.select %155, %152, %153 : vector<2x384xi1>, vector<2x384xf32>
    %cst_28 = arith.constant dense<0.000000e+00> : vector<2x384xf32>
    %157 = tpu.matmul %145, %6, %cst_28 {dimension_numbers = #tpu.dot_dimension_numbers<[1], [0], [0], [1], [0, 0, 1, 1], [], []>} : vector<2x128xf32>, vector<128x384xf32>, vector<2x384xf32> -> vector<2x384xf32>
    %158 = arith.addf %157, %9 : vector<2x384xf32>
    %159 = vector.extract_strided_slice %156 {offsets = [0, 0], sizes = [2, 128], strides = [1, 1]} : vector<2x384xf32> to vector<2x128xf32>
    %160 = vector.extract_strided_slice %158 {offsets = [0, 0], sizes = [2, 128], strides = [1, 1]} : vector<2x384xf32> to vector<2x128xf32>
    %161 = arith.addf %159, %160 : vector<2x128xf32>
    %162 = arith.negf %161 : vector<2x128xf32>
    %163 = math.exp %162 : vector<2x128xf32>
    %cst_29 = arith.constant 1.000000e+00 : f32
    %164 = vector.broadcast %cst_29 : f32 to vector<2x128xf32>
    %165 = arith.addf %164, %163 : vector<2x128xf32>
    %166 = arith.divf %164, %165 : vector<2x128xf32>
    %167 = vector.extract_strided_slice %156 {offsets = [0, 128], sizes = [2, 128], strides = [1, 1]} : vector<2x384xf32> to vector<2x128xf32>
    %168 = vector.extract_strided_slice %158 {offsets = [0, 128], sizes = [2, 128], strides = [1, 1]} : vector<2x384xf32> to vector<2x128xf32>
    %169 = arith.addf %167, %168 : vector<2x128xf32>
    %170 = arith.negf %169 : vector<2x128xf32>
    %171 = math.exp %170 : vector<2x128xf32>
    %cst_30 = arith.constant 1.000000e+00 : f32
    %172 = vector.broadcast %cst_30 : f32 to vector<2x128xf32>
    %173 = arith.addf %172, %171 : vector<2x128xf32>
    %174 = arith.divf %172, %173 : vector<2x128xf32>
    %175 = vector.extract_strided_slice %156 {offsets = [0, 256], sizes = [2, 128], strides = [1, 1]} : vector<2x384xf32> to vector<2x128xf32>
    %176 = vector.extract_strided_slice %158 {offsets = [0, 256], sizes = [2, 128], strides = [1, 1]} : vector<2x384xf32> to vector<2x128xf32>
    %177 = arith.mulf %166, %176 : vector<2x128xf32>
    %178 = arith.addf %175, %177 : vector<2x128xf32>
    %179 = math.tanh %178 : vector<2x128xf32>
    %cst_31 = arith.constant 1.000000e+00 : f32
    %180 = vector.broadcast %cst_31 : f32 to vector<2x128xf32>
    %181 = arith.subf %180, %174 : vector<2x128xf32>
    %182 = arith.mulf %181, %179 : vector<2x128xf32>
    %183 = arith.mulf %174, %145 : vector<2x128xf32>
    %184 = arith.addf %182, %183 : vector<2x128xf32>
    %c2_i32 = arith.constant 2 : i32
    %185 = vector.broadcast %c2_i32 : i32 to vector<2x1xi32>
    %186 = arith.cmpi sgt, %10, %185 : vector<2x1xi32>
    %187 = arith.extui %186 : vector<2x1xi1> to vector<2x1xi32>
    %188 = arith.sitofp %187 : vector<2x1xi32> to vector<2x1xf32>
    %c5_i32 = arith.constant 5 : i32
    %189 = vector.broadcast %c5_i32 : i32 to vector<2x1xi32>
    %190 = arith.cmpi sgt, %10, %189 : vector<2x1xi32>
    %191 = arith.extui %190 : vector<2x1xi1> to vector<2x1xi32>
    %192 = arith.sitofp %191 : vector<2x1xi32> to vector<2x1xf32>
    %193 = vector.shape_cast %32 : vector<1x128xi1> to vector<1x128xi1>
    %194 = vector.broadcast %193 : vector<1x128xi1> to vector<2x128xi1>
    %195 = vector.shape_cast %188 : vector<2x1xf32> to vector<2x1xf32>
    %196 = vector.broadcast %195 : vector<2x1xf32> to vector<2x128xf32>
    %197 = vector.shape_cast %192 : vector<2x1xf32> to vector<2x1xf32>
    %198 = vector.broadcast %197 : vector<2x1xf32> to vector<2x128xf32>
    %199 = arith.select %194, %196, %198 : vector<2x128xi1>, vector<2x128xf32>
    %200 = arith.mulf %199, %184 : vector<2x128xf32>
    %cst_32 = arith.constant 1.000000e+00 : f32
    %201 = vector.broadcast %cst_32 : f32 to vector<2x128xf32>
    %202 = arith.subf %201, %199 : vector<2x128xf32>
    %203 = arith.mulf %202, %145 : vector<2x128xf32>
    %204 = arith.addf %200, %203 : vector<2x128xf32>
    %205 = vector.extract_strided_slice %204 {offsets = [0, 0], sizes = [2, 64], strides = [1, 1]} : vector<2x128xf32> to vector<2x64xf32>
    %206 = vector.broadcast %188 : vector<2x1xf32> to vector<2x64xf32>
    %207 = arith.mulf %206, %205 : vector<2x64xf32>
    %208 = vector.extract_strided_slice %204 {offsets = [0, 64], sizes = [2, 64], strides = [1, 1]} : vector<2x128xf32> to vector<2x64xf32>
    %209 = vector.broadcast %192 : vector<2x1xf32> to vector<2x64xf32>
    %210 = arith.mulf %209, %208 : vector<2x64xf32>
    %211 = vector.extract_strided_slice %5 {offsets = [6, 0], sizes = [2, 384], strides = [1, 1]} : vector<16x384xf32> to vector<2x384xf32>
    %212 = vector.extract_strided_slice %5 {offsets = [8, 0], sizes = [2, 384], strides = [1, 1]} : vector<16x384xf32> to vector<2x384xf32>
    %213 = vector.shape_cast %29 : vector<1x384xi1> to vector<1x384xi1>
    %214 = vector.broadcast %213 : vector<1x384xi1> to vector<2x384xi1>
    %215 = arith.select %214, %211, %212 : vector<2x384xi1>, vector<2x384xf32>
    %cst_33 = arith.constant dense<0.000000e+00> : vector<2x384xf32>
    %216 = tpu.matmul %204, %6, %cst_33 {dimension_numbers = #tpu.dot_dimension_numbers<[1], [0], [0], [1], [0, 0, 1, 1], [], []>} : vector<2x128xf32>, vector<128x384xf32>, vector<2x384xf32> -> vector<2x384xf32>
    %217 = arith.addf %216, %9 : vector<2x384xf32>
    %218 = vector.extract_strided_slice %215 {offsets = [0, 0], sizes = [2, 128], strides = [1, 1]} : vector<2x384xf32> to vector<2x128xf32>
    %219 = vector.extract_strided_slice %217 {offsets = [0, 0], sizes = [2, 128], strides = [1, 1]} : vector<2x384xf32> to vector<2x128xf32>
    %220 = arith.addf %218, %219 : vector<2x128xf32>
    %221 = arith.negf %220 : vector<2x128xf32>
    %222 = math.exp %221 : vector<2x128xf32>
    %cst_34 = arith.constant 1.000000e+00 : f32
    %223 = vector.broadcast %cst_34 : f32 to vector<2x128xf32>
    %224 = arith.addf %223, %222 : vector<2x128xf32>
    %225 = arith.divf %223, %224 : vector<2x128xf32>
    %226 = vector.extract_strided_slice %215 {offsets = [0, 128], sizes = [2, 128], strides = [1, 1]} : vector<2x384xf32> to vector<2x128xf32>
    %227 = vector.extract_strided_slice %217 {offsets = [0, 128], sizes = [2, 128], strides = [1, 1]} : vector<2x384xf32> to vector<2x128xf32>
    %228 = arith.addf %226, %227 : vector<2x128xf32>
    %229 = arith.negf %228 : vector<2x128xf32>
    %230 = math.exp %229 : vector<2x128xf32>
    %cst_35 = arith.constant 1.000000e+00 : f32
    %231 = vector.broadcast %cst_35 : f32 to vector<2x128xf32>
    %232 = arith.addf %231, %230 : vector<2x128xf32>
    %233 = arith.divf %231, %232 : vector<2x128xf32>
    %234 = vector.extract_strided_slice %215 {offsets = [0, 256], sizes = [2, 128], strides = [1, 1]} : vector<2x384xf32> to vector<2x128xf32>
    %235 = vector.extract_strided_slice %217 {offsets = [0, 256], sizes = [2, 128], strides = [1, 1]} : vector<2x384xf32> to vector<2x128xf32>
    %236 = arith.mulf %225, %235 : vector<2x128xf32>
    %237 = arith.addf %234, %236 : vector<2x128xf32>
    %238 = math.tanh %237 : vector<2x128xf32>
    %cst_36 = arith.constant 1.000000e+00 : f32
    %239 = vector.broadcast %cst_36 : f32 to vector<2x128xf32>
    %240 = arith.subf %239, %233 : vector<2x128xf32>
    %241 = arith.mulf %240, %238 : vector<2x128xf32>
    %242 = arith.mulf %233, %204 : vector<2x128xf32>
    %243 = arith.addf %241, %242 : vector<2x128xf32>
    %c3_i32 = arith.constant 3 : i32
    %244 = vector.broadcast %c3_i32 : i32 to vector<2x1xi32>
    %245 = arith.cmpi sgt, %10, %244 : vector<2x1xi32>
    %246 = arith.extui %245 : vector<2x1xi1> to vector<2x1xi32>
    %247 = arith.sitofp %246 : vector<2x1xi32> to vector<2x1xf32>
    %c4_i32 = arith.constant 4 : i32
    %248 = vector.broadcast %c4_i32 : i32 to vector<2x1xi32>
    %249 = arith.cmpi sgt, %10, %248 : vector<2x1xi32>
    %250 = arith.extui %249 : vector<2x1xi1> to vector<2x1xi32>
    %251 = arith.sitofp %250 : vector<2x1xi32> to vector<2x1xf32>
    %252 = vector.shape_cast %32 : vector<1x128xi1> to vector<1x128xi1>
    %253 = vector.broadcast %252 : vector<1x128xi1> to vector<2x128xi1>
    %254 = vector.shape_cast %247 : vector<2x1xf32> to vector<2x1xf32>
    %255 = vector.broadcast %254 : vector<2x1xf32> to vector<2x128xf32>
    %256 = vector.shape_cast %251 : vector<2x1xf32> to vector<2x1xf32>
    %257 = vector.broadcast %256 : vector<2x1xf32> to vector<2x128xf32>
    %258 = arith.select %253, %255, %257 : vector<2x128xi1>, vector<2x128xf32>
    %259 = arith.mulf %258, %243 : vector<2x128xf32>
    %cst_37 = arith.constant 1.000000e+00 : f32
    %260 = vector.broadcast %cst_37 : f32 to vector<2x128xf32>
    %261 = arith.subf %260, %258 : vector<2x128xf32>
    %262 = arith.mulf %261, %204 : vector<2x128xf32>
    %263 = arith.addf %259, %262 : vector<2x128xf32>
    %264 = vector.extract_strided_slice %263 {offsets = [0, 0], sizes = [2, 64], strides = [1, 1]} : vector<2x128xf32> to vector<2x64xf32>
    %265 = vector.broadcast %247 : vector<2x1xf32> to vector<2x64xf32>
    %266 = arith.mulf %265, %264 : vector<2x64xf32>
    %267 = vector.extract_strided_slice %263 {offsets = [0, 64], sizes = [2, 64], strides = [1, 1]} : vector<2x128xf32> to vector<2x64xf32>
    %268 = vector.broadcast %251 : vector<2x1xf32> to vector<2x64xf32>
    %269 = arith.mulf %268, %267 : vector<2x64xf32>
    %270 = vector.extract_strided_slice %5 {offsets = [8, 0], sizes = [2, 384], strides = [1, 1]} : vector<16x384xf32> to vector<2x384xf32>
    %271 = vector.extract_strided_slice %5 {offsets = [6, 0], sizes = [2, 384], strides = [1, 1]} : vector<16x384xf32> to vector<2x384xf32>
    %272 = vector.shape_cast %29 : vector<1x384xi1> to vector<1x384xi1>
    %273 = vector.broadcast %272 : vector<1x384xi1> to vector<2x384xi1>
    %274 = arith.select %273, %270, %271 : vector<2x384xi1>, vector<2x384xf32>
    %cst_38 = arith.constant dense<0.000000e+00> : vector<2x384xf32>
    %275 = tpu.matmul %263, %6, %cst_38 {dimension_numbers = #tpu.dot_dimension_numbers<[1], [0], [0], [1], [0, 0, 1, 1], [], []>} : vector<2x128xf32>, vector<128x384xf32>, vector<2x384xf32> -> vector<2x384xf32>
    %276 = arith.addf %275, %9 : vector<2x384xf32>
    %277 = vector.extract_strided_slice %274 {offsets = [0, 0], sizes = [2, 128], strides = [1, 1]} : vector<2x384xf32> to vector<2x128xf32>
    %278 = vector.extract_strided_slice %276 {offsets = [0, 0], sizes = [2, 128], strides = [1, 1]} : vector<2x384xf32> to vector<2x128xf32>
    %279 = arith.addf %277, %278 : vector<2x128xf32>
    %280 = arith.negf %279 : vector<2x128xf32>
    %281 = math.exp %280 : vector<2x128xf32>
    %cst_39 = arith.constant 1.000000e+00 : f32
    %282 = vector.broadcast %cst_39 : f32 to vector<2x128xf32>
    %283 = arith.addf %282, %281 : vector<2x128xf32>
    %284 = arith.divf %282, %283 : vector<2x128xf32>
    %285 = vector.extract_strided_slice %274 {offsets = [0, 128], sizes = [2, 128], strides = [1, 1]} : vector<2x384xf32> to vector<2x128xf32>
    %286 = vector.extract_strided_slice %276 {offsets = [0, 128], sizes = [2, 128], strides = [1, 1]} : vector<2x384xf32> to vector<2x128xf32>
    %287 = arith.addf %285, %286 : vector<2x128xf32>
    %288 = arith.negf %287 : vector<2x128xf32>
    %289 = math.exp %288 : vector<2x128xf32>
    %cst_40 = arith.constant 1.000000e+00 : f32
    %290 = vector.broadcast %cst_40 : f32 to vector<2x128xf32>
    %291 = arith.addf %290, %289 : vector<2x128xf32>
    %292 = arith.divf %290, %291 : vector<2x128xf32>
    %293 = vector.extract_strided_slice %274 {offsets = [0, 256], sizes = [2, 128], strides = [1, 1]} : vector<2x384xf32> to vector<2x128xf32>
    %294 = vector.extract_strided_slice %276 {offsets = [0, 256], sizes = [2, 128], strides = [1, 1]} : vector<2x384xf32> to vector<2x128xf32>
    %295 = arith.mulf %284, %294 : vector<2x128xf32>
    %296 = arith.addf %293, %295 : vector<2x128xf32>
    %297 = math.tanh %296 : vector<2x128xf32>
    %cst_41 = arith.constant 1.000000e+00 : f32
    %298 = vector.broadcast %cst_41 : f32 to vector<2x128xf32>
    %299 = arith.subf %298, %292 : vector<2x128xf32>
    %300 = arith.mulf %299, %297 : vector<2x128xf32>
    %301 = arith.mulf %292, %263 : vector<2x128xf32>
    %302 = arith.addf %300, %301 : vector<2x128xf32>
    %c4_i32_42 = arith.constant 4 : i32
    %303 = vector.broadcast %c4_i32_42 : i32 to vector<2x1xi32>
    %304 = arith.cmpi sgt, %10, %303 : vector<2x1xi32>
    %305 = arith.extui %304 : vector<2x1xi1> to vector<2x1xi32>
    %306 = arith.sitofp %305 : vector<2x1xi32> to vector<2x1xf32>
    %c3_i32_43 = arith.constant 3 : i32
    %307 = vector.broadcast %c3_i32_43 : i32 to vector<2x1xi32>
    %308 = arith.cmpi sgt, %10, %307 : vector<2x1xi32>
    %309 = arith.extui %308 : vector<2x1xi1> to vector<2x1xi32>
    %310 = arith.sitofp %309 : vector<2x1xi32> to vector<2x1xf32>
    %311 = vector.shape_cast %32 : vector<1x128xi1> to vector<1x128xi1>
    %312 = vector.broadcast %311 : vector<1x128xi1> to vector<2x128xi1>
    %313 = vector.shape_cast %306 : vector<2x1xf32> to vector<2x1xf32>
    %314 = vector.broadcast %313 : vector<2x1xf32> to vector<2x128xf32>
    %315 = vector.shape_cast %310 : vector<2x1xf32> to vector<2x1xf32>
    %316 = vector.broadcast %315 : vector<2x1xf32> to vector<2x128xf32>
    %317 = arith.select %312, %314, %316 : vector<2x128xi1>, vector<2x128xf32>
    %318 = arith.mulf %317, %302 : vector<2x128xf32>
    %cst_44 = arith.constant 1.000000e+00 : f32
    %319 = vector.broadcast %cst_44 : f32 to vector<2x128xf32>
    %320 = arith.subf %319, %317 : vector<2x128xf32>
    %321 = arith.mulf %320, %263 : vector<2x128xf32>
    %322 = arith.addf %318, %321 : vector<2x128xf32>
    %323 = vector.extract_strided_slice %322 {offsets = [0, 0], sizes = [2, 64], strides = [1, 1]} : vector<2x128xf32> to vector<2x64xf32>
    %324 = vector.broadcast %306 : vector<2x1xf32> to vector<2x64xf32>
    %325 = arith.mulf %324, %323 : vector<2x64xf32>
    %326 = vector.extract_strided_slice %322 {offsets = [0, 64], sizes = [2, 64], strides = [1, 1]} : vector<2x128xf32> to vector<2x64xf32>
    %327 = vector.broadcast %310 : vector<2x1xf32> to vector<2x64xf32>
    %328 = arith.mulf %327, %326 : vector<2x64xf32>
    %329 = vector.extract_strided_slice %5 {offsets = [10, 0], sizes = [2, 384], strides = [1, 1]} : vector<16x384xf32> to vector<2x384xf32>
    %330 = vector.extract_strided_slice %5 {offsets = [4, 0], sizes = [2, 384], strides = [1, 1]} : vector<16x384xf32> to vector<2x384xf32>
    %331 = vector.shape_cast %29 : vector<1x384xi1> to vector<1x384xi1>
    %332 = vector.broadcast %331 : vector<1x384xi1> to vector<2x384xi1>
    %333 = arith.select %332, %329, %330 : vector<2x384xi1>, vector<2x384xf32>
    %cst_45 = arith.constant dense<0.000000e+00> : vector<2x384xf32>
    %334 = tpu.matmul %322, %6, %cst_45 {dimension_numbers = #tpu.dot_dimension_numbers<[1], [0], [0], [1], [0, 0, 1, 1], [], []>} : vector<2x128xf32>, vector<128x384xf32>, vector<2x384xf32> -> vector<2x384xf32>
    %335 = arith.addf %334, %9 : vector<2x384xf32>
    %336 = vector.extract_strided_slice %333 {offsets = [0, 0], sizes = [2, 128], strides = [1, 1]} : vector<2x384xf32> to vector<2x128xf32>
    %337 = vector.extract_strided_slice %335 {offsets = [0, 0], sizes = [2, 128], strides = [1, 1]} : vector<2x384xf32> to vector<2x128xf32>
    %338 = arith.addf %336, %337 : vector<2x128xf32>
    %339 = arith.negf %338 : vector<2x128xf32>
    %340 = math.exp %339 : vector<2x128xf32>
    %cst_46 = arith.constant 1.000000e+00 : f32
    %341 = vector.broadcast %cst_46 : f32 to vector<2x128xf32>
    %342 = arith.addf %341, %340 : vector<2x128xf32>
    %343 = arith.divf %341, %342 : vector<2x128xf32>
    %344 = vector.extract_strided_slice %333 {offsets = [0, 128], sizes = [2, 128], strides = [1, 1]} : vector<2x384xf32> to vector<2x128xf32>
    %345 = vector.extract_strided_slice %335 {offsets = [0, 128], sizes = [2, 128], strides = [1, 1]} : vector<2x384xf32> to vector<2x128xf32>
    %346 = arith.addf %344, %345 : vector<2x128xf32>
    %347 = arith.negf %346 : vector<2x128xf32>
    %348 = math.exp %347 : vector<2x128xf32>
    %cst_47 = arith.constant 1.000000e+00 : f32
    %349 = vector.broadcast %cst_47 : f32 to vector<2x128xf32>
    %350 = arith.addf %349, %348 : vector<2x128xf32>
    %351 = arith.divf %349, %350 : vector<2x128xf32>
    %352 = vector.extract_strided_slice %333 {offsets = [0, 256], sizes = [2, 128], strides = [1, 1]} : vector<2x384xf32> to vector<2x128xf32>
    %353 = vector.extract_strided_slice %335 {offsets = [0, 256], sizes = [2, 128], strides = [1, 1]} : vector<2x384xf32> to vector<2x128xf32>
    %354 = arith.mulf %343, %353 : vector<2x128xf32>
    %355 = arith.addf %352, %354 : vector<2x128xf32>
    %356 = math.tanh %355 : vector<2x128xf32>
    %cst_48 = arith.constant 1.000000e+00 : f32
    %357 = vector.broadcast %cst_48 : f32 to vector<2x128xf32>
    %358 = arith.subf %357, %351 : vector<2x128xf32>
    %359 = arith.mulf %358, %356 : vector<2x128xf32>
    %360 = arith.mulf %351, %322 : vector<2x128xf32>
    %361 = arith.addf %359, %360 : vector<2x128xf32>
    %c5_i32_49 = arith.constant 5 : i32
    %362 = vector.broadcast %c5_i32_49 : i32 to vector<2x1xi32>
    %363 = arith.cmpi sgt, %10, %362 : vector<2x1xi32>
    %364 = arith.extui %363 : vector<2x1xi1> to vector<2x1xi32>
    %365 = arith.sitofp %364 : vector<2x1xi32> to vector<2x1xf32>
    %c2_i32_50 = arith.constant 2 : i32
    %366 = vector.broadcast %c2_i32_50 : i32 to vector<2x1xi32>
    %367 = arith.cmpi sgt, %10, %366 : vector<2x1xi32>
    %368 = arith.extui %367 : vector<2x1xi1> to vector<2x1xi32>
    %369 = arith.sitofp %368 : vector<2x1xi32> to vector<2x1xf32>
    %370 = vector.shape_cast %32 : vector<1x128xi1> to vector<1x128xi1>
    %371 = vector.broadcast %370 : vector<1x128xi1> to vector<2x128xi1>
    %372 = vector.shape_cast %365 : vector<2x1xf32> to vector<2x1xf32>
    %373 = vector.broadcast %372 : vector<2x1xf32> to vector<2x128xf32>
    %374 = vector.shape_cast %369 : vector<2x1xf32> to vector<2x1xf32>
    %375 = vector.broadcast %374 : vector<2x1xf32> to vector<2x128xf32>
    %376 = arith.select %371, %373, %375 : vector<2x128xi1>, vector<2x128xf32>
    %377 = arith.mulf %376, %361 : vector<2x128xf32>
    %cst_51 = arith.constant 1.000000e+00 : f32
    %378 = vector.broadcast %cst_51 : f32 to vector<2x128xf32>
    %379 = arith.subf %378, %376 : vector<2x128xf32>
    %380 = arith.mulf %379, %322 : vector<2x128xf32>
    %381 = arith.addf %377, %380 : vector<2x128xf32>
    %382 = vector.extract_strided_slice %381 {offsets = [0, 0], sizes = [2, 64], strides = [1, 1]} : vector<2x128xf32> to vector<2x64xf32>
    %383 = vector.broadcast %365 : vector<2x1xf32> to vector<2x64xf32>
    %384 = arith.mulf %383, %382 : vector<2x64xf32>
    %385 = vector.extract_strided_slice %381 {offsets = [0, 64], sizes = [2, 64], strides = [1, 1]} : vector<2x128xf32> to vector<2x64xf32>
    %386 = vector.broadcast %369 : vector<2x1xf32> to vector<2x64xf32>
    %387 = arith.mulf %386, %385 : vector<2x64xf32>
    %388 = vector.extract_strided_slice %5 {offsets = [12, 0], sizes = [2, 384], strides = [1, 1]} : vector<16x384xf32> to vector<2x384xf32>
    %389 = vector.extract_strided_slice %5 {offsets = [2, 0], sizes = [2, 384], strides = [1, 1]} : vector<16x384xf32> to vector<2x384xf32>
    %390 = vector.shape_cast %29 : vector<1x384xi1> to vector<1x384xi1>
    %391 = vector.broadcast %390 : vector<1x384xi1> to vector<2x384xi1>
    %392 = arith.select %391, %388, %389 : vector<2x384xi1>, vector<2x384xf32>
    %cst_52 = arith.constant dense<0.000000e+00> : vector<2x384xf32>
    %393 = tpu.matmul %381, %6, %cst_52 {dimension_numbers = #tpu.dot_dimension_numbers<[1], [0], [0], [1], [0, 0, 1, 1], [], []>} : vector<2x128xf32>, vector<128x384xf32>, vector<2x384xf32> -> vector<2x384xf32>
    %394 = arith.addf %393, %9 : vector<2x384xf32>
    %395 = vector.extract_strided_slice %392 {offsets = [0, 0], sizes = [2, 128], strides = [1, 1]} : vector<2x384xf32> to vector<2x128xf32>
    %396 = vector.extract_strided_slice %394 {offsets = [0, 0], sizes = [2, 128], strides = [1, 1]} : vector<2x384xf32> to vector<2x128xf32>
    %397 = arith.addf %395, %396 : vector<2x128xf32>
    %398 = arith.negf %397 : vector<2x128xf32>
    %399 = math.exp %398 : vector<2x128xf32>
    %cst_53 = arith.constant 1.000000e+00 : f32
    %400 = vector.broadcast %cst_53 : f32 to vector<2x128xf32>
    %401 = arith.addf %400, %399 : vector<2x128xf32>
    %402 = arith.divf %400, %401 : vector<2x128xf32>
    %403 = vector.extract_strided_slice %392 {offsets = [0, 128], sizes = [2, 128], strides = [1, 1]} : vector<2x384xf32> to vector<2x128xf32>
    %404 = vector.extract_strided_slice %394 {offsets = [0, 128], sizes = [2, 128], strides = [1, 1]} : vector<2x384xf32> to vector<2x128xf32>
    %405 = arith.addf %403, %404 : vector<2x128xf32>
    %406 = arith.negf %405 : vector<2x128xf32>
    %407 = math.exp %406 : vector<2x128xf32>
    %cst_54 = arith.constant 1.000000e+00 : f32
    %408 = vector.broadcast %cst_54 : f32 to vector<2x128xf32>
    %409 = arith.addf %408, %407 : vector<2x128xf32>
    %410 = arith.divf %408, %409 : vector<2x128xf32>
    %411 = vector.extract_strided_slice %392 {offsets = [0, 256], sizes = [2, 128], strides = [1, 1]} : vector<2x384xf32> to vector<2x128xf32>
    %412 = vector.extract_strided_slice %394 {offsets = [0, 256], sizes = [2, 128], strides = [1, 1]} : vector<2x384xf32> to vector<2x128xf32>
    %413 = arith.mulf %402, %412 : vector<2x128xf32>
    %414 = arith.addf %411, %413 : vector<2x128xf32>
    %415 = math.tanh %414 : vector<2x128xf32>
    %cst_55 = arith.constant 1.000000e+00 : f32
    %416 = vector.broadcast %cst_55 : f32 to vector<2x128xf32>
    %417 = arith.subf %416, %410 : vector<2x128xf32>
    %418 = arith.mulf %417, %415 : vector<2x128xf32>
    %419 = arith.mulf %410, %381 : vector<2x128xf32>
    %420 = arith.addf %418, %419 : vector<2x128xf32>
    %c6_i32_56 = arith.constant 6 : i32
    %421 = vector.broadcast %c6_i32_56 : i32 to vector<2x1xi32>
    %422 = arith.cmpi sgt, %10, %421 : vector<2x1xi32>
    %423 = arith.extui %422 : vector<2x1xi1> to vector<2x1xi32>
    %424 = arith.sitofp %423 : vector<2x1xi32> to vector<2x1xf32>
    %c1_i32_57 = arith.constant 1 : i32
    %425 = vector.broadcast %c1_i32_57 : i32 to vector<2x1xi32>
    %426 = arith.cmpi sgt, %10, %425 : vector<2x1xi32>
    %427 = arith.extui %426 : vector<2x1xi1> to vector<2x1xi32>
    %428 = arith.sitofp %427 : vector<2x1xi32> to vector<2x1xf32>
    %429 = vector.shape_cast %32 : vector<1x128xi1> to vector<1x128xi1>
    %430 = vector.broadcast %429 : vector<1x128xi1> to vector<2x128xi1>
    %431 = vector.shape_cast %424 : vector<2x1xf32> to vector<2x1xf32>
    %432 = vector.broadcast %431 : vector<2x1xf32> to vector<2x128xf32>
    %433 = vector.shape_cast %428 : vector<2x1xf32> to vector<2x1xf32>
    %434 = vector.broadcast %433 : vector<2x1xf32> to vector<2x128xf32>
    %435 = arith.select %430, %432, %434 : vector<2x128xi1>, vector<2x128xf32>
    %436 = arith.mulf %435, %420 : vector<2x128xf32>
    %cst_58 = arith.constant 1.000000e+00 : f32
    %437 = vector.broadcast %cst_58 : f32 to vector<2x128xf32>
    %438 = arith.subf %437, %435 : vector<2x128xf32>
    %439 = arith.mulf %438, %381 : vector<2x128xf32>
    %440 = arith.addf %436, %439 : vector<2x128xf32>
    %441 = vector.extract_strided_slice %440 {offsets = [0, 0], sizes = [2, 64], strides = [1, 1]} : vector<2x128xf32> to vector<2x64xf32>
    %442 = vector.broadcast %424 : vector<2x1xf32> to vector<2x64xf32>
    %443 = arith.mulf %442, %441 : vector<2x64xf32>
    %444 = vector.extract_strided_slice %440 {offsets = [0, 64], sizes = [2, 64], strides = [1, 1]} : vector<2x128xf32> to vector<2x64xf32>
    %445 = vector.broadcast %428 : vector<2x1xf32> to vector<2x64xf32>
    %446 = arith.mulf %445, %444 : vector<2x64xf32>
    %447 = vector.extract_strided_slice %5 {offsets = [14, 0], sizes = [2, 384], strides = [1, 1]} : vector<16x384xf32> to vector<2x384xf32>
    %448 = vector.extract_strided_slice %5 {offsets = [0, 0], sizes = [2, 384], strides = [1, 1]} : vector<16x384xf32> to vector<2x384xf32>
    %449 = vector.shape_cast %29 : vector<1x384xi1> to vector<1x384xi1>
    %450 = vector.broadcast %449 : vector<1x384xi1> to vector<2x384xi1>
    %451 = arith.select %450, %447, %448 : vector<2x384xi1>, vector<2x384xf32>
    %cst_59 = arith.constant dense<0.000000e+00> : vector<2x384xf32>
    %452 = tpu.matmul %440, %6, %cst_59 {dimension_numbers = #tpu.dot_dimension_numbers<[1], [0], [0], [1], [0, 0, 1, 1], [], []>} : vector<2x128xf32>, vector<128x384xf32>, vector<2x384xf32> -> vector<2x384xf32>
    %453 = arith.addf %452, %9 : vector<2x384xf32>
    %454 = vector.extract_strided_slice %451 {offsets = [0, 0], sizes = [2, 128], strides = [1, 1]} : vector<2x384xf32> to vector<2x128xf32>
    %455 = vector.extract_strided_slice %453 {offsets = [0, 0], sizes = [2, 128], strides = [1, 1]} : vector<2x384xf32> to vector<2x128xf32>
    %456 = arith.addf %454, %455 : vector<2x128xf32>
    %457 = arith.negf %456 : vector<2x128xf32>
    %458 = math.exp %457 : vector<2x128xf32>
    %cst_60 = arith.constant 1.000000e+00 : f32
    %459 = vector.broadcast %cst_60 : f32 to vector<2x128xf32>
    %460 = arith.addf %459, %458 : vector<2x128xf32>
    %461 = arith.divf %459, %460 : vector<2x128xf32>
    %462 = vector.extract_strided_slice %451 {offsets = [0, 128], sizes = [2, 128], strides = [1, 1]} : vector<2x384xf32> to vector<2x128xf32>
    %463 = vector.extract_strided_slice %453 {offsets = [0, 128], sizes = [2, 128], strides = [1, 1]} : vector<2x384xf32> to vector<2x128xf32>
    %464 = arith.addf %462, %463 : vector<2x128xf32>
    %465 = arith.negf %464 : vector<2x128xf32>
    %466 = math.exp %465 : vector<2x128xf32>
    %cst_61 = arith.constant 1.000000e+00 : f32
    %467 = vector.broadcast %cst_61 : f32 to vector<2x128xf32>
    %468 = arith.addf %467, %466 : vector<2x128xf32>
    %469 = arith.divf %467, %468 : vector<2x128xf32>
    %470 = vector.extract_strided_slice %451 {offsets = [0, 256], sizes = [2, 128], strides = [1, 1]} : vector<2x384xf32> to vector<2x128xf32>
    %471 = vector.extract_strided_slice %453 {offsets = [0, 256], sizes = [2, 128], strides = [1, 1]} : vector<2x384xf32> to vector<2x128xf32>
    %472 = arith.mulf %461, %471 : vector<2x128xf32>
    %473 = arith.addf %470, %472 : vector<2x128xf32>
    %474 = math.tanh %473 : vector<2x128xf32>
    %cst_62 = arith.constant 1.000000e+00 : f32
    %475 = vector.broadcast %cst_62 : f32 to vector<2x128xf32>
    %476 = arith.subf %475, %469 : vector<2x128xf32>
    %477 = arith.mulf %476, %474 : vector<2x128xf32>
    %478 = arith.mulf %469, %440 : vector<2x128xf32>
    %479 = arith.addf %477, %478 : vector<2x128xf32>
    %c7_i32_63 = arith.constant 7 : i32
    %480 = vector.broadcast %c7_i32_63 : i32 to vector<2x1xi32>
    %481 = arith.cmpi sgt, %10, %480 : vector<2x1xi32>
    %482 = arith.extui %481 : vector<2x1xi1> to vector<2x1xi32>
    %483 = arith.sitofp %482 : vector<2x1xi32> to vector<2x1xf32>
    %c0_i32_64 = arith.constant 0 : i32
    %484 = vector.broadcast %c0_i32_64 : i32 to vector<2x1xi32>
    %485 = arith.cmpi sgt, %10, %484 : vector<2x1xi32>
    %486 = arith.extui %485 : vector<2x1xi1> to vector<2x1xi32>
    %487 = arith.sitofp %486 : vector<2x1xi32> to vector<2x1xf32>
    %488 = vector.shape_cast %32 : vector<1x128xi1> to vector<1x128xi1>
    %489 = vector.broadcast %488 : vector<1x128xi1> to vector<2x128xi1>
    %490 = vector.shape_cast %483 : vector<2x1xf32> to vector<2x1xf32>
    %491 = vector.broadcast %490 : vector<2x1xf32> to vector<2x128xf32>
    %492 = vector.shape_cast %487 : vector<2x1xf32> to vector<2x1xf32>
    %493 = vector.broadcast %492 : vector<2x1xf32> to vector<2x128xf32>
    %494 = arith.select %489, %491, %493 : vector<2x128xi1>, vector<2x128xf32>
    %495 = arith.mulf %494, %479 : vector<2x128xf32>
    %cst_65 = arith.constant 1.000000e+00 : f32
    %496 = vector.broadcast %cst_65 : f32 to vector<2x128xf32>
    %497 = arith.subf %496, %494 : vector<2x128xf32>
    %498 = arith.mulf %497, %440 : vector<2x128xf32>
    %499 = arith.addf %495, %498 : vector<2x128xf32>
    %500 = vector.extract_strided_slice %499 {offsets = [0, 0], sizes = [2, 64], strides = [1, 1]} : vector<2x128xf32> to vector<2x64xf32>
    %501 = vector.broadcast %483 : vector<2x1xf32> to vector<2x64xf32>
    %502 = arith.mulf %501, %500 : vector<2x64xf32>
    %503 = vector.extract_strided_slice %499 {offsets = [0, 64], sizes = [2, 64], strides = [1, 1]} : vector<2x128xf32> to vector<2x64xf32>
    %504 = vector.broadcast %487 : vector<2x1xf32> to vector<2x64xf32>
    %505 = arith.mulf %504, %503 : vector<2x64xf32>
    %506 = tpu.concatenate %89, %148, %207, %266, %325, %384, %443, %502 in 0 : vector<2x64xf32>, vector<2x64xf32>, vector<2x64xf32>, vector<2x64xf32>, vector<2x64xf32>, vector<2x64xf32>, vector<2x64xf32>, vector<2x64xf32> -> vector<16x64xf32>
    %507 = tpu.concatenate %505, %446, %387, %328, %269, %210, %151, %92 in 0 : vector<2x64xf32>, vector<2x64xf32>, vector<2x64xf32>, vector<2x64xf32>, vector<2x64xf32>, vector<2x64xf32>, vector<2x64xf32>, vector<2x64xf32> -> vector<16x64xf32>
    %508 = tpu.concatenate %506, %507 in 1 : vector<16x64xf32>, vector<16x64xf32> -> vector<16x128xf32>
    %509 = arith.truncf %508 : vector<16x128xf32> to vector<16x128xbf16>
    %c0_66 = arith.constant 0 : index
    %c0_67 = arith.constant 0 : index
    %510 = vector.load %arg6[%c0_66, %c0_67] : memref<128x128xbf16, #tpu.memory_space<vmem>>, vector<128x128xbf16>
    %cst_68 = arith.constant dense<0.000000e+00> : vector<16x128xf32>
    %511 = tpu.matmul %509, %510, %cst_68 {dimension_numbers = #tpu.dot_dimension_numbers<[1], [0], [0], [1], [0, 0, 1, 1], [], []>} : vector<16x128xbf16>, vector<128x128xbf16>, vector<16x128xf32> -> vector<16x128xf32>
    %c0_69 = arith.constant 0 : index
    %c0_70 = arith.constant 0 : index
    %512 = vector.load %arg7[%c0_69, %c0_70] : memref<1x128xf32, #tpu.memory_space<vmem>>, vector<1x128xf32>
    %513 = vector.broadcast %512 : vector<1x128xf32> to vector<16x128xf32>
    %514 = arith.addf %511, %513 : vector<16x128xf32>
    %c0_71 = arith.constant 0 : index
    %c0_72 = arith.constant 0 : index
    %515 = vector.load %arg8[%c0_71, %c0_72] : memref<128x128xbf16, #tpu.memory_space<vmem>>, vector<128x128xbf16>
    %cst_73 = arith.constant dense<0.000000e+00> : vector<16x128xf32>
    %516 = tpu.matmul %509, %515, %cst_73 {dimension_numbers = #tpu.dot_dimension_numbers<[1], [0], [0], [1], [0, 0, 1, 1], [], []>} : vector<16x128xbf16>, vector<128x128xbf16>, vector<16x128xf32> -> vector<16x128xf32>
    %c0_74 = arith.constant 0 : index
    %c0_75 = arith.constant 0 : index
    %517 = vector.load %arg9[%c0_74, %c0_75] : memref<1x128xf32, #tpu.memory_space<vmem>>, vector<1x128xf32>
    %518 = vector.broadcast %517 : vector<1x128xf32> to vector<16x128xf32>
    %519 = arith.addf %516, %518 : vector<16x128xf32>
    %c0_76 = arith.constant 0 : index
    %c0_77 = arith.constant 0 : index
    %520 = vector.load %arg10[%c0_76, %c0_77] : memref<128x128xbf16, #tpu.memory_space<vmem>>, vector<128x128xbf16>
    %cst_78 = arith.constant dense<0.000000e+00> : vector<16x128xf32>
    %521 = tpu.matmul %509, %520, %cst_78 {dimension_numbers = #tpu.dot_dimension_numbers<[1], [0], [0], [1], [0, 0, 1, 1], [], []>} : vector<16x128xbf16>, vector<128x128xbf16>, vector<16x128xf32> -> vector<16x128xf32>
    %c0_79 = arith.constant 0 : index
    %c0_80 = arith.constant 0 : index
    %522 = vector.load %arg11[%c0_79, %c0_80] : memref<1x128xf32, #tpu.memory_space<vmem>>, vector<1x128xf32>
    %523 = vector.broadcast %522 : vector<1x128xf32> to vector<16x128xf32>
    %524 = arith.addf %521, %523 : vector<16x128xf32>
    %cst_81 = arith.constant 1.250000e-01 : f32
    %525 = vector.broadcast %cst_81 : f32 to vector<16x128xf32>
    %526 = arith.mulf %514, %525 : vector<16x128xf32>
    %527 = tpu.iota {dimensions = array<i32: 0>} : vector<16x16xi32>
    %c2_i32_82 = arith.constant 2 : i32
    %c0_i32_83 = arith.constant 0 : i32
    %528 = arith.cmpi eq, %c2_i32_82, %c0_i32_83 : i32
    %c1_i32_84 = arith.constant 1 : i32
    %529 = arith.select %528, %c1_i32_84, %c2_i32_82 : i32
    %530 = vector.broadcast %529 : i32 to vector<16x16xi32>
    %531 = arith.remsi %527, %530 : vector<16x16xi32>
    %c0_i32_85 = arith.constant 0 : i32
    %532 = vector.broadcast %c0_i32_85 : i32 to vector<16x16xi32>
    %533 = arith.cmpi ne, %531, %532 : vector<16x16xi32>
    %c0_i32_86 = arith.constant 0 : i32
    %534 = vector.broadcast %c0_i32_86 : i32 to vector<16x16xi32>
    %535 = arith.cmpi slt, %531, %534 : vector<16x16xi32>
    %c0_i32_87 = arith.constant 0 : i32
    %536 = arith.cmpi slt, %529, %c0_i32_87 : i32
    %537 = vector.broadcast %536 : i1 to vector<16x16xi1>
    %538 = vector.broadcast %537 : vector<16x16xi1> to vector<16x16xi1>
    %539 = arith.xori %535, %538 : vector<16x16xi1>
    %540 = arith.andi %539, %533 : vector<16x16xi1>
    %541 = vector.broadcast %529 : i32 to vector<16x16xi32>
    %542 = arith.addi %531, %541 : vector<16x16xi32>
    %543 = arith.select %540, %542, %531 : vector<16x16xi1>, vector<16x16xi32>
    %544 = tpu.iota {dimensions = array<i32: 1>} : vector<16x16xi32>
    %c2_i32_88 = arith.constant 2 : i32
    %c0_i32_89 = arith.constant 0 : i32
    %545 = arith.cmpi eq, %c2_i32_88, %c0_i32_89 : i32
    %c1_i32_90 = arith.constant 1 : i32
    %546 = arith.select %545, %c1_i32_90, %c2_i32_88 : i32
    %547 = vector.broadcast %546 : i32 to vector<16x16xi32>
    %548 = arith.remsi %544, %547 : vector<16x16xi32>
    %c0_i32_91 = arith.constant 0 : i32
    %549 = vector.broadcast %c0_i32_91 : i32 to vector<16x16xi32>
    %550 = arith.cmpi ne, %548, %549 : vector<16x16xi32>
    %c0_i32_92 = arith.constant 0 : i32
    %551 = vector.broadcast %c0_i32_92 : i32 to vector<16x16xi32>
    %552 = arith.cmpi slt, %548, %551 : vector<16x16xi32>
    %c0_i32_93 = arith.constant 0 : i32
    %553 = arith.cmpi slt, %546, %c0_i32_93 : i32
    %554 = vector.broadcast %553 : i1 to vector<16x16xi1>
    %555 = vector.broadcast %554 : vector<16x16xi1> to vector<16x16xi1>
    %556 = arith.xori %552, %555 : vector<16x16xi1>
    %557 = arith.andi %556, %550 : vector<16x16xi1>
    %558 = vector.broadcast %546 : i32 to vector<16x16xi32>
    %559 = arith.addi %548, %558 : vector<16x16xi32>
    %560 = arith.select %557, %559, %548 : vector<16x16xi1>, vector<16x16xi32>
    %561 = arith.cmpi eq, %543, %560 : vector<16x16xi32>
    %562 = vector.extract_strided_slice %526 {offsets = [0, 0], sizes = [16, 64], strides = [1, 1]} : vector<16x128xf32> to vector<16x64xf32>
    %563 = vector.extract_strided_slice %519 {offsets = [0, 0], sizes = [16, 64], strides = [1, 1]} : vector<16x128xf32> to vector<16x64xf32>
    %564 = tpu.transpose %563, [1, 0] : vector<16x64xf32> -> vector<64x16xf32>
    %cst_94 = arith.constant dense<0.000000e+00> : vector<16x16xf32>
    %565 = tpu.matmul %562, %564, %cst_94 {dimension_numbers = #tpu.dot_dimension_numbers<[1], [0], [0], [1], [0, 0, 1, 1], [], []>} : vector<16x64xf32>, vector<64x16xf32>, vector<16x16xf32> -> vector<16x16xf32>
    %cst_95 = arith.constant -1.000000e+30 : f32
    %566 = vector.broadcast %cst_95 : f32 to vector<16x16xf32>
    %567 = arith.select %561, %565, %566 : vector<16x16xi1>, vector<16x16xf32>
    %cst_96 = arith.constant dense<0xFF800000> : vector<16xf32>
    %568 = vector.multi_reduction <maximumf>, %567, %cst_96 [1] : vector<16x16xf32> to vector<16xf32>
    %cst_97 = arith.constant 0xFF800000 : f32
    %569 = vector.broadcast %cst_97 : f32 to vector<16xf32>
    %570 = arith.maximumf %569, %568 : vector<16xf32>
    %571 = vector.shape_cast %570 : vector<16xf32> to vector<16x1xf32>
    %572 = vector.broadcast %571 : vector<16x1xf32> to vector<16x16xf32>
    %573 = arith.subf %567, %572 : vector<16x16xf32>
    %574 = math.exp %573 : vector<16x16xf32>
    %cst_98 = arith.constant dense<0.000000e+00> : vector<16xf32>
    %575 = vector.multi_reduction <add>, %574, %cst_98 [1] : vector<16x16xf32> to vector<16xf32>
    %576 = vector.shape_cast %575 : vector<16xf32> to vector<16x1xf32>
    %577 = vector.broadcast %576 : vector<16x1xf32> to vector<16x16xf32>
    %578 = arith.divf %574, %577 : vector<16x16xf32>
    %579 = vector.extract_strided_slice %524 {offsets = [0, 0], sizes = [16, 64], strides = [1, 1]} : vector<16x128xf32> to vector<16x64xf32>
    %cst_99 = arith.constant dense<0.000000e+00> : vector<16x64xf32>
    %580 = tpu.matmul %578, %579, %cst_99 {dimension_numbers = #tpu.dot_dimension_numbers<[1], [0], [0], [1], [0, 0, 1, 1], [], []>} : vector<16x16xf32>, vector<16x64xf32>, vector<16x64xf32> -> vector<16x64xf32>
    %581 = vector.extract_strided_slice %526 {offsets = [0, 64], sizes = [16, 64], strides = [1, 1]} : vector<16x128xf32> to vector<16x64xf32>
    %582 = vector.extract_strided_slice %519 {offsets = [0, 64], sizes = [16, 64], strides = [1, 1]} : vector<16x128xf32> to vector<16x64xf32>
    %583 = tpu.transpose %582, [1, 0] : vector<16x64xf32> -> vector<64x16xf32>
    %cst_100 = arith.constant dense<0.000000e+00> : vector<16x16xf32>
    %584 = tpu.matmul %581, %583, %cst_100 {dimension_numbers = #tpu.dot_dimension_numbers<[1], [0], [0], [1], [0, 0, 1, 1], [], []>} : vector<16x64xf32>, vector<64x16xf32>, vector<16x16xf32> -> vector<16x16xf32>
    %cst_101 = arith.constant -1.000000e+30 : f32
    %585 = vector.broadcast %cst_101 : f32 to vector<16x16xf32>
    %586 = arith.select %561, %584, %585 : vector<16x16xi1>, vector<16x16xf32>
    %cst_102 = arith.constant dense<0xFF800000> : vector<16xf32>
    %587 = vector.multi_reduction <maximumf>, %586, %cst_102 [1] : vector<16x16xf32> to vector<16xf32>
    %cst_103 = arith.constant 0xFF800000 : f32
    %588 = vector.broadcast %cst_103 : f32 to vector<16xf32>
    %589 = arith.maximumf %588, %587 : vector<16xf32>
    %590 = vector.shape_cast %589 : vector<16xf32> to vector<16x1xf32>
    %591 = vector.broadcast %590 : vector<16x1xf32> to vector<16x16xf32>
    %592 = arith.subf %586, %591 : vector<16x16xf32>
    %593 = math.exp %592 : vector<16x16xf32>
    %cst_104 = arith.constant dense<0.000000e+00> : vector<16xf32>
    %594 = vector.multi_reduction <add>, %593, %cst_104 [1] : vector<16x16xf32> to vector<16xf32>
    %595 = vector.shape_cast %594 : vector<16xf32> to vector<16x1xf32>
    %596 = vector.broadcast %595 : vector<16x1xf32> to vector<16x16xf32>
    %597 = arith.divf %593, %596 : vector<16x16xf32>
    %598 = vector.extract_strided_slice %524 {offsets = [0, 64], sizes = [16, 64], strides = [1, 1]} : vector<16x128xf32> to vector<16x64xf32>
    %cst_105 = arith.constant dense<0.000000e+00> : vector<16x64xf32>
    %599 = tpu.matmul %597, %598, %cst_105 {dimension_numbers = #tpu.dot_dimension_numbers<[1], [0], [0], [1], [0, 0, 1, 1], [], []>} : vector<16x16xf32>, vector<16x64xf32>, vector<16x64xf32> -> vector<16x64xf32>
    %600 = tpu.concatenate %580, %599 in 1 : vector<16x64xf32>, vector<16x64xf32> -> vector<16x128xf32>
    %601 = arith.truncf %600 : vector<16x128xf32> to vector<16x128xbf16>
    %c0_106 = arith.constant 0 : index
    %c0_107 = arith.constant 0 : index
    %602 = vector.load %arg12[%c0_106, %c0_107] : memref<128x128xbf16, #tpu.memory_space<vmem>>, vector<128x128xbf16>
    %cst_108 = arith.constant dense<0.000000e+00> : vector<16x128xf32>
    %603 = tpu.matmul %601, %602, %cst_108 {dimension_numbers = #tpu.dot_dimension_numbers<[1], [0], [0], [1], [0, 0, 1, 1], [], []>} : vector<16x128xbf16>, vector<128x128xbf16>, vector<16x128xf32> -> vector<16x128xf32>
    %c0_109 = arith.constant 0 : index
    %c0_110 = arith.constant 0 : index
    %604 = vector.load %arg13[%c0_109, %c0_110] : memref<1x128xf32, #tpu.memory_space<vmem>>, vector<1x128xf32>
    %605 = vector.broadcast %604 : vector<1x128xf32> to vector<16x128xf32>
    %606 = arith.addf %603, %605 : vector<16x128xf32>
    %607 = arith.addf %606, %508 : vector<16x128xf32>
    %cst_111 = arith.constant dense<0.000000e+00> : vector<16xf32>
    %608 = vector.multi_reduction <add>, %607, %cst_111 [1] : vector<16x128xf32> to vector<16xf32>
    %609 = vector.shape_cast %608 : vector<16xf32> to vector<16x1xf32>
    %cst_112 = arith.constant 1.280000e+02 : f32
    %610 = vector.broadcast %cst_112 : f32 to vector<16x1xf32>
    %611 = arith.divf %609, %610 : vector<16x1xf32>
    %612 = vector.broadcast %611 : vector<16x1xf32> to vector<16x128xf32>
    %613 = arith.subf %607, %612 : vector<16x128xf32>
    %614 = arith.mulf %613, %613 : vector<16x128xf32>
    %cst_113 = arith.constant dense<0.000000e+00> : vector<16xf32>
    %615 = vector.multi_reduction <add>, %614, %cst_113 [1] : vector<16x128xf32> to vector<16xf32>
    %616 = vector.shape_cast %615 : vector<16xf32> to vector<16x1xf32>
    %cst_114 = arith.constant 1.280000e+02 : f32
    %617 = vector.broadcast %cst_114 : f32 to vector<16x1xf32>
    %618 = arith.divf %616, %617 : vector<16x1xf32>
    %619 = vector.broadcast %611 : vector<16x1xf32> to vector<16x128xf32>
    %620 = arith.subf %607, %619 : vector<16x128xf32>
    %cst_115 = arith.constant 9.99999974E-6 : f32
    %621 = vector.broadcast %cst_115 : f32 to vector<16x1xf32>
    %622 = arith.addf %618, %621 : vector<16x1xf32>
    %623 = math.rsqrt %622 : vector<16x1xf32>
    %624 = vector.broadcast %623 : vector<16x1xf32> to vector<16x128xf32>
    %625 = arith.mulf %620, %624 : vector<16x128xf32>
    %c0_116 = arith.constant 0 : index
    %c0_117 = arith.constant 0 : index
    %626 = vector.load %arg14[%c0_116, %c0_117] : memref<1x128xf32, #tpu.memory_space<vmem>>, vector<1x128xf32>
    %627 = vector.broadcast %626 : vector<1x128xf32> to vector<16x128xf32>
    %628 = arith.mulf %625, %627 : vector<16x128xf32>
    %c0_118 = arith.constant 0 : index
    %c0_119 = arith.constant 0 : index
    %629 = vector.load %arg15[%c0_118, %c0_119] : memref<1x128xf32, #tpu.memory_space<vmem>>, vector<1x128xf32>
    %630 = vector.broadcast %629 : vector<1x128xf32> to vector<16x128xf32>
    %631 = arith.addf %628, %630 : vector<16x128xf32>
    %c0_120 = arith.constant 0 : index
    %c0_121 = arith.constant 0 : index
    %632 = vector.load %arg16[%c0_120, %c0_121] : memref<5x128xf32, #tpu.memory_space<vmem>>, vector<5x128xf32>
    %cst_122 = arith.constant dense<0.000000e+00> : vector<128xf32>
    %633 = vector.multi_reduction <add>, %632, %cst_122 [0] : vector<5x128xf32> to vector<128xf32>
    %634 = vector.shape_cast %633 : vector<128xf32> to vector<1x128xf32>
    %cst_123 = arith.constant 5.000000e+00 : f32
    %635 = vector.broadcast %cst_123 : f32 to vector<1x128xf32>
    %636 = arith.divf %634, %635 : vector<1x128xf32>
    %637 = vector.extract_strided_slice %631 {offsets = [14, 0], sizes = [2, 128], strides = [1, 1]} : vector<16x128xf32> to vector<2x128xf32>
    %cst_124 = arith.constant dense<0.000000e+00> : vector<128xf32>
    %638 = vector.multi_reduction <add>, %637, %cst_124 [0] : vector<2x128xf32> to vector<128xf32>
    %639 = vector.shape_cast %638 : vector<128xf32> to vector<1x128xf32>
    %cst_125 = arith.constant 2.000000e+00 : f32
    %640 = vector.broadcast %cst_125 : f32 to vector<1x128xf32>
    %641 = arith.divf %639, %640 : vector<1x128xf32>
    %cst_126 = arith.constant 0.899999976 : f32
    %642 = vector.broadcast %cst_126 : f32 to vector<1x128xf32>
    %643 = arith.mulf %642, %636 : vector<1x128xf32>
    %cst_127 = arith.constant 1.000000e-01 : f32
    %644 = vector.broadcast %cst_127 : f32 to vector<1x128xf32>
    %645 = arith.mulf %644, %641 : vector<1x128xf32>
    %646 = arith.addf %643, %645 : vector<1x128xf32>
    %647 = vector.broadcast %646 : vector<1x128xf32> to vector<16x128xf32>
    %648 = arith.addf %631, %647 : vector<16x128xf32>
    %649 = arith.truncf %648 : vector<16x128xf32> to vector<16x128xbf16>
    %c0_128 = arith.constant 0 : index
    %c0_129 = arith.constant 0 : index
    %650 = vector.load %arg17[%c0_128, %c0_129] : memref<128x64xbf16, #tpu.memory_space<vmem>>, vector<128x64xbf16>
    %cst_130 = arith.constant dense<0.000000e+00> : vector<16x64xf32>
    %651 = tpu.matmul %649, %650, %cst_130 {dimension_numbers = #tpu.dot_dimension_numbers<[1], [0], [0], [1], [0, 0, 1, 1], [], []>} : vector<16x128xbf16>, vector<128x64xbf16>, vector<16x64xf32> -> vector<16x64xf32>
    %c0_131 = arith.constant 0 : index
    %c0_132 = arith.constant 0 : index
    %652 = vector.load %arg18[%c0_131, %c0_132] : memref<1x64xf32, #tpu.memory_space<vmem>>, vector<1x64xf32>
    %653 = vector.broadcast %652 : vector<1x64xf32> to vector<16x64xf32>
    %654 = arith.addf %651, %653 : vector<16x64xf32>
    %cst_133 = arith.constant dense<0.000000e+00> : vector<16xf32>
    %655 = vector.multi_reduction <add>, %654, %cst_133 [1] : vector<16x64xf32> to vector<16xf32>
    %656 = vector.shape_cast %655 : vector<16xf32> to vector<16x1xf32>
    %cst_134 = arith.constant 6.400000e+01 : f32
    %657 = vector.broadcast %cst_134 : f32 to vector<16x1xf32>
    %658 = arith.divf %656, %657 : vector<16x1xf32>
    %659 = vector.broadcast %658 : vector<16x1xf32> to vector<16x64xf32>
    %660 = arith.subf %654, %659 : vector<16x64xf32>
    %661 = arith.mulf %660, %660 : vector<16x64xf32>
    %cst_135 = arith.constant dense<0.000000e+00> : vector<16xf32>
    %662 = vector.multi_reduction <add>, %661, %cst_135 [1] : vector<16x64xf32> to vector<16xf32>
    %663 = vector.shape_cast %662 : vector<16xf32> to vector<16x1xf32>
    %cst_136 = arith.constant 6.400000e+01 : f32
    %664 = vector.broadcast %cst_136 : f32 to vector<16x1xf32>
    %665 = arith.divf %663, %664 : vector<16x1xf32>
    %666 = vector.broadcast %658 : vector<16x1xf32> to vector<16x64xf32>
    %667 = arith.subf %654, %666 : vector<16x64xf32>
    %cst_137 = arith.constant 9.99999974E-6 : f32
    %668 = vector.broadcast %cst_137 : f32 to vector<16x1xf32>
    %669 = arith.addf %665, %668 : vector<16x1xf32>
    %670 = math.rsqrt %669 : vector<16x1xf32>
    %671 = vector.broadcast %670 : vector<16x1xf32> to vector<16x64xf32>
    %672 = arith.mulf %667, %671 : vector<16x64xf32>
    %c0_138 = arith.constant 0 : index
    %c0_139 = arith.constant 0 : index
    %673 = vector.load %arg19[%c0_138, %c0_139] : memref<1x64xf32, #tpu.memory_space<vmem>>, vector<1x64xf32>
    %674 = vector.broadcast %673 : vector<1x64xf32> to vector<16x64xf32>
    %675 = arith.mulf %672, %674 : vector<16x64xf32>
    %c0_140 = arith.constant 0 : index
    %c0_141 = arith.constant 0 : index
    %676 = vector.load %arg20[%c0_140, %c0_141] : memref<1x64xf32, #tpu.memory_space<vmem>>, vector<1x64xf32>
    %677 = vector.broadcast %676 : vector<1x64xf32> to vector<16x64xf32>
    %678 = arith.addf %675, %677 : vector<16x64xf32>
    %c0_142 = arith.constant 0 : index
    %c0_143 = arith.constant 0 : index
    %679 = vector.load %arg27[%c0_142, %c0_143] : memref<16x64xf32, #tpu.memory_space<vmem>>, vector<16x64xf32>
    tpu.vector_store %arg27[%c0_142, %c0_143], %678 {strides = array<i32>} : memref<16x64xf32, #tpu.memory_space<vmem>>, vector<16x64xf32>,
    %680 = arith.truncf %678 : vector<16x64xf32> to vector<16x64xbf16>
    %c0_144 = arith.constant 0 : index
    %c0_145 = arith.constant 0 : index
    %681 = vector.load %arg21[%c0_144, %c0_145] : memref<64x64xbf16, #tpu.memory_space<vmem>>, vector<64x64xbf16>
    %cst_146 = arith.constant dense<0.000000e+00> : vector<16x64xf32>
    %682 = tpu.matmul %680, %681, %cst_146 {dimension_numbers = #tpu.dot_dimension_numbers<[1], [0], [0], [1], [0, 0, 1, 1], [], []>} : vector<16x64xbf16>, vector<64x64xbf16>, vector<16x64xf32> -> vector<16x64xf32>
    %c0_147 = arith.constant 0 : index
    %c0_148 = arith.constant 0 : index
    %683 = vector.load %arg22[%c0_147, %c0_148] : memref<1x64xf32, #tpu.memory_space<vmem>>, vector<1x64xf32>
    %684 = vector.broadcast %683 : vector<1x64xf32> to vector<16x64xf32>
    %685 = arith.addf %682, %684 : vector<16x64xf32>
    %cst_149 = arith.constant dense<0.000000e+00> : vector<16xf32>
    %686 = vector.multi_reduction <add>, %685, %cst_149 [1] : vector<16x64xf32> to vector<16xf32>
    %687 = vector.shape_cast %686 : vector<16xf32> to vector<16x1xf32>
    %cst_150 = arith.constant 6.400000e+01 : f32
    %688 = vector.broadcast %cst_150 : f32 to vector<16x1xf32>
    %689 = arith.divf %687, %688 : vector<16x1xf32>
    %690 = vector.broadcast %689 : vector<16x1xf32> to vector<16x64xf32>
    %691 = arith.subf %685, %690 : vector<16x64xf32>
    %692 = arith.mulf %691, %691 : vector<16x64xf32>
    %cst_151 = arith.constant dense<0.000000e+00> : vector<16xf32>
    %693 = vector.multi_reduction <add>, %692, %cst_151 [1] : vector<16x64xf32> to vector<16xf32>
    %694 = vector.shape_cast %693 : vector<16xf32> to vector<16x1xf32>
    %cst_152 = arith.constant 6.400000e+01 : f32
    %695 = vector.broadcast %cst_152 : f32 to vector<16x1xf32>
    %696 = arith.divf %694, %695 : vector<16x1xf32>
    %697 = vector.broadcast %689 : vector<16x1xf32> to vector<16x64xf32>
    %698 = arith.subf %685, %697 : vector<16x64xf32>
    %cst_153 = arith.constant 9.99999974E-6 : f32
    %699 = vector.broadcast %cst_153 : f32 to vector<16x1xf32>
    %700 = arith.addf %696, %699 : vector<16x1xf32>
    %701 = math.rsqrt %700 : vector<16x1xf32>
    %702 = vector.broadcast %701 : vector<16x1xf32> to vector<16x64xf32>
    %703 = arith.mulf %698, %702 : vector<16x64xf32>
    %c0_154 = arith.constant 0 : index
    %c0_155 = arith.constant 0 : index
    %704 = vector.load %arg23[%c0_154, %c0_155] : memref<1x64xf32, #tpu.memory_space<vmem>>, vector<1x64xf32>
    %705 = vector.broadcast %704 : vector<1x64xf32> to vector<16x64xf32>
    %706 = arith.mulf %703, %705 : vector<16x64xf32>
    %c0_156 = arith.constant 0 : index
    %c0_157 = arith.constant 0 : index
    %707 = vector.load %arg24[%c0_156, %c0_157] : memref<1x64xf32, #tpu.memory_space<vmem>>, vector<1x64xf32>
    %708 = vector.broadcast %707 : vector<1x64xf32> to vector<16x64xf32>
    %709 = arith.addf %706, %708 : vector<16x64xf32>
    %cst_158 = arith.constant 0.000000e+00 : f32
    %710 = vector.broadcast %cst_158 : f32 to vector<16x64xf32>
    %711 = arith.maximumf %709, %710 : vector<16x64xf32>
    %712 = arith.truncf %711 : vector<16x64xf32> to vector<16x64xbf16>
    %c0_159 = arith.constant 0 : index
    %c0_160 = arith.constant 0 : index
    %713 = vector.load %arg25[%c0_159, %c0_160] : memref<64x1024xbf16, #tpu.memory_space<vmem>>, vector<64x1024xbf16>
    %cst_161 = arith.constant dense<0.000000e+00> : vector<16x1024xf32>
    %714 = tpu.matmul %712, %713, %cst_161 {dimension_numbers = #tpu.dot_dimension_numbers<[1], [0], [0], [1], [0, 0, 1, 1], [], []>} : vector<16x64xbf16>, vector<64x1024xbf16>, vector<16x1024xf32> -> vector<16x1024xf32>
    %c0_162 = arith.constant 0 : index
    %c0_163 = arith.constant 0 : index
    %715 = vector.load %arg26[%c0_162, %c0_163] : memref<1x1024xf32, #tpu.memory_space<vmem>>, vector<1x1024xf32>
    %716 = vector.broadcast %715 : vector<1x1024xf32> to vector<16x1024xf32>
    %717 = arith.addf %714, %716 : vector<16x1024xf32>
    %c0_164 = arith.constant 0 : index
    %c0_165 = arith.constant 0 : index
    %718 = vector.load %arg28[%c0_164, %c0_165] : memref<16x1024xf32, #tpu.memory_space<vmem>>, vector<16x1024xf32>
    tpu.vector_store %arg28[%c0_164, %c0_165], %717 {strides = array<i32>} : memref<16x1024xf32, #tpu.memory_space<vmem>>, vector<16x1024xf32>,
    return
  }
}

</mosaic_0001>

<bundles_post_ra>
// kernel: arnet_lm_forward.1
= control target key start
LH: loop header
LB: loop body
LE: loop exit
PB: predicated region body
PF: predicated region fallthrough
CT: control target
= control target key end

     0   :  { %v6731_v3 = vmov 0.0   ;;  %v6729_v8 = vmov 0   ;;  %vm132_vm0 = vcmask 523264   ;;  %vm5186_vm5 = vmmov 0   ;;  %s6693_s2 = inlined_call_operand.vmem [shape: f32[64,384], index: 2, kind: input, shape index: {}]   ;;  %s6694_s0 = inlined_call_operand.vmem [shape: f32[16,64], index: 0, kind: input, shape index: {}]   ;;  %s6695_s4 = inlined_call_operand.vmem [shape: f32[128,384], index: 4, kind: input, shape index: {}]   ;;  %s6696_s1 = inlined_call_operand.vmem [shape: s32[2,1], index: 1, kind: input, shape index: {}]   ;;  %s6697_s3 = inlined_call_operand.vmem [shape: f32[1,384], index: 3, kind: input, shape index: {}]   ;;  %s6698_s5 = inlined_call_operand.vmem [shape: f32[1,384], index: 5, kind: input, shape index: {}]   ;;  %s6699_s6 = inlined_call_operand.vmem [shape: bf16[128,128], index: 6, kind: input, shape index: {}]   ;;  %s6700_s8 = inlined_call_operand.vmem [shape: bf16[128,128], index: 8, kind: input, shape index: {}]   ;;  %s6701_s10 = inlined_call_operand.vmem [shape: bf16[128,128], index: 10, kind: input, shape index: {}]   ;;  %s6702_s7 = inlined_call_operand.vmem [shape: f32[1,128], index: 7, kind: input, shape index: {}]   ;;  %s6703_s9 = inlined_call_operand.vmem [shape: f32[1,128], index: 9, kind: input, shape index: {}]   ;;  %s6704_s11 = inlined_call_operand.vmem [shape: f32[1,128], index: 11, kind: input, shape index: {}]   ;;  %s6705_s12 = inlined_call_operand.vmem [shape: bf16[128,128], index: 12, kind: input, shape index: {}]   ;;  %s6706_s13 = inlined_call_operand.vmem [shape: f32[1,128], index: 13, kind: input, shape index: {}]   ;;  %s6707_s17 = inlined_call_operand.vmem [shape: bf16[128,64], index: 17, kind: input, shape index: {}]   ;;  %s6708_s16 = inlined_call_operand.vmem [shape: f32[5,128], index: 16, kind: input, shape index: {}]   ;;  %s6709_s14 = inlined_call_operand.vmem [shape: f32[1,128], index: 14, kind: input, shape index: {}]   ;;  %s6710_s15 = inlined_call_operand.vmem [shape: f32[1,128], index: 15, kind: input, shape index: {}]   ;;  %s6711_s18 = inlined_call_operand.vmem [shape: f32[1,64], index: 18, kind: input, shape index: {}]   ;;  %s6712_s21 = inlined_call_operand.vmem [shape: bf16[64,64], index: 21, kind: input, shape index: {}]   ;;  %s6713_s19 = inlined_call_operand.vmem [shape: f32[1,64], index: 19, kind: input, shape index: {}]   ;;  %s6714_s20 = inlined_call_operand.vmem [shape: f32[1,64], index: 20, kind: input, shape index: {}]   ;;  %s6715_s27 = inlined_call_operand.vmem [shape: f32[16,64], index: 27, kind: output, shape index: {0}]   ;;  %s6716_s22 = inlined_call_operand.vmem [shape: f32[1,64], index: 22, kind: input, shape index: {}]   ;;  %s6717_s25 = inlined_call_operand.vmem [shape: bf16[64,1024], index: 25, kind: input, shape index: {}]   ;;  %s6718_s23 = inlined_call_operand.vmem [shape: f32[1,64], index: 23, kind: input, shape index: {}]   ;;  %s6719_s24 = inlined_call_operand.vmem [shape: f32[1,64], index: 24, kind: input, shape index: {}]   ;;  %s6720_s26 = inlined_call_operand.vmem [shape: f32[1,1024], index: 26, kind: input, shape index: {}]   ;;  %s6721_s28 = inlined_call_operand.vmem [shape: f32[16,1024], index: 28, kind: output, shape index: {1}]  }
   0x1   :  { %6742 = sst [smem:[#allocation7_spill]] %s6693_s2  ;;  %203 = vmatprep.mubr.f32.mxu0 %v6731_v3  ;;  %4994 = vset.pattern.permute.xlu0 %v6729_v8  ;;  %vm1975_vm13 = vcmask 1041408   ;;  %vm1977_vm14 = vcmask 1043456   ;;  %vm1979_vm15 = vcmask 1045504  }
   0x2   :  { %6743 = sst [smem:[#allocation8_spill]] %s6694_s0  ;;  %5005 = vset.pattern.permute.xlu1 %v6729_v8 }
   0x3   :  { %6744 = sst [smem:[#allocation9_spill]] %s6695_s4  ;;  %s5187_s4 = smov 64  }
   0x4   :  { %6745 = sst [smem:[#allocation10_spill]] %s6696_s1  ;;  %s6756_s1 = sld [smem:[#allocation8_spill]] }
   0x5   :  { %6746 = sst [smem:[#allocation11_spill]] %s6697_s3  ;;  %s6757_s3 = sld [smem:[#allocation9_spill]] }
   0x6   :  { %6747 = sst [smem:[#allocation12_spill]] %s6698_s5  ;;  %s6758_s29 = sld [smem:[#allocation10_spill]] }
   0x7   :  { %6748 = sst [smem:[#allocation13_spill]] %s6699_s6 }
   0x8   :  { %6749 = sst [smem:[#allocation14_spill]] %s6700_s8 }
   0x9   :  { %6750 = sst [smem:[#allocation15_spill]] %s6701_s10  ;;  %s6771_s5 = sld [smem:[#allocation14_spill]] }
   0xa   :  { %6751 = sst [smem:[#allocation16_spill]] %s6702_s7  ;;  %s6755_s7 = sld [smem:[#allocation7_spill]]  ;;  %v89_v19 = vld [vmem:[%s6756_s1] sm:$0xff]  ;;  %v90_v52 = vld [vmem:[%s6756_s1 + $0x8] sm:$0xff] }
   0xb   :  { %6752 = sst [smem:[#allocation17_spill]] %s6703_s9  ;;  %4066 = vmatprep.mubr.msk.f32.mxu1 %vm132_vm0, %v89_v19  ;;  %v292_v26 = vld [vmem:[%s6757_s3 + $0x8] sm:$0xff]  ;;  %v295_v27 = vld [vmem:[%s6757_s3 + $0x20] sm:$0xff]  ;;  %v294_v36 = vld [vmem:[%s6757_s3 + $0x18] sm:$0xff]  ;;  %s6761_s9 = sld [smem:[#allocation11_spill]] }
   0xc   :  { %6753 = sst [smem:[#allocation18_spill]] %s6704_s11  ;;  %v5406_v34 = vpack.c.bf16 %v295_v27, %v292_v26  ;;  %v291_v35 = vld [vmem:[%s6757_s3] sm:$0xff]  ;;  %v298_v37 = vld [vmem:[%s6757_s3 + $0x38] sm:$0xff]  ;;  %v301_v39 = vld [vmem:[%s6757_s3 + $0x50] sm:$0xff]  ;;  %s6766_s11 = sld [smem:[#allocation12_spill]] }
   0xd   :  { %6754 = sst [smem:[#allocation19_spill]] %s6705_s12  ;;  %v5426_v43 = vpack.c.bf16 %v294_v36, %v291_v35  ;;  %v5435_v46 = vpack.c.bf16 %v301_v39, %v298_v37  ;;  %v297_v47 = vld [vmem:[%s6757_s3 + $0x30] sm:$0xff]  ;;  %v300_v48 = vld [vmem:[%s6757_s3 + $0x48] sm:$0xff]  ;;  %v307_v50 = vld [vmem:[%s6757_s3 + $0x80] sm:$0xff]  ;;  %s6770_s12 = sld [smem:[#allocation13_spill]] }
   0xe   :  { %v304_v49 = vld [vmem:[%s6757_s3 + $0x68] sm:$0xff]  ;;  %v5455_v53 = vpack.c.bf16 %v300_v48, %v297_v47  ;;  %v303_v55 = vld [vmem:[%s6757_s3 + $0x60] sm:$0xff]  ;;  %v306_v56 = vld [vmem:[%s6757_s3 + $0x78] sm:$0xff]  ;;  %s6773_s2 = sld [smem:[#allocation15_spill]]  ;;  %s6778_s8 = sld [smem:[#allocation18_spill]] }
   0xf   :  { %v5458_v54 = vpack.c.bf16 %v307_v50, %v304_v49  ;;  %v310_v57 = vld [vmem:[%s6757_s3 + $0x98] sm:$0xff]  ;;  %v313_v58 = vld [vmem:[%s6757_s3 + $0xb0] sm:$0xff]  ;;  %v296_v60 = vld [vmem:[%s6757_s3 + $0x28] sm:$0xff]  ;;  %v5480_v61 = vpack.c.bf16 %v306_v56, %v303_v55  ;;  %s6784_s1 = sld [smem:[#allocation19_spill]] }
  0x10   :  { %v92_v0 = vld [vmem:[%s6755_s7 + $0x8] sm:$0xff]  ;;  %v95_v1 = vld [vmem:[%s6755_s7 + $0x20] sm:$0xff]  ;;  %v94_v5 = vld [vmem:[%s6755_s7 + $0x18] sm:$0xff]  ;;  %v5489_v63 = vpack.c.bf16 %v313_v58, %v310_v57 }
  0x11   :  { %v91_v2 = vld [vmem:[%s6755_s7] sm:$0xff]  ;;  %v4489_v4 = vpack.c.bf16 %v95_v1, %v92_v0  ;;  %v98_v6 = vld [vmem:[%s6755_s7 + $0x38] sm:$0xff]  ;;  %v101_v7 = vld [vmem:[%s6755_s7 + $0x50] sm:$0xff] }
  0x12   :  { %v4491_v9 = vpack.c.bf16 %v94_v5, %v91_v2  ;;  %v4493_v10 = vpack.c.bf16 %v101_v7, %v98_v6  ;;  %v97_v11 = vld [vmem:[%s6755_s7 + $0x30] sm:$0xff]  ;;  %v100_v12 = vld [vmem:[%s6755_s7 + $0x48] sm:$0xff]  ;;  %v107_v14 = vld [vmem:[%s6755_s7 + $0x80] sm:$0xff] }
  0x13   :  { %v104_v13 = vld [vmem:[%s6755_s7 + $0x68] sm:$0xff]  ;;  %4490 = vmatprep.subr.bf16.mxu0 %v4489_v4  ;;  %v4495_v15 = vpack.c.bf16 %v100_v12, %v97_v11  ;;  %v103_v17 = vld [vmem:[%s6755_s7 + $0x60] sm:$0xff]  ;;  %v106_v18 = vld [vmem:[%s6755_s7 + $0x78] sm:$0xff] }
  0x14   :  { %4492 = vmatpush1.bf16.msra.mxu0 %v4491_v9  ;;  %v4497_v16 = vpack.c.bf16 %v107_v14, %v104_v13  ;;  %v110_v20 = vld [vmem:[%s6755_s7 + $0x98] sm:$0xff]  ;;  %v113_v21 = vld [vmem:[%s6755_s7 + $0xb0] sm:$0xff]  ;;  %v4499_v22 = vpack.c.bf16 %v106_v18, %v103_v17  ;;  %v112_v25 = vld [vmem:[%s6755_s7 + $0xa8] sm:$0xff]  ;;  %v6733_v9 = vmov 0.0|0.0  }
  0x15   :  { %4494 = vmatprep.subr.bf16.mxu0 %v4493_v10  ;;  %v4501_v23 = vpack.c.bf16 %v113_v21, %v110_v20  ;;  %v109_v24 = vld [vmem:[%s6755_s7 + $0x90] sm:$0xff]  ;;  %v96_v29 = vld [vmem:[%s6755_s7 + $0x28] sm:$0xff]  ;;  %v99_v32 = vld [vmem:[%s6755_s7 + $0x40] sm:$0xff] }
  0x16   :  { %v93_v28 = vld [vmem:[%s6755_s7 + $0x10] sm:$0xff]  ;;  %v4503_v31 = vpack.c.bf16 %v112_v25, %v109_v24  ;;  %v102_v33 = vld [vmem:[%s6755_s7 + $0x58] sm:$0xff]  ;;  %v108_v41 = vld [vmem:[%s6755_s7 + $0x88] sm:$0xff] }
  0x17   :  { %v4505_v30 = vpack.c.bf16 %v96_v29, %v93_v28  ;;  %v4509_v38 = vpack.c.bf16 %v102_v33, %v99_v32  ;;  %v105_v40 = vld [vmem:[%s6755_s7 + $0x70] sm:$0xff]  ;;  %v111_v44 = vld [vmem:[%s6755_s7 + $0xa0] sm:$0xff]  ;;  %v114_v45 = vld [vmem:[%s6755_s7 + $0xb8] sm:$0xff] }
  0x18   :  { %4496 = vmatpush1.bf16.msra.mxu0 %v4495_v15  ;;  %v4513_v42 = vpack.c.bf16 %v108_v41, %v105_v40  ;;  %v4517_v51 = vpack.c.bf16 %v114_v45, %v111_v44  ;;  %v293_v59 = vld [vmem:[%s6757_s3 + $0x10] sm:$0xff]  ;;  %v5486_v62 = vld [vmem:[%s6758_s29] sm:$0x3]  ;;  %v312_v1 = vld [vmem:[%s6757_s3 + $0xa8] sm:$0xff] }
  0x19   :  { %4498 = vmatprep.subr.bf16.mxu0 %v4497_v16  ;;  %4506 = vmatprep.subr.bf16.mxu1 %v4505_v30  ;;  %v309_v0 = vld [vmem:[%s6757_s3 + $0x90] sm:$0xff]  ;;  %vm581_vm1 = vcmp.gt.s32.totalorder %v5486_v62, 0  ;;  %vm584_vm2 = vcmp.gt.s32.totalorder %v5486_v62, 7  ;;  %vm789_vm3 = vcmp.gt.s32.totalorder %v5486_v62, 1  ;;  %v316_v2 = vld [vmem:[%s6757_s3 + $0xc8] sm:$0xff]  ;;  %v319_v4 = vld [vmem:[%s6757_s3 + $0xe0] sm:$0xff]  ;;  %v5506_v5 = vpack.c.bf16 %v296_v60, %v293_v59 }
  0x1a   :  { %4508 = vmatpush3.bf16.msra.mxu1 %v4505_v30  ;;  %v3711_v6 = vsel %vm581_vm1, 1.0, %v6731_v3  ;;  %v3712_v7 = vsel %vm584_vm2, 1.0, %v6731_v3  ;;  %vm792_vm4 = vcmp.gt.s32.totalorder %v5486_v62, 6  ;;  %v299_v10 = vld [vmem:[%s6757_s3 + $0x40] sm:$0xff]  ;;  %v302_v11 = vld [vmem:[%s6757_s3 + $0x58] sm:$0xff]  ;;  %v5519_v13 = vpack.c.bf16 %v312_v1, %v309_v0  ;;  %v325_v20 = vld [vmem:[%s6757_s3 + $0x110] sm:$0xff] }
  0x1b   :  { %4510 = vmatprep.subr.bf16.mxu1 %v4509_v38  ;;  %v4995_v12 = vpack.i.bf16 %v3712_v7, %v3711_v6  ;;  %v3715_v14 = vsel %vm789_vm3, 1.0, %v6731_v3  ;;  %v3716_v15 = vsel %vm792_vm4, 1.0, %v6731_v3  ;;  %v5524_v16 = vpack.c.bf16 %v319_v4, %v316_v2  ;;  %v315_v17 = vld [vmem:[%s6757_s3 + $0xc0] sm:$0xff]  ;;  %v318_v18 = vld [vmem:[%s6757_s3 + $0xd8] sm:$0xff]  ;;  %v321_v27 = vld [vmem:[%s6757_s3 + $0xf0] sm:$0xff] }
  0x1c   :  { %4500 = vmatpush1.bf16.msra.mxu0 %v4499_v22  ;;  %v5540_v21 = vpack.c.bf16 %v302_v11, %v299_v10  ;;  %v305_v22 = vld [vmem:[%s6757_s3 + $0x70] sm:$0xff]  ;;  %v5000_v24 = vpack.i.bf16 %v3716_v15, %v3715_v14  ;;  %v5552_v25 = vpack.c.bf16 %v318_v18, %v315_v17  ;;  %v324_v28 = vld [vmem:[%s6757_s3 + $0x108] sm:$0xff]  ;;  %v331_v30 = vld [vmem:[%s6757_s3 + $0x140] sm:$0xff]  ;;  %vm989_vm6 = vcmp.gt.s32.totalorder %v5486_v62, 2 }
  0x1d   :  { %4502 = vmatprep.subr.bf16.mxu0 %v4501_v23  ;;  %v308_v23 = vld [vmem:[%s6757_s3 + $0x88] sm:$0xff]  ;;  %4996 = vperm.xlu0 %4994, %v4995_v12   ;;  %v311_v32 = vld [vmem:[%s6757_s3 + $0xa0] sm:$0xff]  ;;  %v314_v33 = vld [vmem:[%s6757_s3 + $0xb8] sm:$0xff]  ;;  %v5580_v35 = vpack.c.bf16 %v324_v28, %v321_v27  ;;  %vm992_vm7 = vcmp.gt.s32.totalorder %v5486_v62, 5  ;;  %v3719_v2 = vsel %vm989_vm6, 1.0, %v6731_v3  ;;  %v117_v7 = vlaneseq }
  0x1e   :  { %4512 = vmatpush3.bf16.msra.mxu1 %v4509_v38  ;;  %v328_v29 = vld [vmem:[%s6757_s3 + $0x128] sm:$0xff]  ;;  %v327_v37 = vld [vmem:[%s6757_s3 + $0x120] sm:$0xff]  ;;  %v330_v38 = vld [vmem:[%s6757_s3 + $0x138] sm:$0xff]  ;;  %v5598_v41 = vpack.c.bf16 %v314_v33, %v311_v32  ;;  %v3720_v4 = vsel %vm992_vm7, 1.0, %v6731_v3  ;;  %vm1189_vm11 = vcmp.gt.s32.totalorder %v5486_v62, 3  ;;  %vm1192_vm12 = vcmp.gt.s32.totalorder %v5486_v62, 4 }
  0x1f   :  { %4514 = vmatprep.subr.bf16.mxu1 %v4513_v42  ;;  %v5583_v36 = vpack.c.bf16 %v331_v30, %v328_v29  ;;  %v334_v39 = vld [vmem:[%s6757_s3 + $0x158] sm:$0xff]  ;;  %v337_v40 = vld [vmem:[%s6757_s3 + $0x170] sm:$0xff]  ;;  %v320_v44 = vld [vmem:[%s6757_s3 + $0xe8] sm:$0xff]  ;;  %v5608_v45 = vpack.c.bf16 %v330_v38, %v327_v37  ;;  %v5006_v6 = vpack.i.bf16 %v3720_v4, %v3719_v2  ;;  %v5702_v10 = vshrl.u32 %v117_v7, 7 }
  0x20   :  { %4504 = vmatpush1.bf16.msra.mxu0 %v4503_v31  ;;  %v5570_v31 = vpack.c.bf16 %v308_v23, %v305_v22  ;;  %v5611_v47 = vpack.c.bf16 %v337_v40, %v334_v39  ;;  %v333_v48 = vld [vmem:[%s6757_s3 + $0x150] sm:$0xff]  ;;  %v336_v49 = vld [vmem:[%s6757_s3 + $0x168] sm:$0xff]  ;;  %v335_v60 = vld [vmem:[%s6757_s3 + $0x160] sm:$0xff]  ;;  %v5707_v12 = vand.u32 127, %v117_v7  ;;  %vm2479_vm4 = vcmask 130048  }
  0x21   :  { %4522 = vmatprep.subr.bf16.mxu0 %v5406_v34  ;;  %5001 = vperm.xlu0 %4994, %v5000_v24   ;;  %v5630_v55 = vpack.c.bf16 %v336_v49, %v333_v48  ;;  %v329_v57 = vld [vmem:[%s6757_s3 + $0x130] sm:$0xff]  ;;  %v332_v58 = vld [vmem:[%s6757_s3 + $0x148] sm:$0xff]  ;;  %v338_v0 = vld [vmem:[%s6757_s3 + $0x178] sm:$0xff]  ;;  %6759 = vst [vmem:[#allocation2_spill] sm:$0xff] %v5702_v10  ;;  %v5705_v11 = vsub.s32 0, %v5702_v10  ;;  %v5713_v15 = vsub.s32 1, %v5702_v10 }
  0x22   :  { %4516 = vmatpush3.bf16.msra.mxu1 %v4513_v42  ;;  %v317_v42 = vld [vmem:[%s6757_s3 + $0xd0] sm:$0xff]  ;;  %v5646_v59 = vpack.c.bf16 %v332_v58, %v329_v57  ;;  %v5660_v1 = vpack.c.bf16 %v338_v0, %v335_v60  ;;  %5007 = vperm.xlu1 %5005, %v5006_v6   ;;  %v115_v14 = vld [vmem:[%s6761_s9] sm:$0x7]  ;;  %v359_v18 = vadd.s32 128, %v5707_v12  ;;  %v5719_v24 = vsub.s32 2, %v5702_v10  ;;  %s6774_s9 = sld [smem:[#allocation16_spill]]  ;;  %vm6308_vm1 = vmpackc.low %vm132_vm0, %vm132_vm0 }
  0x23   :  { %3705 = vmatmul.mubr.msk.f32.vlgmr.msra.gmra.mrb[0].mxu0 %vm132_vm0, %v89_v19  ;;  %4518 = vmatprep.subr.bf16.mxu1 %v4517_v51  ;;  %v322_v19 = vld [vmem:[%s6757_s3 + $0xf8] sm:$0xff]  ;;  %v5620_v50 = vpack.c.bf16 %v320_v44, %v317_v42  ;;  %6760 = vst [vmem:[#allocation3_spill] sm:$0xff] %v5705_v11  ;;  %6762 = vst [vmem:[#allocation4_spill] sm:$0xff] %v5713_v15  ;;  %v120_v17 = vrot.slane %v115_v14, %v5705_v11  ;;  %v360_v29 = vadd.s32 256, %v5707_v12 }
  0x24   :  { %4524 = vmatpush1.bf16.msra.mxu0 %v5426_v43  ;;  %209 = vmatprep.mubr.f32.mxu0 %v6731_v3  ;;  %v5555_v26 = vpack.c.bf16 %v325_v20, %v322_v19  ;;  %v124_v19 = vrot.slane %v115_v14, %v5713_v15  ;;  %6763 = vst [vmem:[#allocation5_spill] sm:$0xff] %v5719_v24  ;;  %v372_v27 = vand.u32 127, %v359_v18  ;;  %vm397_vm8 = vcmp.lt.s32.totalorder %v5707_v12, 64 }
  0x25   :  { %4526 = vmatprep.subr.bf16.mxu0 %v5435_v46  ;;  %v128_v39 = vrot.slane %v115_v14, %v5719_v24  ;;  %v379_v44 = vand.u32 127, %v360_v29 }
  0x26   :  { %4520 = vmatpush3.bf16.msra.mxu1 %v4517_v51  ;;  %v323_v51 = vld [vmem:[%s6757_s3 + $0x100] sm:$0xff]  ;;  %vm5724_vm9 = vcmp.lt.s32.totalorder %v372_v27, 64 }
  0x27   :  { %3706 = vmatmul.mubr.msk.f32.gmra.mrb[2].mxu0 %vm132_vm0, %v90_v52  ;;  %4553 = vmatprep.subr.bf16.mxu1 %v6733_v9  ;;  %vm399_vm10 = vcmp.lt.s32.totalorder %v379_v44, 64 }
  0x28   :  { %4528 = vmatpush1.bf16.msra.mxu0 %v5455_v53  ;;  %483 = vmatprep.mubr.f32.mxu0 %v6731_v3 }
  0x29   :  { %4530 = vmatprep.subr.bf16.mxu0 %v5458_v54  ;;  %4067 = vmatmul.mubr.msk.f32.vlgmr.msra.gmra.mrb[0].mxu1 %vm132_vm0, %v90_v52  ;;  %v326_v52 = vld [vmem:[%s6757_s3 + $0x118] sm:$0xff] }
  0x2a   :  { %4555 = vmatpush3.bf16.msra.mxu1 %v5506_v5  ;;  %4101 = vmatprep.mubr.msk.f32.mxu1 %vm5186_vm5, %v6731_v3  ;;  %v5634_v56 = vpack.c.bf16 %v326_v52, %v323_v51 }
  0x2b   :  { %4556 = vmatprep.subr.bf16.mxu1 %v6733_v9 }
  0x2c   :  { %4532 = vmatpush1.bf16.msra.mxu0 %v5480_v61 }
  0x2d   :  { %4534 = vmatprep.subr.bf16.mxu0 %v5489_v63 }
  0x2e   :  { %4558 = vmatpush3.bf16.msra.mxu1 %v5540_v21 }
  0x2f   :  { %4559 = vmatprep.subr.bf16.mxu1 %v6733_v9 }
  0x30   :  { %4536 = vmatpush1.bf16.msra.mxu0 %v5519_v13 }
  0x31   :  { %4538 = vmatprep.subr.bf16.mxu0 %v5524_v16 }
  0x32   :  { %4561 = vmatpush3.bf16.msra.mxu1 %v5570_v31 }
  0x33   :  { %4562 = vmatprep.subr.bf16.mxu1 %v6733_v9 }
  0x34   :  { %4540 = vmatpush1.bf16.msra.mxu0 %v5552_v25 }
  0x35   :  { %4542 = vmatprep.subr.bf16.mxu0 %v5555_v26 }
  0x36   :  { %4564 = vmatpush3.bf16.msra.mxu1 %v5598_v41 }
  0x37   :  { %4565 = vmatprep.subr.bf16.mxu1 %v6733_v9 }
  0x38   :  { %4544 = vmatpush1.bf16.msra.mxu0 %v5580_v35 }
  0x39   :  { %4546 = vmatprep.subr.bf16.mxu0 %v5583_v36 }
  0x3a   :  { %4567 = vmatpush3.bf16.msra.mxu1 %v5620_v50 }
  0x3b   :  { %4568 = vmatprep.subr.bf16.mxu1 %v6733_v9 }
  0x3c   :  { %4548 = vmatpush1.bf16.msra.mxu0 %v5608_v45 }
  0x3d   :  { %4550 = vmatprep.subr.bf16.mxu0 %v5611_v47 }
  0x3e   :  { %4570 = vmatpush3.bf16.msra.mxu1 %v5634_v56 }
  0x3f   :  { %4571 = vmatprep.subr.bf16.mxu1 %v6733_v9 }
  0x40   :  { %4552 = vmatpush1.bf16.msra.mxu0 %v5630_v55 }
  0x41   :  { %4578 = vmatprep.subr.bf16.mxu0 %v5406_v34 }
  0x42   :  { %4573 = vmatpush3.bf16.msra.mxu1 %v5646_v59 }
  0x43   :  { %484 = vmatmul.mubr.f32.vlgmr.msra.gmra.mrb[4].mxu0 %v6731_v3  ;;  %4574 = vmatprep.subr.bf16.mxu1 %v6733_v9 }
  0x44   :  { %4580 = vmatpush1.bf16.msra.mxu0 %v5426_v43  ;;  %679 = vmatprep.mubr.f32.mxu0 %v6731_v3 }
  0x45   :  { %4582 = vmatprep.subr.bf16.mxu0 %v5435_v46 }
  0x46   :  { %4576 = vmatpush3.bf16.msra.mxu1 %v5660_v1 }
  0x47   :  { %4609 = vmatprep.subr.bf16.mxu1 %v6733_v9 }
  0x48   :  { %4584 = vmatpush1.bf16.msra.mxu0 %v5455_v53 }
  0x49   :  { %4586 = vmatprep.subr.bf16.mxu0 %v5458_v54  ;;  %4102 = vmatmul.mubr.f32.vlgmr.msra.gmra.mrb[2].mxu1 %v6731_v3 }
  0x4a   :  { %4611 = vmatpush3.bf16.msra.mxu1 %v5506_v5  ;;  %4136 = vmatprep.mubr.msk.f32.mxu1 %vm5186_vm5, %v6731_v3 }
  0x4b   :  { %4612 = vmatprep.subr.bf16.mxu1 %v6733_v9 }
  0x4c   :  { %4588 = vmatpush1.bf16.msra.mxu0 %v5480_v61 }
  0x4d   :  { %4590 = vmatprep.subr.bf16.mxu0 %v5489_v63 }
  0x4e   :  { %4614 = vmatpush3.bf16.msra.mxu1 %v5540_v21 }
  0x4f   :  { %4615 = vmatprep.subr.bf16.mxu1 %v6733_v9 }
  0x50   :  { %4592 = vmatpush1.bf16.msra.mxu0 %v5519_v13 }
  0x51   :  { %4594 = vmatprep.subr.bf16.mxu0 %v5524_v16 }
  0x52   :  { %4617 = vmatpush3.bf16.msra.mxu1 %v5570_v31 }
  0x53   :  { %4618 = vmatprep.subr.bf16.mxu1 %v6733_v9 }
  0x54   :  { %4596 = vmatpush1.bf16.msra.mxu0 %v5552_v25 }
  0x55   :  { %4598 = vmatprep.subr.bf16.mxu0 %v5555_v26 }
  0x56   :  { %4620 = vmatpush3.bf16.msra.mxu1 %v5598_v41 }
  0x57   :  { %4621 = vmatprep.subr.bf16.mxu1 %v6733_v9 }
  0x58   :  { %4600 = vmatpush1.bf16.msra.mxu0 %v5580_v35 }
  0x59   :  { %4602 = vmatprep.subr.bf16.mxu0 %v5583_v36 }
  0x5a   :  { %4623 = vmatpush3.bf16.msra.mxu1 %v5620_v50 }
  0x5b   :  { %4624 = vmatprep.subr.bf16.mxu1 %v6733_v9 }
  0x5c   :  { %4604 = vmatpush1.bf16.msra.mxu0 %v5608_v45 }
  0x5d   :  { %4606 = vmatprep.subr.bf16.mxu0 %v5611_v47 }
  0x5e   :  { %4626 = vmatpush3.bf16.msra.mxu1 %v5634_v56 }
  0x5f   :  { %4627 = vmatprep.subr.bf16.mxu1 %v6733_v9 }
  0x60   :  { %4608 = vmatpush1.bf16.msra.mxu0 %v5630_v55 }
  0x61   :  { %4634 = vmatprep.subr.bf16.mxu0 %v5406_v34 }
  0x62   :  { %4629 = vmatpush3.bf16.msra.mxu1 %v5646_v59 }
  0x63   :  { %4630 = vmatprep.subr.bf16.mxu1 %v6733_v9 }
  0x66   :  { %4632 = vmatpush3.bf16.msra.mxu1 %v5660_v1 }
  0x67   :  { %4665 = vmatprep.subr.bf16.mxu1 %v6733_v9 }
  0xf6   :  { %v205_v20 = vpop.f32.mrb[0].mxu0 }
  0xf7   :  { %v206_v22 = vadd.f32 %v205_v20, %v120_v17  ;;  %v207_v23 = vpop.f32.mrb[1].mxu0 }
  0xf8   :  { %v208_v28 = vadd.f32 %v207_v23, %v124_v19 }
  0xf9   :  { %v1218_v30 = vrot.slane %v206_v22, 6  ;;  %v1396_v32 = vrot.slane %v206_v22, 2 }
  0xfa   :  { %v211_v33 = vpop.f32.mrb[2].mxu0  ;;  %v1219_v48 = vrot.slane %v208_v28, 6  ;;  %v1397_v49 = vrot.slane %v208_v28, 2 }
  0xfb   :  { %v212_v37 = vadd.f32 %v211_v33, %v120_v17  ;;  %v213_v38 = vpop.f32.mrb[3].mxu0 }
  0xfc   :  { %v214_v42 = vadd.f32 %v213_v38, %v124_v19  ;;  %v4068_v14 = vpop.f32.mrb[0].mxu1 }
  0xfd   :  { %v410_v51 = vrot.slane %v212_v37, 6  ;;  %v606_v52 = vrot.slane %v212_v37, 2  ;;  %v5730_v57 = vsel %vm397_vm8, %v212_v37, %v1218_v30  ;;  %v5734_v58 = vsel %vm397_vm8, %v212_v37, %v1396_v32  ;;  %v282_v20 = vpop.f32.mrb[1].mxu1 }
  0xfe   :  { %v411_v60 = vrot.slane %v214_v42, 6  ;;  %v607_v0 = vrot.slane %v214_v42, 2  ;;  %v5738_v2 = vsel %vm5724_vm9, %v214_v42, %v1219_v48  ;;  %v5742_v4 = vsel %vm5724_vm9, %v214_v42, %v1397_v49 }
  0xff   :  { %v5746_v6 = vsel %vm397_vm8, %v206_v22, %v410_v51  ;;  %v5750_v7 = vsel %vm397_vm8, %v206_v22, %v606_v52  ;;  %v288_v19 = vadd.f32 %v4068_v14, %v128_v39  ;;  %v283_v23 = vadd.f32 %v282_v20, %v128_v39 }
 0x100   :  { %v5754_v17 = vsel %vm5724_vm9, %v208_v28, %v411_v60  ;;  %v5758_v18 = vsel %vm5724_vm9, %v208_v28, %v607_v0  ;;  %v339_v28 = vld [vmem:[%s6766_s11] sm:$0x7]  ;;  %s6775_s11 = sld [smem:[#allocation17_spill]] }
 0x101   :  { %v412_v27 = vrot.slane %v288_v19, 6  ;;  %v608_v29 = vrot.slane %v288_v19, 2  ;;  %v1220_v30 = vrot.slane %v283_v23, 6  ;;  %v1398_v32 = vrot.slane %v283_v23, 2 }
 0x102   :  { %v5772_v40 = vrot.slane %v339_v28, %v5705_v11  ;;  %v5775_v39 = vrot.slane %v339_v28, %v5713_v15 }
 0x103   :  { %v5760_v33 = vsel %vm399_vm10, %v283_v23, %v412_v27  ;;  %v5762_v22 = vsel %vm399_vm10, %v283_v23, %v608_v29  ;;  %v5764_v37 = vsel %vm399_vm10, %v288_v19, %v1220_v30  ;;  %v5766_v38 = vsel %vm399_vm10, %v288_v19, %v1398_v32 }
 0x104   :  { %v5782_v27 = vrot.slane %v339_v28, %v5719_v24 }
 0x116   :  { %v485_v42 = vpop.f32.mrb[4].mxu0 }
 0x117   :  { %v486_v44 = vadd.f32 %v485_v42, %v5772_v40  ;;  %v487_v48 = vpop.f32.mrb[5].mxu0 }
 0x118   :  { %v488_v49 = vadd.f32 %v487_v48, %v5775_v39 }
 0x119   :  { %v560_v51 = vadd.f32 %v486_v44, %v5746_v6 }
 0x11a   :  { %v567_v60 = vadd.f32 %v488_v49, %v5754_v17  ;;  %v4997_v49 = vpop.permute.xlu0 %4996 }
 0x11b   :  { %v3709_v52 = vmul.f32 -1.442695, %v560_v51  ;;  %v5786_v51 = vunpack.i.h.bf16 %v4997_v49 }
 0x11c   :  { %v3710_v0 = vmul.f32 -1.442695, %v567_v60  ;;  %v556_v14 = vpop.f32.mrb[2].mxu1 }
 0x11d   :  { %5075 = vpow2.f32 %v3709_v52  ;;  %v4103_v19 = vpop.f32.mrb[3].mxu1  ;;  %v557_v32 = vadd.f32 %v556_v14, %v5782_v27  ;;  %v5788_v52 = vunpack.i.l.bf16 %v4997_v49 }
 0x11e   :  { %5077 = vpow2.f32 %v3710_v0 }
 0x11f   :  { %6767 = vst [vmem:[#allocation6_spill] sm:$0xff] %v5788_v52  ;;  %v599_v28 = vsel %vm397_vm8, %v5788_v52, %v5786_v51 }
 0x120   :  { %v601_v19 = vsub.f32 1.0, %v599_v28 }
 0x127   :  { %v5076_v20 = vpop.eup %5075 }
 0x128   :  { %v564_v23 = vadd.f32 1.0, %v5076_v20  ;;  %v5078_v29 = vpop.eup %5077 }
 0x129   :  { %v571_v30 = vadd.f32 1.0, %v5078_v29 }
 0x12a   :  { %5079 = vrcp.f32 %v564_v23 }
 0x12b   :  { %5081 = vrcp.f32 %v571_v30  ;;  %v602_v30 = vmul.f32 0.0, %v601_v19 }
 0x134   :  { %v5080_v42 = vpop.eup %5079 }
 0x135   :  { %v574_v44 = vmul.f32 %v5080_v42, %v557_v32  ;;  %v5082_v60 = vpop.eup %5081 }
 0x136   :  { %v577_v0 = vsub.f32 1.0, %v5082_v60  ;;  %v579_v23 = vmul.f32 0.0, %v5082_v60 }
 0x137   :  { %v575_v48 = vadd.f32 %v574_v44, %v5760_v33  ;;  %v3723_v44 = vsel %vm1189_vm11, 1.0, %v6731_v3 }
 0x139   :  { %5083 = vtanh.f32 %v575_v48  ;;  %v3724_v48 = vsel %vm1192_vm12, 1.0, %v6731_v3 }
 0x13a   :  { %v5011_v49 = vpack.i.bf16 %v3724_v48, %v3723_v44 }
 0x13c   :  { %5012 = vperm.xlu1 %5005, %v5011_v49  }
 0x143   :  { %v5084_v14 = vpop.eup %5083 }
 0x144   :  { %v578_v20 = vmul.f32 %v5084_v14, %v577_v0 }
 0x146   :  { %v580_v29 = vadd.f32 %v579_v23, %v578_v20 }
 0x148   :  { %v600_v32 = vmul.f32 %v599_v28, %v580_v29 }
 0x14a   :  { %v5794_v42 = vadd.f32 %v602_v30, %v600_v32 }
 0x14c   :  { %680 = vmatmul.mubr.f32.vlgmr.msra.gmra.mrb[6].mxu0 %v5794_v42  ;;  %4137 = vmatmul.mubr.f32.vlgmr.msra.gmra.mrb[4].mxu1 %v5794_v42 }
 0x14d   :  { %4636 = vmatpush1.bf16.msra.mxu0 %v5426_v43  ;;  %4667 = vmatpush3.bf16.msra.mxu1 %v5506_v5 }
 0x14e   :  { %4638 = vmatprep.subr.bf16.mxu0 %v5435_v46  ;;  %4668 = vmatprep.subr.bf16.mxu1 %v6733_v9 }
 0x14f   :  { %879 = vmatprep.mubr.f32.mxu0 %v6731_v3  ;;  %4171 = vmatprep.mubr.msk.f32.mxu1 %vm5186_vm5, %v6731_v3 }
 0x151   :  { %4640 = vmatpush1.bf16.msra.mxu0 %v5455_v53  ;;  %4670 = vmatpush3.bf16.msra.mxu1 %v5540_v21 }
 0x152   :  { %4642 = vmatprep.subr.bf16.mxu0 %v5458_v54  ;;  %4671 = vmatprep.subr.bf16.mxu1 %v6733_v9 }
 0x155   :  { %4644 = vmatpush1.bf16.msra.mxu0 %v5480_v61  ;;  %4673 = vmatpush3.bf16.msra.mxu1 %v5570_v31 }
 0x156   :  { %4646 = vmatprep.subr.bf16.mxu0 %v5489_v63  ;;  %4674 = vmatprep.subr.bf16.mxu1 %v6733_v9 }
 0x159   :  { %4648 = vmatpush1.bf16.msra.mxu0 %v5519_v13  ;;  %4676 = vmatpush3.bf16.msra.mxu1 %v5598_v41 }
 0x15a   :  { %4650 = vmatprep.subr.bf16.mxu0 %v5524_v16  ;;  %4677 = vmatprep.subr.bf16.mxu1 %v6733_v9 }
 0x15d   :  { %4652 = vmatpush1.bf16.msra.mxu0 %v5552_v25  ;;  %4679 = vmatpush3.bf16.msra.mxu1 %v5620_v50 }
 0x15e   :  { %4654 = vmatprep.subr.bf16.mxu0 %v5555_v26  ;;  %4680 = vmatprep.subr.bf16.mxu1 %v6733_v9 }
 0x161   :  { %4656 = vmatpush1.bf16.msra.mxu0 %v5580_v35  ;;  %4682 = vmatpush3.bf16.msra.mxu1 %v5634_v56 }
 0x162   :  { %4658 = vmatprep.subr.bf16.mxu0 %v5583_v36  ;;  %4683 = vmatprep.subr.bf16.mxu1 %v6733_v9 }
 0x165   :  { %4660 = vmatpush1.bf16.msra.mxu0 %v5608_v45  ;;  %4685 = vmatpush3.bf16.msra.mxu1 %v5646_v59 }
 0x166   :  { %4662 = vmatprep.subr.bf16.mxu0 %v5611_v47  ;;  %4686 = vmatprep.subr.bf16.mxu1 %v6733_v9 }
 0x169   :  { %4664 = vmatpush1.bf16.msra.mxu0 %v5630_v55  ;;  %4688 = vmatpush3.bf16.msra.mxu1 %v5660_v1 }
 0x16a   :  { %4690 = vmatprep.subr.bf16.mxu0 %v5406_v34  ;;  %4721 = vmatprep.subr.bf16.mxu1 %v6733_v9 }
 0x21f   :  { %v681_v60 = vpop.f32.mrb[6].mxu0  ;;  %v752_v28 = vpop.f32.mrb[4].mxu1 }
 0x220   :  { %v682_v0 = vadd.f32 %v681_v60, %v5772_v40  ;;  %v683_v19 = vpop.f32.mrb[7].mxu0  ;;  %v4138_v14 = vpop.f32.mrb[5].mxu1  ;;  %v753_v60 = vadd.f32 %v752_v28, %v5782_v27 }
 0x221   :  { %v684_v20 = vadd.f32 %v683_v19, %v5775_v39 }
 0x222   :  { %v757_v23 = vrot.slane %v682_v0, 6  ;;  %v777_v14 = vrot.slane %v753_v60, 6  ;;  %v785_v0 = vrot.slane %v5794_v42, 6 }
 0x223   :  { %v767_v29 = vrot.slane %v684_v20, 6 }
 0x224   :  { %v759_v30 = vadd.f32 %v757_v23, %v5750_v7 }
 0x225   :  { %v769_v62 = vadd.f32 %v767_v29, %v5758_v18 }
 0x226   :  { %v3713_v32 = vmul.f32 -1.442695, %v759_v30  ;;  %v5002_v30 = vpop.permute.xlu0 %5001 }
 0x227   :  { %v3714_v8 = vmul.f32 -1.442695, %v769_v62  ;;  %v5846_v62 = vunpack.i.l.bf16 %v5002_v30 }
 0x228   :  { %5085 = vpow2.f32 %v3713_v32 }
 0x229   :  { %5087 = vpow2.f32 %v3714_v8  ;;  %v5844_v8 = vunpack.i.h.bf16 %v5002_v30  ;;  %v6769_v30 = vmov 0.0  }
 0x22b   :  { %v805_v28 = vsel %vm397_vm8, %v5846_v62, %v5844_v8 }
 0x232   :  { %v5086_v44 = vpop.eup %5085 }
 0x233   :  { %v5088_v48 = vpop.eup %5087  ;;  %v763_v49 = vadd.f32 1.0, %v5086_v44 }
 0x234   :  { %v773_v3 = vadd.f32 1.0, %v5088_v48 }
 0x235   :  { %5089 = vrcp.f32 %v763_v49  ;;  %v810_v49 = vsub.f32 1.0, %v805_v28 }
 0x236   :  { %5091 = vrcp.f32 %v773_v3 }
 0x23f   :  { %v5090_v19 = vpop.eup %5089 }
 0x240   :  { %v5092_v20 = vpop.eup %5091  ;;  %v779_v23 = vmul.f32 %v5090_v19, %v777_v14  ;;  %v811_v14 = vmul.f32 %v810_v49, %v5794_v42 }
 0x241   :  { %v787_v9 = vmul.f32 %v5092_v20, %v785_v0  ;;  %v782_v32 = vsub.f32 1.0, %v5092_v20 }
 0x242   :  { %v780_v29 = vadd.f32 %v779_v23, %v5762_v22  ;;  %v6768_v23 = vmov 0.0|0.0  }
 0x244   :  { %5093 = vtanh.f32 %v780_v29 }
 0x24e   :  { %v5094_v44 = vpop.eup %5093 }
 0x24f   :  { %v783_v3 = vmul.f32 %v5094_v44, %v782_v32 }
 0x251   :  { %v788_v48 = vadd.f32 %v787_v9, %v783_v3  ;;  %v604_v9 = vmul.f32 %v5788_v52, %v5794_v42 }
 0x253   :  { %v807_v60 = vrot.slane %v788_v48, 2 }
 0x255   :  { %v809_v19 = vmul.f32 %v807_v60, %v805_v28 }
 0x257   :  { %v5853_v0 = vadd.f32 %v811_v14, %v809_v19 }
 0x259   :  { %880 = vmatmul.mubr.f32.vlgmr.msra.gmra.mrb[8].mxu0 %v5853_v0  ;;  %4172 = vmatmul.mubr.f32.vlgmr.msra.gmra.mrb[6].mxu1 %v5853_v0  ;;  %v813_v20 = vmul.f32 %v5846_v62, %v5853_v0 }
 0x25a   :  { %4692 = vmatpush1.bf16.msra.mxu0 %v5426_v43  ;;  %4723 = vmatpush3.bf16.msra.mxu1 %v5506_v5 }
 0x25b   :  { %4694 = vmatprep.subr.bf16.mxu0 %v5435_v46  ;;  %4724 = vmatprep.subr.bf16.mxu1 %v6768_v23  ;;  %v1958_v29 = vrot.slane %v813_v20, 6 }
 0x25c   :  { %1079 = vmatprep.mubr.f32.mxu0 %v6769_v30  ;;  %4206 = vmatprep.mubr.msk.f32.mxu1 %vm5186_vm5, %v6769_v30 }
 0x25d   :  { %v5869_v32 = vsel %vm1975_vm13, %v604_v9, %v1958_v29 }
 0x25e   :  { %4696 = vmatpush1.bf16.msra.mxu0 %v5455_v53  ;;  %4726 = vmatpush3.bf16.msra.mxu1 %v5540_v21 }
 0x25f   :  { %4698 = vmatprep.subr.bf16.mxu0 %v5458_v54  ;;  %4727 = vmatprep.subr.bf16.mxu1 %v6768_v23 }
 0x262   :  { %4700 = vmatpush1.bf16.msra.mxu0 %v5480_v61  ;;  %4729 = vmatpush3.bf16.msra.mxu1 %v5570_v31 }
 0x263   :  { %4702 = vmatprep.subr.bf16.mxu0 %v5489_v63  ;;  %4730 = vmatprep.subr.bf16.mxu1 %v6768_v23 }
 0x266   :  { %4704 = vmatpush1.bf16.msra.mxu0 %v5519_v13  ;;  %4732 = vmatpush3.bf16.msra.mxu1 %v5598_v41 }
 0x267   :  { %4706 = vmatprep.subr.bf16.mxu0 %v5524_v16  ;;  %4733 = vmatprep.subr.bf16.mxu1 %v6768_v23 }
 0x26a   :  { %4708 = vmatpush1.bf16.msra.mxu0 %v5552_v25  ;;  %4735 = vmatpush3.bf16.msra.mxu1 %v5620_v50 }
 0x26b   :  { %4710 = vmatprep.subr.bf16.mxu0 %v5555_v26  ;;  %4736 = vmatprep.subr.bf16.mxu1 %v6768_v23 }
 0x26e   :  { %4712 = vmatpush1.bf16.msra.mxu0 %v5580_v35  ;;  %4738 = vmatpush3.bf16.msra.mxu1 %v5634_v56 }
 0x26f   :  { %4714 = vmatprep.subr.bf16.mxu0 %v5583_v36  ;;  %4739 = vmatprep.subr.bf16.mxu1 %v6768_v23 }
 0x272   :  { %4716 = vmatpush1.bf16.msra.mxu0 %v5608_v45  ;;  %4741 = vmatpush3.bf16.msra.mxu1 %v5646_v59 }
 0x273   :  { %4718 = vmatprep.subr.bf16.mxu0 %v5611_v47  ;;  %4742 = vmatprep.subr.bf16.mxu1 %v6768_v23 }
 0x276   :  { %4720 = vmatpush1.bf16.msra.mxu0 %v5630_v55  ;;  %4744 = vmatpush3.bf16.msra.mxu1 %v5660_v1 }
 0x277   :  { %4746 = vmatprep.subr.bf16.mxu0 %v5406_v34  ;;  %4777 = vmatprep.subr.bf16.mxu1 %v6768_v23 }
 0x32c   :  { %v881_v44 = vpop.f32.mrb[8].mxu0  ;;  %v952_v3 = vpop.f32.mrb[6].mxu1 }
 0x32d   :  { %v882_v28 = vadd.f32 %v881_v44, %v5772_v40  ;;  %v883_v48 = vpop.f32.mrb[9].mxu0  ;;  %v4173_v49 = vpop.f32.mrb[7].mxu1  ;;  %v953_v44 = vadd.f32 %v952_v3, %v5782_v27 }
 0x32e   :  { %v884_v60 = vadd.f32 %v883_v48, %v5775_v39 }
 0x32f   :  { %v957_v14 = vrot.slane %v882_v28, 4  ;;  %v977_v49 = vrot.slane %v953_v44, 4  ;;  %v985_v28 = vrot.slane %v5853_v0, 4 }
 0x330   :  { %v967_v19 = vrot.slane %v884_v60, 4 }
 0x331   :  { %v959_v20 = vadd.f32 %v957_v14, %v5746_v6 }
 0x332   :  { %v969_v9 = vadd.f32 %v967_v19, %v5754_v17  ;;  %v5008_v19 = vpop.permute.xlu1 %5007 }
 0x333   :  { %v3717_v29 = vmul.f32 -1.442695, %v959_v20  ;;  %v5908_v20 = vunpack.i.l.bf16 %v5008_v19 }
 0x334   :  { %v3718_v15 = vmul.f32 -1.442695, %v969_v9 }
 0x335   :  { %5095 = vpow2.f32 %v3717_v29 }
 0x336   :  { %5097 = vpow2.f32 %v3718_v15  ;;  %v5906_v15 = vunpack.i.h.bf16 %v5008_v19 }
 0x33f   :  { %v5096_v24 = vpop.eup %5095 }
 0x340   :  { %v5098_v11 = vpop.eup %5097  ;;  %v963_v10 = vadd.f32 1.0, %v5096_v24  ;;  %v1005_v24 = vsel %vm397_vm8, %v5908_v20, %v5906_v15 }
 0x341   :  { %v973_v52 = vadd.f32 1.0, %v5098_v11  ;;  %v1010_v3 = vsub.f32 1.0, %v1005_v24 }
 0x342   :  { %5099 = vrcp.f32 %v963_v10 }
 0x343   :  { %5101 = vrcp.f32 %v973_v52  ;;  %v1011_v44 = vmul.f32 %v1010_v3, %v5853_v0 }
 0x34c   :  { %v5100_v48 = vpop.eup %5099 }
 0x34d   :  { %v5102_v60 = vpop.eup %5101  ;;  %v979_v6 = vmul.f32 %v5100_v48, %v977_v49 }
 0x34e   :  { %v987_v14 = vmul.f32 %v5102_v60, %v985_v28  ;;  %v982_v11 = vsub.f32 1.0, %v5102_v60 }
 0x34f   :  { %v980_v17 = vadd.f32 %v979_v6, %v5760_v33 }
 0x351   :  { %5103 = vtanh.f32 %v980_v17 }
 0x35b   :  { %v5104_v10 = vpop.eup %5103 }
 0x35c   :  { %v983_v52 = vmul.f32 %v5104_v10, %v982_v11 }
 0x35e   :  { %v988_v9 = vadd.f32 %v987_v14, %v983_v52 }
 0x360   :  { %v1007_v29 = vrot.slane %v988_v9, 4 }
 0x362   :  { %v1009_v33 = vmul.f32 %v1007_v29, %v1005_v24 }
 0x364   :  { %v5915_v49 = vadd.f32 %v1011_v44, %v1009_v33 }
 0x366   :  { %1080 = vmatmul.mubr.f32.vlgmr.msra.gmra.mrb[10].mxu0 %v5915_v49  ;;  %4207 = vmatmul.mubr.f32.vlgmr.msra.gmra.mrb[8].mxu1 %v5915_v49  ;;  %v1013_v48 = vmul.f32 %v5908_v20, %v5915_v49 }
 0x367   :  { %4748 = vmatpush1.bf16.msra.mxu0 %v5426_v43  ;;  %4779 = vmatpush3.bf16.msra.mxu1 %v5506_v5 }
 0x368   :  { %4750 = vmatprep.subr.bf16.mxu0 %v5435_v46  ;;  %4780 = vmatprep.subr.bf16.mxu1 %v6768_v23  ;;  %v1961_v28 = vrot.slane %v1013_v48, 4 }
 0x369   :  { %1291 = vmatprep.mubr.f32.mxu0 %v6769_v30  ;;  %4241 = vmatprep.mubr.msk.f32.mxu1 %vm5186_vm5, %v6769_v30 }
 0x36a   :  { %v5930_v60 = vsel %vm1977_vm14, %v5869_v32, %v1961_v28 }
 0x36b   :  { %4752 = vmatpush1.bf16.msra.mxu0 %v5455_v53  ;;  %4782 = vmatpush3.bf16.msra.mxu1 %v5540_v21 }
 0x36c   :  { %4754 = vmatprep.subr.bf16.mxu0 %v5458_v54  ;;  %4783 = vmatprep.subr.bf16.mxu1 %v6768_v23 }
 0x36f   :  { %4756 = vmatpush1.bf16.msra.mxu0 %v5480_v61  ;;  %4785 = vmatpush3.bf16.msra.mxu1 %v5570_v31 }
 0x370   :  { %4758 = vmatprep.subr.bf16.mxu0 %v5489_v63  ;;  %4786 = vmatprep.subr.bf16.mxu1 %v6768_v23 }
 0x373   :  { %4760 = vmatpush1.bf16.msra.mxu0 %v5519_v13  ;;  %4788 = vmatpush3.bf16.msra.mxu1 %v5598_v41 }
 0x374   :  { %4762 = vmatprep.subr.bf16.mxu0 %v5524_v16  ;;  %4789 = vmatprep.subr.bf16.mxu1 %v6768_v23 }
 0x377   :  { %4764 = vmatpush1.bf16.msra.mxu0 %v5552_v25  ;;  %4791 = vmatpush3.bf16.msra.mxu1 %v5620_v50 }
 0x378   :  { %4766 = vmatprep.subr.bf16.mxu0 %v5555_v26  ;;  %4792 = vmatprep.subr.bf16.mxu1 %v6768_v23 }
 0x37b   :  { %4768 = vmatpush1.bf16.msra.mxu0 %v5580_v35  ;;  %4794 = vmatpush3.bf16.msra.mxu1 %v5634_v56 }
 0x37c   :  { %4770 = vmatprep.subr.bf16.mxu0 %v5583_v36  ;;  %4795 = vmatprep.subr.bf16.mxu1 %v6768_v23 }
 0x37f   :  { %4772 = vmatpush1.bf16.msra.mxu0 %v5608_v45  ;;  %4797 = vmatpush3.bf16.msra.mxu1 %v5646_v59 }
 0x380   :  { %4774 = vmatprep.subr.bf16.mxu0 %v5611_v47  ;;  %4798 = vmatprep.subr.bf16.mxu1 %v6768_v23 }
 0x383   :  { %4776 = vmatpush1.bf16.msra.mxu0 %v5630_v55  ;;  %4800 = vmatpush3.bf16.msra.mxu1 %v5660_v1 }
 0x384   :  { %4802 = vmatprep.subr.bf16.mxu0 %v5406_v34  ;;  %4833 = vmatprep.subr.bf16.mxu1 %v6768_v23 }
 0x439   :  { %v1081_v32 = vpop.f32.mrb[10].mxu0  ;;  %v1152_v6 = vpop.f32.mrb[8].mxu1 }
 0x43a   :  { %v1082_v14 = vadd.f32 %v1081_v32, %v5772_v40  ;;  %v1083_v17 = vpop.f32.mrb[11].mxu0  ;;  %v4208_v19 = vpop.f32.mrb[9].mxu1  ;;  %v1153_v32 = vadd.f32 %v1152_v6, %v5782_v27 }
 0x43b   :  { %v1084_v11 = vadd.f32 %v1083_v17, %v5775_v39 }
 0x43c   :  { %v1157_v10 = vrot.slane %v1082_v14, 2  ;;  %v1177_v19 = vrot.slane %v1153_v32, 2  ;;  %v1185_v14 = vrot.slane %v5915_v49, 2 }
 0x43d   :  { %v1167_v24 = vrot.slane %v1084_v11, 2 }
 0x43e   :  { %v1159_v52 = vadd.f32 %v1157_v10, %v5750_v7 }
 0x43f   :  { %v1169_v3 = vadd.f32 %v1167_v24, %v5758_v18  ;;  %v5013_v24 = vpop.permute.xlu1 %5012 }
 0x440   :  { %v3721_v9 = vmul.f32 -1.442695, %v1159_v52  ;;  %v5967_v52 = vunpack.i.h.bf16 %v5013_v24 }
 0x441   :  { %v3722_v29 = vmul.f32 -1.442695, %v1169_v3  ;;  %v5969_v3 = vunpack.i.l.bf16 %v5013_v24 }
 0x442   :  { %5105 = vpow2.f32 %v3721_v9 }
 0x443   :  { %5107 = vpow2.f32 %v3722_v29  ;;  %v1205_v6 = vsel %vm397_vm8, %v5969_v3, %v5967_v52 }
 0x44c   :  { %v5106_v44 = vpop.eup %5105 }
 0x44d   :  { %v5108_v33 = vpop.eup %5107  ;;  %v1163_v48 = vadd.f32 1.0, %v5106_v44 }
 0x44e   :  { %v1173_v28 = vadd.f32 1.0, %v5108_v33 }
 0x44f   :  { %5109 = vrcp.f32 %v1163_v48  ;;  %v1210_v48 = vsub.f32 1.0, %v1205_v6 }
 0x450   :  { %5111 = vrcp.f32 %v1173_v28 }
 0x451   :  { %v1211_v32 = vmul.f32 %v1210_v48, %v5915_v49 }
 0x459   :  { %v5110_v17 = vpop.eup %5109 }
 0x45a   :  { %v5112_v11 = vpop.eup %5111  ;;  %v1179_v7 = vmul.f32 %v5110_v17, %v1177_v19  ;;  %v1014_v19 = vmul.f32 %v5906_v15, %v5915_v49  ;;  %v814_v17 = vmul.f32 %v5844_v8, %v5853_v0 }
 0x45b   :  { %v1187_v10 = vmul.f32 %v5112_v11, %v1185_v14  ;;  %v1182_v9 = vsub.f32 1.0, %v5112_v11  ;;  %v605_v14 = vmul.f32 %v5786_v51, %v5794_v42 }
 0x45c   :  { %v1180_v18 = vadd.f32 %v1179_v7, %v5762_v22  ;;  %v1997_v49 = vrot.slane %v814_v17, 4 }
 0x45d   :  { %v2000_v0 = vrot.slane %v605_v14, 2 }
 0x45e   :  { %5113 = vtanh.f32 %v1180_v18 }
 0x468   :  { %v5114_v29 = vpop.eup %5113 }
 0x469   :  { %v1183_v44 = vmul.f32 %v5114_v29, %v1182_v9 }
 0x46b   :  { %v1188_v33 = vadd.f32 %v1187_v10, %v1183_v44  ;;  %v1994_v10 = vrot.slane %v1014_v19, 6 }
 0x46d   :  { %v1207_v28 = vrot.slane %v1188_v33, 6 }
 0x46f   :  { %v1209_v22 = vmul.f32 %v1207_v28, %v1205_v6 }
 0x471   :  { %v5982_v11 = vadd.f32 %v1211_v32, %v1209_v22 }
 0x473   :  { %1292 = vmatmul.mubr.f32.vlgmr.msra.gmra.mrb[12].mxu0 %v5982_v11  ;;  %4242 = vmatmul.mubr.f32.vlgmr.msra.gmra.mrb[10].mxu1 %v5982_v11  ;;  %v1214_v7 = vmul.f32 %v5967_v52, %v5982_v11 }
 0x474   :  { %4804 = vmatpush1.bf16.msra.mxu0 %v5426_v43  ;;  %4835 = vmatpush3.bf16.msra.mxu1 %v5506_v5 }
 0x475   :  { %4806 = vmatprep.subr.bf16.mxu0 %v5435_v46  ;;  %4836 = vmatprep.subr.bf16.mxu1 %v6768_v23  ;;  %v2005_v42 = vsel %vm1975_vm13, %v1214_v7, %v1994_v10 }
 0x476   :  { %1469 = vmatprep.mubr.f32.mxu0 %v6769_v30  ;;  %4276 = vmatprep.mubr.msk.f32.mxu1 %vm5186_vm5, %v6769_v30  ;;  %v2006_v18 = vsel %vm1977_vm14, %v2005_v42, %v1997_v49 }
 0x477   :  { %v5998_v24 = vsel %vm1979_vm15, %v2006_v18, %v2000_v0 }
 0x478   :  { %4808 = vmatpush1.bf16.msra.mxu0 %v5455_v53  ;;  %4838 = vmatpush3.bf16.msra.mxu1 %v5540_v21 }
 0x479   :  { %4810 = vmatprep.subr.bf16.mxu0 %v5458_v54  ;;  %4839 = vmatprep.subr.bf16.mxu1 %v6768_v23 }
 0x47c   :  { %4812 = vmatpush1.bf16.msra.mxu0 %v5480_v61  ;;  %4841 = vmatpush3.bf16.msra.mxu1 %v5570_v31 }
 0x47d   :  { %4814 = vmatprep.subr.bf16.mxu0 %v5489_v63  ;;  %4842 = vmatprep.subr.bf16.mxu1 %v6768_v23 }
 0x480   :  { %4816 = vmatpush1.bf16.msra.mxu0 %v5519_v13  ;;  %4844 = vmatpush3.bf16.msra.mxu1 %v5598_v41 }
 0x481   :  { %4818 = vmatprep.subr.bf16.mxu0 %v5524_v16  ;;  %4845 = vmatprep.subr.bf16.mxu1 %v6768_v23 }
 0x484   :  { %4820 = vmatpush1.bf16.msra.mxu0 %v5552_v25  ;;  %4847 = vmatpush3.bf16.msra.mxu1 %v5620_v50 }
 0x485   :  { %4822 = vmatprep.subr.bf16.mxu0 %v5555_v26  ;;  %4848 = vmatprep.subr.bf16.mxu1 %v6768_v23 }
 0x488   :  { %4824 = vmatpush1.bf16.msra.mxu0 %v5580_v35  ;;  %4850 = vmatpush3.bf16.msra.mxu1 %v5634_v56 }
 0x489   :  { %4826 = vmatprep.subr.bf16.mxu0 %v5583_v36  ;;  %4851 = vmatprep.subr.bf16.mxu1 %v6768_v23 }
 0x48c   :  { %4828 = vmatpush1.bf16.msra.mxu0 %v5608_v45  ;;  %4853 = vmatpush3.bf16.msra.mxu1 %v5646_v59 }
 0x48d   :  { %4830 = vmatprep.subr.bf16.mxu0 %v5611_v47  ;;  %4854 = vmatprep.subr.bf16.mxu1 %v6768_v23 }
 0x490   :  { %4832 = vmatpush1.bf16.msra.mxu0 %v5630_v55  ;;  %4856 = vmatpush3.bf16.msra.mxu1 %v5660_v1 }
 0x491   :  { %4858 = vmatprep.subr.bf16.mxu0 %v5406_v34  ;;  %4889 = vmatprep.subr.bf16.mxu1 %v6768_v23 }
 0x546   :  { %v1293_v9 = vpop.f32.mrb[12].mxu0  ;;  %v1364_v29 = vpop.f32.mrb[10].mxu1 }
 0x547   :  { %v1294_v44 = vadd.f32 %v1293_v9, %v5772_v40  ;;  %v1295_v6 = vpop.f32.mrb[13].mxu0  ;;  %v4243_v33 = vpop.f32.mrb[11].mxu1  ;;  %v1365_v49 = vadd.f32 %v1364_v29, %v5782_v27 }
 0x548   :  { %v1296_v48 = vadd.f32 %v1295_v6, %v5775_v39  ;;  %v1389_v33 = vsel %vm397_vm8, %v5967_v52, %v5969_v3 }
 0x549   :  { %v1368_v28 = vadd.f32 %v1294_v44, %v5730_v57 }
 0x54a   :  { %v1375_v22 = vadd.f32 %v1296_v48, %v5738_v2 }
 0x54b   :  { %v3725_v32 = vmul.f32 -1.442695, %v1368_v28 }
 0x54c   :  { %v3726_v19 = vmul.f32 -1.442695, %v1375_v22 }
 0x54d   :  { %5115 = vpow2.f32 %v3725_v32  ;;  %v1391_v32 = vsub.f32 1.0, %v1389_v33 }
 0x54e   :  { %5117 = vpow2.f32 %v3726_v19 }
 0x54f   :  { %v1392_v19 = vmul.f32 %v1391_v32, %v5982_v11 }
 0x557   :  { %v5116_v17 = vpop.eup %5115 }
 0x558   :  { %v1372_v14 = vadd.f32 1.0, %v5116_v17  ;;  %v5118_v7 = vpop.eup %5117 }
 0x559   :  { %v1379_v10 = vadd.f32 1.0, %v5118_v7 }
 0x55a   :  { %5119 = vrcp.f32 %v1372_v14 }
 0x55b   :  { %5121 = vrcp.f32 %v1379_v10 }
 0x564   :  { %v5120_v0 = vpop.eup %5119 }
 0x565   :  { %v1382_v42 = vmul.f32 %v5120_v0, %v1365_v49  ;;  %v5122_v9 = vpop.eup %5121 }
 0x566   :  { %v1385_v44 = vsub.f32 1.0, %v5122_v9  ;;  %v1387_v28 = vmul.f32 %v5122_v9, %v5982_v11 }
 0x567   :  { %v1383_v18 = vadd.f32 %v1382_v42, %v5764_v37 }
 0x569   :  { %5123 = vtanh.f32 %v1383_v18 }
 0x573   :  { %v5124_v6 = vpop.eup %5123 }
 0x574   :  { %v1386_v48 = vmul.f32 %v5124_v6, %v1385_v44 }
 0x576   :  { %v1388_v22 = vadd.f32 %v1387_v28, %v1386_v48 }
 0x578   :  { %v1390_v29 = vmul.f32 %v1389_v33, %v1388_v22 }
 0x57a   :  { %v6040_v17 = vadd.f32 %v1392_v19, %v1390_v29 }
 0x57c   :  { %1470 = vmatmul.mubr.f32.vlgmr.msra.gmra.mrb[14].mxu0 %v6040_v17  ;;  %4277 = vmatmul.mubr.f32.vlgmr.msra.gmra.mrb[12].mxu1 %v6040_v17 }
 0x57d   :  { %4860 = vmatpush1.bf16.msra.mxu0 %v5426_v43  ;;  %4891 = vmatpush3.bf16.msra.mxu1 %v5506_v5 }
 0x57e   :  { %4862 = vmatprep.subr.bf16.mxu0 %v5435_v46  ;;  %4892 = vmatprep.subr.bf16.mxu1 %v6768_v23 }
 0x57f   :  { %1653 = vmatprep.mubr.f32.mxu0 %v6769_v30  ;;  %4311 = vmatprep.mubr.msk.f32.mxu1 %vm5186_vm5, %v6769_v30 }
 0x581   :  { %4864 = vmatpush1.bf16.msra.mxu0 %v5455_v53  ;;  %4894 = vmatpush3.bf16.msra.mxu1 %v5540_v21 }
 0x582   :  { %4866 = vmatprep.subr.bf16.mxu0 %v5458_v54  ;;  %4895 = vmatprep.subr.bf16.mxu1 %v6768_v23 }
 0x585   :  { %4868 = vmatpush1.bf16.msra.mxu0 %v5480_v61  ;;  %4897 = vmatpush3.bf16.msra.mxu1 %v5570_v31 }
 0x586   :  { %4870 = vmatprep.subr.bf16.mxu0 %v5489_v63  ;;  %4898 = vmatprep.subr.bf16.mxu1 %v6768_v23 }
 0x589   :  { %4872 = vmatpush1.bf16.msra.mxu0 %v5519_v13  ;;  %4900 = vmatpush3.bf16.msra.mxu1 %v5598_v41 }
 0x58a   :  { %4874 = vmatprep.subr.bf16.mxu0 %v5524_v16  ;;  %4901 = vmatprep.subr.bf16.mxu1 %v6768_v23 }
 0x58d   :  { %4876 = vmatpush1.bf16.msra.mxu0 %v5552_v25  ;;  %4903 = vmatpush3.bf16.msra.mxu1 %v5620_v50 }
 0x58e   :  { %4878 = vmatprep.subr.bf16.mxu0 %v5555_v26  ;;  %4904 = vmatprep.subr.bf16.mxu1 %v6768_v23 }
 0x591   :  { %4880 = vmatpush1.bf16.msra.mxu0 %v5580_v35  ;;  %4906 = vmatpush3.bf16.msra.mxu1 %v5634_v56 }
 0x592   :  { %4882 = vmatprep.subr.bf16.mxu0 %v5583_v36  ;;  %4907 = vmatprep.subr.bf16.mxu1 %v6768_v23 }
 0x595   :  { %4884 = vmatpush1.bf16.msra.mxu0 %v5608_v45  ;;  %4909 = vmatpush3.bf16.msra.mxu1 %v5646_v59 }
 0x596   :  { %4886 = vmatprep.subr.bf16.mxu0 %v5611_v47  ;;  %4910 = vmatprep.subr.bf16.mxu1 %v6768_v23 }
 0x599   :  { %4888 = vmatpush1.bf16.msra.mxu0 %v5630_v55  ;;  %4912 = vmatpush3.bf16.msra.mxu1 %v5660_v1 }
 0x59a   :  { %4914 = vmatprep.subr.bf16.mxu0 %v5406_v34  ;;  %4945 = vmatprep.subr.bf16.mxu1 %v6768_v23 }
 0x64f   :  { %v1471_v14 = vpop.f32.mrb[14].mxu0  ;;  %v1542_v7 = vpop.f32.mrb[12].mxu1 }
 0x650   :  { %v1472_v10 = vadd.f32 %v1471_v14, %v5772_v40  ;;  %v1473_v49 = vpop.f32.mrb[15].mxu0  ;;  %v4278_v0 = vpop.f32.mrb[13].mxu1  ;;  %v1543_v29 = vadd.f32 %v1542_v7, %v5782_v27 }
 0x651   :  { %v1474_v42 = vadd.f32 %v1473_v49, %v5775_v39 }
 0x652   :  { %v1547_v18 = vrot.slane %v1472_v10, 6  ;;  %v1567_v19 = vrot.slane %v1543_v29, 6  ;;  %v1575_v10 = vrot.slane %v6040_v17, 6 }
 0x653   :  { %v1557_v9 = vrot.slane %v1474_v42, 6 }
 0x654   :  { %v1549_v44 = vadd.f32 %v1547_v18, %v5734_v58 }
 0x655   :  { %v1559_v6 = vadd.f32 %v1557_v9, %v5742_v4 }
 0x656   :  { %v3727_v33 = vmul.f32 -1.442695, %v1549_v44 }
 0x657   :  { %v3728_v48 = vmul.f32 -1.442695, %v1559_v6 }
 0x658   :  { %5125 = vpow2.f32 %v3727_v33  ;;  %v1579_v33 = vsel %vm397_vm8, %v5906_v15, %v5908_v20 }
 0x659   :  { %5127 = vpow2.f32 %v3728_v48  ;;  %v1584_v7 = vsub.f32 1.0, %v1579_v33 }
 0x662   :  { %v5126_v34 = vpop.eup %5125 }
 0x663   :  { %v5128_v28 = vpop.eup %5127  ;;  %v1553_v32 = vadd.f32 1.0, %v5126_v34 }
 0x664   :  { %v1563_v22 = vadd.f32 1.0, %v5128_v28 }
 0x665   :  { %5129 = vrcp.f32 %v1553_v32  ;;  %v1585_v32 = vmul.f32 %v1584_v7, %v6040_v17  ;;  %v5032_v7 = vld [vmem:[%s6771_s5] sm:$0xff]  }
 0x666   :  { %5131 = vrcp.f32 %v1563_v22 }
 0x66f   :  { %v5130_v14 = vpop.eup %5129 }
 0x670   :  { %v5132_v49 = vpop.eup %5131  ;;  %v1569_v0 = vmul.f32 %v5130_v14, %v1567_v19  ;;  %v1394_v19 = vmul.f32 %v5967_v52, %v6040_v17  ;;  %v1763_v52 = vsel %vm397_vm8, %v5844_v8, %v5846_v62 }
 0x671   :  { %v1577_v42 = vmul.f32 %v5132_v49, %v1575_v10  ;;  %v1572_v9 = vsub.f32 1.0, %v5132_v49 }
 0x672   :  { %v1570_v18 = vadd.f32 %v1569_v0, %v5766_v38  ;;  %v1768_v0 = vsub.f32 1.0, %v1763_v52 }
 0x674   :  { %5133 = vtanh.f32 %v1570_v18 }
 0x67e   :  { %v5134_v44 = vpop.eup %5133 }
 0x67f   :  { %v1573_v6 = vmul.f32 %v5134_v44, %v1572_v9 }
 0x681   :  { %v1578_v48 = vadd.f32 %v1577_v42, %v1573_v6 }
 0x683   :  { %v1581_v34 = vrot.slane %v1578_v48, 2  ;;  %v5031_v48 = vld [vmem:[%s6770_s12] sm:$0xff]  }
 0x685   :  { %v1583_v28 = vmul.f32 %v1581_v34, %v1579_v33  ;;  %v5034_v34 = vld [vmem:[%s6771_s5 + $0x8] sm:$0xff]  }
 0x687   :  { %v6091_v22 = vadd.f32 %v1585_v32, %v1583_v28  ;;  %v5035_v28 = vld [vmem:[%s6770_s12 + $0x10] sm:$0xff]  }
 0x688   :  { %v5036_v32 = vld [vmem:[%s6771_s5 + $0x10] sm:$0xff]  }
 0x689   :  { %1654 = vmatmul.mubr.f32.vlgmr.msra.gmra.mrb[16].mxu0 %v6091_v22  ;;  %4312 = vmatmul.mubr.f32.vlgmr.msra.gmra.mrb[14].mxu1 %v6091_v22  ;;  %v1587_v29 = vmul.f32 %v5906_v15, %v6091_v22  ;;  %v1769_v9 = vmul.f32 %v1768_v0, %v6091_v22  ;;  %v6772_v0 = vld [vmem:[#allocation6_spill] sm:$0xff] }
 0x68a   :  { %4916 = vmatpush1.bf16.msra.mxu0 %v5426_v43  ;;  %4947 = vmatpush3.bf16.msra.mxu1 %v5506_v5 }
 0x68b   :  { %4918 = vmatprep.subr.bf16.mxu0 %v5435_v46  ;;  %4948 = vmatprep.subr.bf16.mxu1 %v6768_v23  ;;  %v1967_v14 = vrot.slane %v1587_v29, 6  ;;  %v5037_v29 = vld [vmem:[%s6770_s12 + $0x18] sm:$0xff]  }
 0x68c   :  { %1837 = vmatprep.mubr.f32.mxu0 %v6769_v30  ;;  %4346 = vmatprep.mubr.msk.f32.mxu1 %vm5186_vm5, %v6769_v30 }
 0x68d   :  { %v6107_v10 = vsel %vm1975_vm13, %v1394_v19, %v1967_v14  ;;  %v5038_v19 = vld [vmem:[%s6771_s5 + $0x18] sm:$0xff]   ;;  %v5039_v14 = vld [vmem:[%s6770_s12 + $0x20] sm:$0xff]  }
 0x68e   :  { %4920 = vmatpush1.bf16.msra.mxu0 %v5455_v53  ;;  %4950 = vmatpush3.bf16.msra.mxu1 %v5540_v21 }
 0x68f   :  { %4922 = vmatprep.subr.bf16.mxu0 %v5458_v54  ;;  %4951 = vmatprep.subr.bf16.mxu1 %v6768_v23 }
 0x692   :  { %4924 = vmatpush1.bf16.msra.mxu0 %v5480_v61  ;;  %4953 = vmatpush3.bf16.msra.mxu1 %v5570_v31 }
 0x693   :  { %4926 = vmatprep.subr.bf16.mxu0 %v5489_v63  ;;  %4954 = vmatprep.subr.bf16.mxu1 %v6768_v23 }
 0x696   :  { %4928 = vmatpush1.bf16.msra.mxu0 %v5519_v13  ;;  %4956 = vmatpush3.bf16.msra.mxu1 %v5598_v41 }
 0x697   :  { %4930 = vmatprep.subr.bf16.mxu0 %v5524_v16  ;;  %4957 = vmatprep.subr.bf16.mxu1 %v6768_v23 }
 0x69a   :  { %4932 = vmatpush1.bf16.msra.mxu0 %v5552_v25  ;;  %4959 = vmatpush3.bf16.msra.mxu1 %v5620_v50 }
 0x69b   :  { %4934 = vmatprep.subr.bf16.mxu0 %v5555_v26  ;;  %4960 = vmatprep.subr.bf16.mxu1 %v6768_v23 }
 0x69e   :  { %4936 = vmatpush1.bf16.msra.mxu0 %v5580_v35  ;;  %4962 = vmatpush3.bf16.msra.mxu1 %v5634_v56 }
 0x69f   :  { %4938 = vmatprep.subr.bf16.mxu0 %v5583_v36  ;;  %4963 = vmatprep.subr.bf16.mxu1 %v6768_v23 }
 0x6a2   :  { %4940 = vmatpush1.bf16.msra.mxu0 %v5608_v45  ;;  %4965 = vmatpush3.bf16.msra.mxu1 %v5646_v59 }
 0x6a3   :  { %4942 = vmatprep.subr.bf16.mxu0 %v5611_v47  ;;  %4966 = vmatprep.subr.bf16.mxu1 %v6768_v23 }
 0x6a6   :  { %4944 = vmatpush1.bf16.msra.mxu0 %v5630_v55  ;;  %4968 = vmatpush3.bf16.msra.mxu1 %v5660_v1  ;;  %v1759_v55 = vrot.slane %v6091_v22, 4 }
 0x6a7   :  { %4349 = vmatprep.subr.bf16.mxu0 %v6769_v30  ;;  %4369 = vmatprep.subr.bf16.mxu1 %v6769_v30 }
 0x75c   :  { %v1655_v43 = vpop.f32.mrb[16].mxu0  ;;  %v1726_v46 = vpop.f32.mrb[14].mxu1 }
 0x75d   :  { %v1656_v53 = vadd.f32 %v1655_v43, %v5772_v40  ;;  %v1657_v54 = vpop.f32.mrb[17].mxu0  ;;  %v4313_v61 = vpop.f32.mrb[15].mxu1  ;;  %v1727_v45 = vadd.f32 %v1726_v46, %v5782_v27  ;;  %v5041_v43 = vld [vmem:[%s6770_s12 + $0x28] sm:$0xff]  }
 0x75e   :  { %v1658_v63 = vadd.f32 %v1657_v54, %v5775_v39  ;;  %v5042_v46 = vld [vmem:[%s6771_s5 + $0x28] sm:$0xff]   ;;  %v5044_v54 = vld [vmem:[%s6771_s5 + $0x30] sm:$0xff]   ;;  %v5045_v61 = vld [vmem:[%s6770_s12 + $0x38] sm:$0xff]  }
 0x75f   :  { %v1731_v5 = vrot.slane %v1656_v53, 4  ;;  %v1751_v47 = vrot.slane %v1727_v45, 4  ;;  %v5043_v53 = vld [vmem:[%s6770_s12 + $0x30] sm:$0xff]  }
 0x760   :  { %v1741_v13 = vrot.slane %v1658_v63, 4  ;;  %v5046_v63 = vld [vmem:[%s6771_s5 + $0x38] sm:$0xff]  }
 0x761   :  { %v1733_v16 = vadd.f32 %v1731_v5, %v5730_v57 }
 0x762   :  { %v1743_v21 = vadd.f32 %v1741_v13, %v5738_v2 }
 0x763   :  { %v3729_v25 = vmul.f32 -1.442695, %v1733_v16 }
 0x764   :  { %v3730_v26 = vmul.f32 -1.442695, %v1743_v21 }
 0x765   :  { %5135 = vpow2.f32 %v3729_v25 }
 0x766   :  { %5137 = vpow2.f32 %v3730_v26 }
 0x76f   :  { %v5136_v31 = vpop.eup %5135 }
 0x770   :  { %v5138_v35 = vpop.eup %5137  ;;  %v1737_v36 = vadd.f32 1.0, %v5136_v31 }
 0x771   :  { %v1747_v41 = vadd.f32 1.0, %v5138_v35 }
 0x772   :  { %5139 = vrcp.f32 %v1737_v36 }
 0x773   :  { %5141 = vrcp.f32 %v1747_v41 }
 0x77c   :  { %v5140_v50 = vpop.eup %5139 }
 0x77d   :  { %v5142_v56 = vpop.eup %5141  ;;  %v1753_v59 = vmul.f32 %v5140_v50, %v1751_v47 }
 0x77e   :  { %v1761_v1 = vmul.f32 %v5142_v56, %v1759_v55  ;;  %v1756_v2 = vsub.f32 1.0, %v5142_v56 }
 0x77f   :  { %v1754_v57 = vadd.f32 %v1753_v59, %v5764_v37 }
 0x781   :  { %5143 = vtanh.f32 %v1754_v57 }
 0x78b   :  { %v5144_v23 = vpop.eup %5143 }
 0x78c   :  { %v1757_v15 = vmul.f32 %v5144_v23, %v1756_v2 }
 0x78e   :  { %v1762_v49 = vadd.f32 %v1761_v1, %v1757_v15 }
 0x790   :  { %v1765_v42 = vrot.slane %v1762_v49, 4 }
 0x792   :  { %v1767_v18 = vmul.f32 %v1765_v42, %v1763_v52  ;;  %v1947_v42 = vsel %vm397_vm8, %v5786_v51, %v6772_v0 }
 0x794   :  { %v6149_v44 = vadd.f32 %v1769_v9, %v1767_v18 }
 0x796   :  { %1838 = vmatmul.mubr.f32.vlgmr.msra.gmra.mrb[18].mxu0 %v6149_v44  ;;  %4347 = vmatmul.mubr.f32.vlgmr.msra.gmra.mrb[16].mxu1 %v6149_v44  ;;  %v1771_v37 = vmul.f32 %v5844_v8, %v6149_v44  ;;  %v5033_v8 = vld [vmem:[%s6770_s12 + $0x8] sm:$0xff]   ;;  %v1943_v57 = vrot.slane %v6149_v44, 2 }
 0x797   :  { %4365 = vmatprep.mubr.msk.bf16.mxu0 %vm5186_vm5, %v6769_v30  ;;  %4385 = vmatprep.mubr.msk.bf16.mxu1 %vm5186_vm5, %v6769_v30 }
 0x798   :  { %v1970_v6 = vrot.slane %v1771_v37, 4  ;;  %4350 = vmatpush3.bf16.msra.mxu0 %v5031_v48  ;;  %4370 = vmatpush3.bf16.msra.mxu1 %v5032_v7  ;;  %v1213_v37 = vmul.f32 %v5969_v3, %v5982_v11  ;;  %v1588_v7 = vmul.f32 %v5908_v20, %v6091_v22 }
 0x799   :  { %4351 = vmatprep.subr.bf16.mxu0 %v6769_v30  ;;  %4371 = vmatprep.subr.bf16.mxu1 %v6769_v30 }
 0x79a   :  { %v6161_v33 = vsel %vm1977_vm14, %v6107_v10, %v1970_v6  ;;  %v5040_v10 = vld [vmem:[%s6771_s5 + $0x20] sm:$0xff]   ;;  %v1772_v6 = vmul.f32 %v5846_v62, %v6149_v44  ;;  %v1988_v11 = vrot.slane %v1588_v7, 4 }
 0x79c   :  { %4352 = vmatpush3.bf16.msra.mxu0 %v5033_v8  ;;  %4372 = vmatpush3.bf16.msra.mxu1 %v5034_v34  ;;  %v1395_v8 = vmul.f32 %v5969_v3, %v6040_v17 }
 0x79d   :  { %4353 = vmatprep.subr.bf16.mxu0 %v6769_v30  ;;  %4373 = vmatprep.subr.bf16.mxu1 %v6769_v30 }
 0x7a0   :  { %4354 = vmatpush3.bf16.msra.mxu0 %v5035_v28  ;;  %4374 = vmatpush3.bf16.msra.mxu1 %v5036_v32 }
 0x7a1   :  { %4355 = vmatprep.subr.bf16.mxu0 %v6769_v30  ;;  %4375 = vmatprep.subr.bf16.mxu1 %v6769_v30 }
 0x7a4   :  { %4356 = vmatpush3.bf16.msra.mxu0 %v5037_v29  ;;  %4376 = vmatpush3.bf16.msra.mxu1 %v5038_v19  ;;  %v1964_v29 = vrot.slane %v1213_v37, 2  ;;  %v1985_v19 = vrot.slane %v1772_v6, 6 }
 0x7a5   :  { %4357 = vmatprep.subr.bf16.mxu0 %v6769_v30  ;;  %4377 = vmatprep.subr.bf16.mxu1 %v6769_v30 }
 0x7a6   :  { %v1980_v20 = vsel %vm1979_vm15, %v5930_v60, %v1964_v29  ;;  %v5048_v60 = vld [vmem:[%s6773_s2 + $0x8] sm:$0xff]  }
 0x7a8   :  { %4358 = vmatpush3.bf16.msra.mxu0 %v5039_v14  ;;  %4378 = vmatpush3.bf16.msra.mxu1 %v5040_v10  ;;  %v1991_v10 = vrot.slane %v1395_v8, 2 }
 0x7a9   :  { %4359 = vmatprep.subr.bf16.mxu0 %v6769_v30  ;;  %4379 = vmatprep.subr.bf16.mxu1 %v6769_v30 }
 0x7ac   :  { %4360 = vmatpush3.bf16.msra.mxu0 %v5041_v43  ;;  %4380 = vmatpush3.bf16.msra.mxu1 %v5042_v46  ;;  %v5047_v43 = vld [vmem:[%s6773_s2] sm:$0xff]  }
 0x7ad   :  { %4361 = vmatprep.subr.bf16.mxu0 %v6769_v30  ;;  %4381 = vmatprep.subr.bf16.mxu1 %v6769_v30 }
 0x7b0   :  { %4362 = vmatpush3.bf16.msra.mxu0 %v5043_v53  ;;  %4382 = vmatpush3.bf16.msra.mxu1 %v5044_v54  ;;  %v5051_v53 = vld [vmem:[%s6773_s2 + $0x20] sm:$0xff]   ;;  %v5052_v54 = vld [vmem:[%s6773_s2 + $0x28] sm:$0xff]  }
 0x7b1   :  { %4363 = vmatprep.subr.bf16.mxu0 %v6769_v30  ;;  %4383 = vmatprep.subr.bf16.mxu1 %v6769_v30 }
 0x7b4   :  { %4364 = vmatpush3.bf16.msra.mxu0 %v5045_v61  ;;  %4384 = vmatpush3.bf16.msra.mxu1 %v5046_v63  ;;  %v5053_v61 = vld [vmem:[%s6773_s2 + $0x30] sm:$0xff]   ;;  %v5054_v63 = vld [vmem:[%s6773_s2 + $0x38] sm:$0xff]  }
 0x7b5   :  { %4389 = vmatprep.subr.bf16.mxu0 %v6769_v30 }
 0x869   :  { %v1839_v5 = vpop.f32.mrb[18].mxu0  ;;  %v1910_v13 = vpop.f32.mrb[16].mxu1 }
 0x86a   :  { %v1840_v16 = vadd.f32 %v1839_v5, %v5772_v40  ;;  %v1841_v21 = vpop.f32.mrb[19].mxu0  ;;  %v4348_v25 = vpop.f32.mrb[17].mxu1  ;;  %v1911_v40 = vadd.f32 %v1910_v13, %v5782_v27  ;;  %v1952_v27 = vsub.f32 1.0, %v1947_v42  ;;  %v3733_v5 = vld [vmem:[%s6774_s9] ss:$0 sm:$0xff] }
 0x86b   :  { %v1842_v26 = vadd.f32 %v1841_v21, %v5775_v39 }
 0x86c   :  { %v1915_v31 = vrot.slane %v1840_v16, 2  ;;  %v1935_v1 = vrot.slane %v1911_v40, 2  ;;  %v3742_v16 = vld [vmem:[%s6775_s11] ss:$0 sm:$0xff] }
 0x86d   :  { %v1925_v35 = vrot.slane %v1842_v26, 2 }
 0x86e   :  { %v1917_v36 = vadd.f32 %v1915_v31, %v5734_v58 }
 0x86f   :  { %v1927_v41 = vadd.f32 %v1925_v35, %v5742_v4 }
 0x870   :  { %v3731_v45 = vmul.f32 -1.442695, %v1917_v36 }
 0x871   :  { %v3732_v47 = vmul.f32 -1.442695, %v1927_v41 }
 0x872   :  { %5145 = vpow2.f32 %v3731_v45 }
 0x873   :  { %5147 = vpow2.f32 %v3732_v47 }
 0x87c   :  { %v5146_v50 = vpop.eup %5145 }
 0x87d   :  { %v5148_v55 = vpop.eup %5147  ;;  %v1921_v56 = vadd.f32 1.0, %v5146_v50 }
 0x87e   :  { %v1931_v59 = vadd.f32 1.0, %v5148_v55 }
 0x87f   :  { %5149 = vrcp.f32 %v1921_v56 }
 0x880   :  { %5151 = vrcp.f32 %v1931_v59 }
 0x889   :  { %v5150_v39 = vpop.eup %5149 }
 0x88a   :  { %v5152_v2 = vpop.eup %5151  ;;  %v1937_v58 = vmul.f32 %v5150_v39, %v1935_v1 }
 0x88b   :  { %v1945_v23 = vmul.f32 %v5152_v2, %v1943_v57  ;;  %v1940_v15 = vsub.f32 1.0, %v5152_v2  ;;  %v3751_v57 = vld [vmem:[%s6778_s8] ss:$0 sm:$0xff] }
 0x88c   :  { %v1938_v4 = vadd.f32 %v1937_v58, %v5766_v38  ;;  %v1953_v38 = vmul.f32 %v1952_v27, %v6149_v44 }
 0x88e   :  { %5153 = vtanh.f32 %v1938_v4 }
 0x898   :  { %v5154_v52 = vpop.eup %5153 }
 0x899   :  { %v1941_v49 = vmul.f32 %v5154_v52, %v1940_v15 }
 0x89b   :  { %v1946_v18 = vadd.f32 %v1945_v23, %v1941_v49 }
 0x89d   :  { %v1949_v9 = vrot.slane %v1946_v18, 6 }
 0x89f   :  { %v1951_v48 = vmul.f32 %v1949_v9, %v1947_v42  ;;  %v6779_v42 = vld [vmem:[#allocation2_spill] sm:$0xff]  ;;  %v2380_v9 = vand.u32 1, %v5707_v12 }
 0x8a0   :  { %v2351_v18 = vadd.s32 8, %v6779_v42  ;;  %v2356_v37 = vand.u32 1, %v6779_v42 }
 0x8a1   :  { %v1954_v34 = vadd.f32 %v1953_v38, %v1951_v48  ;;  %v5058_v48 = vld [vmem:[%s6784_s1 + $0x18] sm:$0xff]  }
 0x8a2   :  { %v2363_v27 = vand.u32 1, %v2351_v18  ;;  %vm6336_vm3 = vcmp.eq.s32.totalorder %v2356_v37, %v2380_v9 }
 0x8a3   :  { %v1955_v28 = vmul.f32 %v5786_v51, %v1954_v34  ;;  %v1956_v32 = vmul.f32 %v6772_v0, %v1954_v34 }
 0x8a4   :  { %vm6332_vm2 = vcmp.eq.s32.totalorder %v2363_v27, %v2380_v9 }
 0x8a5   :  { %v1973_v14 = vrot.slane %v1955_v28, 2  ;;  %v2002_v62 = vsel %vm1975_vm13, %v1956_v32, %v1985_v19 }
 0x8a6   :  { %v2003_v44 = vsel %vm1977_vm14, %v2002_v62, %v1988_v11 }
 0x8a7   :  { %v1983_v3 = vsel %vm1979_vm15, %v6161_v33, %v1973_v14  ;;  %v2004_v17 = vsel %vm1979_vm15, %v2003_v44, %v1991_v10  ;;  %v5050_v33 = vld [vmem:[%s6773_s2 + $0x18] sm:$0xff]  }
 0x8a8   :  { %v6256_v51 = vsel %vm132_vm0, %v1980_v20, %v2004_v17  ;;  %v6260_v22 = vsel %vm132_vm0, %v1983_v3, %v5998_v24  ;;  %v5049_v24 = vld [vmem:[%s6773_s2 + $0x10] sm:$0xff]  }
 0x8a9   :  { %v2010_v46 = vpack.c.bf16 %v6260_v22, %v6256_v51 }
 0x8ab   :  { %4366 = vmatmul.mubr.bf16.vlgmr.msra.gmra.mrb[20].mxu0 %v2010_v46  ;;  %4386 = vmatmul.mubr.bf16.vlgmr.msra.gmra.mrb[20].mxu1 %v2010_v46 }
 0x8ac   :  { %4390 = vmatpush3.bf16.msra.mxu0 %v5047_v43  ;;  %4405 = vmatprep.mubr.msk.bf16.mxu0 %vm5186_vm5, %v6769_v30 }
 0x8ad   :  { %4391 = vmatprep.subr.bf16.mxu0 %v6769_v30 }
 0x8b0   :  { %4392 = vmatpush3.bf16.msra.mxu0 %v5048_v60 }
 0x8b1   :  { %4393 = vmatprep.subr.bf16.mxu0 %v6769_v30 }
 0x8b4   :  { %4394 = vmatpush3.bf16.msra.mxu0 %v5049_v24 }
 0x8b5   :  { %4395 = vmatprep.subr.bf16.mxu0 %v6769_v30 }
 0x8b8   :  { %4396 = vmatpush3.bf16.msra.mxu0 %v5050_v33 }
 0x8b9   :  { %4397 = vmatprep.subr.bf16.mxu0 %v6769_v30 }
 0x8bc   :  { %4398 = vmatpush3.bf16.msra.mxu0 %v5051_v53 }
 0x8bd   :  { %4399 = vmatprep.subr.bf16.mxu0 %v6769_v30 }
 0x8c0   :  { %4400 = vmatpush3.bf16.msra.mxu0 %v5052_v54 }
 0x8c1   :  { %4401 = vmatprep.subr.bf16.mxu0 %v6769_v30 }
 0x8c4   :  { %4402 = vmatpush3.bf16.msra.mxu0 %v5053_v61 }
 0x8c5   :  { %4403 = vmatprep.subr.bf16.mxu0 %v6769_v30 }
 0x8c8   :  { %4404 = vmatpush3.bf16.msra.mxu0 %v5054_v63 }
 0x8c9   :  { %4457 = vmatprep.subr.bf16.mxu0 %v6769_v30 }
 0x8cb   :  { %4406 = vmatmul.mubr.bf16.vlgmr.msra.gmra.mrb[24].mxu0 %v2010_v46 }
 0x8cc   :  { %4473 = vmatprep.mubr.msk.bf16.mxu0 %vm5186_vm5, %v6769_v30 }
 0x97e   :  { %v2116_v13 = vpop.f32.mrb[20].mxu0  ;;  %v2228_v21 = vpop.f32.mrb[20].mxu1 }
 0x97f   :  { %v2117_v25 = vadd.f32 %v3733_v5, %v2116_v13  ;;  %v4367_v26 = vpop.f32.mrb[21].mxu0  ;;  %v4387_v31 = vpop.f32.mrb[21].mxu1  ;;  %v2229_v45 = vadd.f32 %v3742_v16, %v2228_v21 }
 0x980   :  { %v2119_v35 = vpop.f32.mrb[22].mxu0  ;;  %v2231_v36 = vpop.f32.mrb[22].mxu1 }
 0x981   :  { %v2347_v41 = vmul.f32 0.125, %v2117_v25  ;;  %v2232_v47 = vadd.f32 %v3742_v16, %v2231_v36  ;;  %v4368_v50 = vpop.f32.mrb[23].mxu0  ;;  %v4388_v55 = vpop.f32.mrb[23].mxu1  ;;  %v2120_v1 = vadd.f32 %v3733_v5, %v2119_v35 }
 0x983   :  { %v5016_v59 = vpack.i.bf16 %v2232_v47, %v2229_v45  ;;  %v4969_v40 = vpack.c.bf16 %v2232_v47, %v2229_v45  ;;  %4413 = vmatprep.mubr.msk.f32.mxu1 %vm132_vm0, %v2347_v41  ;;  %v2348_v39 = vmul.f32 0.125, %v2120_v1 }
 0x985   :  { %4971 = vmatprep.subr.msk.bf16.mxu1 %vm6308_vm1, %v4969_v40 }
 0x986   :  { %4974 = vmatpush3.bf16.xpose.msk.msra.mxu1 %vm6308_vm1, %v4969_v40 }
 0x98d   :  { %4414 = vmatmul.mubr.msk.f32.vlgmr.msra.gmra.mrb[18].mxu1 %vm132_vm0, %v2348_v39 }
 0x99e   :  { %v2340_v2 = vpop.f32.mrb[24].mxu0 }
 0x99f   :  { %v4407_v58 = vpop.f32.mrb[25].mxu0  ;;  %v6321_v4 = vadd.f32 %v3751_v57, %v2340_v2 }
 0x9a0   :  { %v2343_v23 = vpop.f32.mrb[26].mxu0 }
 0x9a1   :  { %v6323_v15 = vadd.f32 %v3751_v57, %v2343_v23  ;;  %v4408_v52 = vpop.f32.mrb[27].mxu0 }
 0x9a3   :  { %v5021_v49 = vpack.i.bf16 %v6323_v15, %v6321_v4  ;;  %v4975_v0 = vpack.c.bf16 %v6323_v15, %v6321_v4  ;;  %v5055_v4 = vld [vmem:[%s6784_s1] sm:$0xff]   ;;  %v5056_v15 = vld [vmem:[%s6784_s1 + $0x8] sm:$0xff]  }
 0x9a5   :  { %4976 = vmatprep.subr.bf16.mxu1 %v4975_v0 }
 0x9a6   :  { %4978 = vmatpush3.bf16.msra.mxu1 %v4975_v0 }
 0xa60   :  { %v4415_v38 = vpop.f32.mrb[18].mxu1 }
 0xa61   :  { %v2478_v7 = vsel %vm6332_vm2, %v4415_v38, -1e+30  ;;  %v2468_v8 = vpop.f32.mrb[19].mxu1  ;;  %v5059_v38 = vld [vmem:[%s6784_s1 + $0x20] sm:$0xff]  }
 0xa62   :  { %v2477_v34 = vsel %vm6336_vm3, %v2468_v8, -1e+30  ;;  %v2483_v12 = vsel %vm2479_vm4, %v2478_v7, -inf  ;;  %v5061_v8 = vld [vmem:[%s6784_s1 + $0x30] sm:$0xff]  }
 0xa63   :  { %2484 = vmax.xlane.f32.xlu1 %v2483_v12  ;;  %v2480_v28 = vsel %vm2479_vm4, %v2477_v34, -inf }
 0xa64   :  { %2481 = vmax.xlane.f32.xlu0 %v2480_v28 }
 0xa74   :  { %5017 = vrot.lane.b32.xlu1 %v5016_v59, %s5187_s4 }
 0xa78   :  { %2585 = vrot.lane.b32.xlu1 %v2348_v39, %s5187_s4 }
 0xaf0   :  { %v2485_v32 = vpop.xlane.xlu1 %2484 }
 0xaf1   :  { %v2487_v29 = vsub.f32 %v2478_v7, %v2485_v32  ;;  %v2482_v19 = vpop.xlane.xlu0 %2481  ;;  %v5060_v7 = vld [vmem:[%s6784_s1 + $0x28] sm:$0xff]  }
 0xaf2   :  { %v2486_v11 = vsub.f32 %v2477_v34, %v2482_v19  ;;  %v5062_v34 = vld [vmem:[%s6784_s1 + $0x38] sm:$0xff]  }
 0xaf3   :  { %v2490_v14 = vmul.f32 1.442695, %v2487_v29 }
 0xaf4   :  { %v2488_v10 = vmul.f32 1.442695, %v2486_v11  ;;  %v5018_v62 = vpop.permute.xlu1 %5017 }
 0xaf5   :  { %v5020_v44 = vunpack.i.h.bf16 %v5018_v62  ;;  %v5019_v20 = vunpack.i.l.bf16 %v5018_v62 }
 0xaf6   :  { %5155 = vpow2.f32 %v2488_v10 }
 0xaf7   :  { %v4979_v3 = vpack.c.bf16 %v5020_v44, %v5019_v20  ;;  %5157 = vpow2.f32 %v2490_v14  ;;  %v3772_v44 = vld [vmem:[%s6706_s13] ss:$0 sm:$0xff] }
 0xaf8   :  { %v2586_v13 = vpop.permute.xlu1 %2585 }
 0xaf9   :  { %4981 = vmatprep.subr.msk.bf16.mxu1 %vm6308_vm1, %v4979_v3 }
 0xb00   :  { %v5156_v17 = vpop.eup %5155 }
 0xb01   :  { %v2492_v43 = vsel %vm2479_vm4, %v5156_v17, 0.0  ;;  %v5158_v46 = vpop.eup %5157 }
 0xb02   :  { %2493 = vadd.xlane.f32.xlu0 %v2492_v43  ;;  %v2495_v60 = vsel %vm2479_vm4, %v5158_v46, 0.0 }
 0xb06   :  { %2496 = vadd.xlane.f32.xlu0 %v2495_v60 }
 0xb1c   :  { %2583 = vrot.lane.b32.xlu0 %v2347_v41, %s5187_s4 }
 0xb8f   :  { %v2494_v24 = vpop.xlane.xlu0 %2493 }
 0xb90   :  { %5159 = vrcp.f32 %v2494_v24 }
 0xb93   :  { %v2497_v33 = vpop.xlane.xlu0 %2496 }
 0xb94   :  { %5161 = vrcp.f32 %v2497_v33 }
 0xb97   :  { %v2584_v5 = vpop.permute.xlu0 %2583 }
 0xb9a   :  { %v5160_v53 = vpop.eup %5159 }
 0xb9b   :  { %v2499_v54 = vmul.f32 %v5160_v53, %v5156_v17 }
 0xb9d   :  { %4420 = vmatprep.mubr.msk.f32.mxu1 %vm2479_vm4, %v2499_v54 }
 0xb9e   :  { %v5162_v61 = vpop.eup %5161 }
 0xb9f   :  { %v2501_v63 = vmul.f32 %v5162_v61, %v5158_v46 }
 0xba1   :  { %4421 = vmatmul.mubr.msk.f32.vlgmr.msra.gmra.mrb[24].mxu1 %vm2479_vm4, %v2501_v63 }
 0xba2   :  { %4984 = vmatpush3.bf16.xpose.msk.msra.mxu1 %vm6308_vm1, %v4979_v3  ;;  %4427 = vmatprep.mubr.msk.f32.mxu1 %vm132_vm0, %v2584_v5 }
 0xba9   :  { %4428 = vmatmul.mubr.msk.f32.vlgmr.msra.gmra.mrb[26].mxu1 %vm132_vm0, %v2586_v13 }
 0xc74   :  { %v6359_v16 = vpop.f32.mrb[24].mxu1 }
 0xc75   :  { %v6361_v21 = vpop.f32.mrb[25].mxu1 }
 0xc7c   :  { %v4429_v25 = vpop.f32.mrb[26].mxu1 }
 0xc7d   :  { %v2675_v26 = vsel %vm6332_vm2, %v4429_v25, -1e+30  ;;  %v2665_v31 = vpop.f32.mrb[27].mxu1  ;;  %v5065_v25 = vld [vmem:[%s6707_s17 + $0x10] sm:$0xff]  }
 0xc7e   :  { %v2674_v35 = vsel %vm6336_vm3, %v2665_v31, -1e+30  ;;  %v2679_v36 = vsel %vm2479_vm4, %v2675_v26, -inf  ;;  %v5067_v31 = vld [vmem:[%s6707_s17 + $0x20] sm:$0xff]  }
 0xc7f   :  { %2680 = vmax.xlane.f32.xlu0 %v2679_v36  ;;  %v2676_v41 = vsel %vm2479_vm4, %v2674_v35, -inf  ;;  %v5069_v36 = vld [vmem:[%s6707_s17 + $0x30] sm:$0xff]  }
 0xc80   :  { %2677 = vmax.xlane.f32.xlu1 %v2676_v41  ;;  %v5070_v41 = vld [vmem:[%s6707_s17 + $0x38] sm:$0xff]  }
 0xd0c   :  { %v2681_v45 = vpop.xlane.xlu0 %2680 }
 0xd0d   :  { %v2683_v47 = vsub.f32 %v2675_v26, %v2681_v45  ;;  %v2678_v50 = vpop.xlane.xlu1 %2677  ;;  %v5066_v26 = vld [vmem:[%s6707_s17 + $0x18] sm:$0xff]  }
 0xd0e   :  { %v2682_v55 = vsub.f32 %v2674_v35, %v2678_v50  ;;  %v5068_v35 = vld [vmem:[%s6707_s17 + $0x28] sm:$0xff]  }
 0xd0f   :  { %v2686_v56 = vmul.f32 1.442695, %v2683_v47 }
 0xd10   :  { %v2684_v59 = vmul.f32 1.442695, %v2682_v55  ;;  %v2953_v55 = vld [vmem:[%s6708_s16] sm:$0x1f] }
 0xd11   :  { %5163 = vpow2.f32 %v2686_v56 }
 0xd12   :  { %5165 = vpow2.f32 %v2684_v59 }
 0xd1b   :  { %v5164_v40 = vpop.eup %5163 }
 0xd1c   :  { %v5166_v1 = vpop.eup %5165  ;;  %v2691_v39 = vsel %vm2479_vm4, %v5164_v40, 0.0 }
 0xd1d   :  { %2692 = vadd.xlane.f32.xlu1 %v2691_v39  ;;  %v2688_v57 = vsel %vm2479_vm4, %v5166_v1, 0.0 }
 0xd1e   :  { %2689 = vadd.xlane.f32.xlu0 %v2688_v57 }
 0xd34   :  { %5022 = vrot.lane.b32.xlu0 %v5021_v49, %s5187_s4  ;;  %v5057_v49 = vld [vmem:[%s6784_s1 + $0x10] sm:$0xff]  }
 0xdaa   :  { %v2693_v2 = vpop.xlane.xlu1 %2692 }
 0xdab   :  { %5167 = vrcp.f32 %v2693_v2  ;;  %v2690_v58 = vpop.xlane.xlu0 %2689 }
 0xdac   :  { %5169 = vrcp.f32 %v2690_v58 }
 0xdaf   :  { %v5023_v23 = vpop.permute.xlu0 %5022 }
 0xdb0   :  { %v5025_v52 = vunpack.i.h.bf16 %v5023_v23  ;;  %v5024_v0 = vunpack.i.l.bf16 %v5023_v23  ;;  %v3781_v23 = vld [vmem:[%s6709_s14] ss:$0 sm:$0xff] }
 0xdb2   :  { %v4985_v18 = vpack.c.bf16 %v5025_v52, %v5024_v0 }
 0xdb4   :  { %4986 = vmatprep.subr.bf16.mxu1 %v4985_v18 }
 0xdb5   :  { %v5168_v27 = vpop.eup %5167  ;;  %4988 = vmatpush3.bf16.msra.mxu1 %v4985_v18  ;;  %v3782_v18 = vld [vmem:[%s6710_s15] ss:$0 sm:$0xff] }
 0xdb6   :  { %v5170_v9 = vpop.eup %5169  ;;  %4437 = vmatprep.subr.bf16.mxu1 %v6769_v30  ;;  %v2697_v6 = vmul.f32 %v5168_v27, %v5164_v40 }
 0xdb7   :  { %v2695_v37 = vmul.f32 %v5170_v9, %v5166_v1 }
 0xdb9   :  { %4434 = vmatprep.mubr.msk.f32.mxu1 %vm2479_vm4, %v2695_v37 }
 0xdba   :  { %4435 = vmatmul.mubr.msk.f32.vlgmr.msra.gmra.mrb[28].mxu1 %vm2479_vm4, %v2697_v6 }
 0xdbb   :  { %4453 = vmatprep.mubr.msk.bf16.mxu1 %vm5186_vm5, %v6769_v30  ;;  %4438 = vmatpush3.bf16.msra.mxu1 %v5055_v4 }
 0xdbc   :  { %4439 = vmatprep.subr.bf16.mxu1 %v6769_v30 }
 0xdbf   :  { %4440 = vmatpush3.bf16.msra.mxu1 %v5056_v15 }
 0xdc0   :  { %4441 = vmatprep.subr.bf16.mxu1 %v6769_v30 }
 0xdc3   :  { %4442 = vmatpush3.bf16.msra.mxu1 %v5057_v49 }
 0xdc4   :  { %4443 = vmatprep.subr.bf16.mxu1 %v6769_v30 }
 0xdc7   :  { %4444 = vmatpush3.bf16.msra.mxu1 %v5058_v48 }
 0xdc8   :  { %4445 = vmatprep.subr.bf16.mxu1 %v6769_v30 }
 0xdcb   :  { %4446 = vmatpush3.bf16.msra.mxu1 %v5059_v38 }
 0xdcc   :  { %4447 = vmatprep.subr.bf16.mxu1 %v6769_v30 }
 0xdcf   :  { %4448 = vmatpush3.bf16.msra.mxu1 %v5060_v7 }
 0xdd0   :  { %4449 = vmatprep.subr.bf16.mxu1 %v6769_v30 }
 0xdd3   :  { %4450 = vmatpush3.bf16.msra.mxu1 %v5061_v8 }
 0xdd4   :  { %4451 = vmatprep.subr.bf16.mxu1 %v6769_v30 }
 0xdd7   :  { %4452 = vmatpush3.bf16.msra.mxu1 %v5062_v34 }
 0xdd8   :  { %4477 = vmatprep.subr.bf16.mxu1 %v6769_v30 }
 0xe8d   :  { %v4436_v12 = vpop.f32.mrb[28].mxu1 }
 0xe8e   :  { %v2778_v28 = vpop.f32.mrb[29].mxu1 }
 0xe8f   :  { %v5026_v32 = vpack.i.bf16 %v4436_v12, %v2778_v28 }
 0xe91   :  { %5027 = vrot.lane.b32.xlu1 %v5026_v32, %s5187_s4 }
 0xf03   :  { %v5028_v29 = vpop.permute.xlu1 %5027 }
 0xf04   :  { %v5030_v19 = vunpack.i.h.bf16 %v5028_v29  ;;  %v5029_v11 = vunpack.i.l.bf16 %v5028_v29 }
 0xf06   :  { %v2796_v14 = vsel %vm132_vm0, %v6359_v16, %v5030_v19  ;;  %v2795_v10 = vsel %vm132_vm0, %v6361_v21, %v5029_v11 }
 0xf07   :  { %v2797_v62 = vpack.c.bf16 %v2796_v14, %v2795_v10 }
 0xf09   :  { %4454 = vmatmul.mubr.bf16.vlgmr.msra.gmra.mrb[32].mxu1 %v2797_v62 }
 0xf0a   :  { %4485 = vmatprep.mubr.msk.bf16.mxu1 %vm5186_vm5, %v6769_v30  ;;  %vm2954_vm5 = vcmask 1044480  }
 0xf0b   :  { %v2955_v56 = vsel %vm2954_vm5, %v2953_v55, 0.0 }
 0xf0c   :  { %v2956_v40 = vrot.slane %v2955_v56, 4 }
 0xf0e   :  { %v2957_v39 = vadd.f32 %v2956_v40, %v2955_v56 }
 0xf10   :  { %v2958_v52 = vrot.slane %v2957_v39, 2 }
 0xf12   :  { %v2959_v9 = vadd.f32 %v2958_v52, %v2957_v39 }
 0xf14   :  { %v2960_v4 = vrot.slane %v2959_v9, 1 }
 0xf16   :  { %v2961_v48 = vadd.f32 %v2960_v4, %v2959_v9 }
 0xf18   :  { %v2963_v12 = vmul.f32 0.2, %v2961_v48 }
 0xf1a   :  { %v2976_v11 = vmul.f32 0.9, %v2963_v12 }
 0xfdc   :  { %v2903_v20 = vpop.f32.mrb[32].mxu1 }
 0xfdd   :  { %v2904_v3 = vadd.f32 %v3772_v44, %v2903_v20  ;;  %v4455_v17 = vpop.f32.mrb[33].mxu1 }
 0xfde   :  { %v2906_v43 = vpop.f32.mrb[34].mxu1  ;;  %v6785_v17 = vmov 0  }
 0xfdf   :  { %v2907_v46 = vadd.f32 %v3772_v44, %v2906_v43  ;;  %v4456_v60 = vpop.f32.mrb[35].mxu1  ;;  %v2910_v24 = vadd.f32 %v2904_v3, %v6256_v51  ;;  %v5063_v51 = vld [vmem:[%s6707_s17] sm:$0xff]  }
 0xfe0   :  { %4458 = vmatpush3.bf16.msra.mxu0 %v5063_v51  ;;  %v3783_v43 = vld [vmem:[%s6711_s18] ss:$0 sm:$0xff] }
 0xfe1   :  { %2912 = vadd.xlane.f32.xlu0 %v2910_v24  ;;  %v2911_v33 = vadd.f32 %v2907_v46, %v6260_v22  ;;  %v5064_v22 = vld [vmem:[%s6707_s17 + $0x8] sm:$0xff]   ;;  %4459 = vmatprep.subr.bf16.mxu0 %v6769_v30 }
 0xfe3   :  { %2914 = vadd.xlane.f32.xlu1 %v2911_v33 }
 0xfe4   :  { %4460 = vmatpush3.bf16.msra.mxu0 %v5064_v22 }
 0xfe5   :  { %4461 = vmatprep.subr.bf16.mxu0 %v6769_v30 }
 0xfe8   :  { %4462 = vmatpush3.bf16.msra.mxu0 %v5065_v25 }
 0xfe9   :  { %4463 = vmatprep.subr.bf16.mxu0 %v6769_v30 }
 0xfec   :  { %4464 = vmatpush3.bf16.msra.mxu0 %v5066_v26 }
 0xfed   :  { %4465 = vmatprep.subr.bf16.mxu0 %v6769_v30 }
 0xff0   :  { %4466 = vmatpush3.bf16.msra.mxu0 %v5067_v31 }
 0xff1   :  { %4467 = vmatprep.subr.bf16.mxu0 %v6769_v30 }
 0xff4   :  { %4468 = vmatpush3.bf16.msra.mxu0 %v5068_v35 }
 0xff5   :  { %4469 = vmatprep.subr.bf16.mxu0 %v6769_v30 }
 0xff8   :  { %4470 = vmatpush3.bf16.msra.mxu0 %v5069_v36  ;;  %v5071_v36 = vld [vmem:[%s6712_s21] sm:$0xff]  }
 0xff9   :  { %4471 = vmatprep.subr.bf16.mxu0 %v6769_v30  ;;  %4478 = vmatpush3.bf16.msra.mxu1 %v5071_v36 }
 0xffa   :  { %4479 = vmatprep.subr.bf16.mxu1 %v6769_v30 }
 0xffc   :  { %4472 = vmatpush3.bf16.msra.mxu0 %v5070_v41  ;;  %v5072_v41 = vld [vmem:[%s6712_s21 + $0x8] sm:$0xff]  }
 0xffd   :  { %4480 = vmatpush3.bf16.msra.mxu1 %v5072_v41 }
 0xffe   :  { %4481 = vmatprep.subr.bf16.mxu1 %v6769_v30 }
0x106e   :  { %v2913_v53 = vpop.xlane.xlu0 %2912 }
0x106f   :  { %v2917_v54 = vmul.f32 0.0078125, %v2913_v53 }
0x1070   :  { %v2915_v61 = vpop.xlane.xlu1 %2914 }
0x1071   :  { %v6424_v63 = vsub.f32 %v2910_v24, %v2917_v54  ;;  %v2918_v5 = vmul.f32 0.0078125, %v2915_v61 }
0x1073   :  { %v2920_v13 = vsub.f32 %v2911_v33, %v2918_v5  ;;  %v2921_v16 = vmul.f32 %v6424_v63, %v6424_v63 }
0x1075   :  { %2923 = vadd.xlane.f32.xlu1 %v2921_v16  ;;  %v2922_v21 = vmul.f32 %v2920_v13, %v2920_v13 }
0x1077   :  { %2925 = vadd.xlane.f32.xlu0 %v2922_v21 }
0x1102   :  { %v2924_v59 = vpop.xlane.xlu1 %2923 }
0x1103   :  { %v2927_v1 = vmul.f32 0.0078125, %v2924_v59 }
0x1104   :  { %v2926_v45 = vpop.xlane.xlu0 %2925 }
0x1105   :  { %v2928_v47 = vmul.f32 0.0078125, %v2926_v45  ;;  %v2929_v2 = vadd.f32 1e-05, %v2927_v1  ;;  %v5073_v45 = vld [vmem:[%s6712_s21 + $0x10] sm:$0xff]  }
0x1106   :  { %4482 = vmatpush3.bf16.msra.mxu1 %v5073_v45  ;;  %v3296_v45 = vld [vmem:[%s6717_s25 + $0xc0] sm:$0xff] }
0x1107   :  { %v2930_v50 = vadd.f32 1e-05, %v2928_v47  ;;  %4483 = vmatprep.subr.bf16.mxu1 %v6769_v30  ;;  %v5074_v47 = vld [vmem:[%s6712_s21 + $0x18] sm:$0xff]  }
0x1109   :  { %5171 = vrsqrt.f32 %v2930_v50 }
0x110a   :  { %5173 = vrsqrt.f32 %v2929_v2  ;;  %4484 = vmatpush3.bf16.msra.mxu1 %v5074_v47  ;;  %v3300_v47 = vld [vmem:[%s6717_s25 + $0xe0] sm:$0xff] }
0x1113   :  { %v5172_v57 = vpop.eup %5171 }
0x1114   :  { %v2934_v58 = vmul.f32 %v5172_v57, %v2920_v13  ;;  %v5174_v7 = vpop.eup %5173  ;;  %v3792_v57 = vld [vmem:[%s6713_s19] ss:$0 sm:$0xff] }
0x1115   :  { %v2933_v34 = vmul.f32 %v5174_v7, %v6424_v63 }
0x1116   :  { %v2943_v0 = vmul.f32 %v3781_v23, %v2934_v58  ;;  %v3793_v58 = vld [vmem:[%s6714_s20] ss:$0 sm:$0xff] }
0x1117   :  { %v2942_v29 = vmul.f32 %v3781_v23, %v2933_v34 }
0x1118   :  { %v2952_v27 = vadd.f32 %v3782_v18, %v2943_v0 }
0x1119   :  { %v2951_v10 = vadd.f32 %v3782_v18, %v2942_v29 }
0x111a   :  { %v2965_v37 = vrot.slane %v2952_v27, 6 }
0x111c   :  { %v2967_v6 = vsel %vm1975_vm13, %v2965_v37, 0.0  ;;  %v3794_v37 = vld [vmem:[%s6716_s22] ss:$0 sm:$0xff] }
0x111d   :  { %v2968_v15 = vrot.slane %v2967_v6, 4 }
0x111f   :  { %v2969_v49 = vadd.f32 %v2968_v15, %v2967_v6 }
0x1121   :  { %v2970_v38 = vrot.slane %v2969_v49, 2 }
0x1123   :  { %v2971_v8 = vadd.f32 %v2970_v38, %v2969_v49 }
0x1125   :  { %v2972_v28 = vrot.slane %v2971_v8, 1 }
0x1127   :  { %v2973_v32 = vadd.f32 %v2972_v28, %v2971_v8 }
0x1129   :  { %v2975_v19 = vmul.f32 0.5, %v2973_v32 }
0x112b   :  { %v2977_v14 = vmul.f32 0.1, %v2975_v19 }
0x112d   :  { %v2978_v62 = vadd.f32 %v2977_v14, %v2976_v11 }
0x112f   :  { %v2979_v44 = vadd.f32 %v2978_v62, %v2951_v10  ;;  %v2980_v20 = vadd.f32 %v2978_v62, %v2952_v27 }
0x1131   :  { %v2981_v3 = vpack.c.bf16 %v2980_v20, %v2979_v44  ;;  %v3272_v44 = vld [vmem:[%s6717_s25] sm:$0xff] }
0x1132   :  { %v3276_v20 = vld [vmem:[%s6717_s25 + $0x20] sm:$0xff] }
0x1133   :  { %4474 = vmatmul.mubr.bf16.vlgmr.msra.gmra.mrb[28].mxu0 %v2981_v3  ;;  %v3273_v3 = vld [vmem:[%s6717_s25 + $0x8] sm:$0xff] }
0x1134   :  { %3541 = vmatprep.mubr.bf16.mxu0 %v6785_v17 }
0x1206   :  { %v3087_v46 = vpop.f32.mrb[28].mxu0 }
0x1207   :  { %v3088_v60 = vadd.f32 %v3783_v43, %v3087_v46  ;;  %v4475_v24 = vpop.f32.mrb[29].mxu0  ;;  %v3277_v46 = vld [vmem:[%s6717_s25 + $0x28] sm:$0xff] }
0x1208   :  { %v3090_v33 = vpop.f32.mrb[30].mxu0  ;;  %v3804_v24 = vcombine.low %v3273_v3, %v3277_v46 }
0x1209   :  { %v3091_v53 = vadd.f32 %v3783_v43, %v3090_v33  ;;  %v4476_v54 = vpop.f32.mrb[31].mxu0  ;;  %v3094_v61 = vsel %vm132_vm0, %v3088_v60, 0.0  ;;  %v3803_v43 = vcombine.high %v3272_v44, %v3276_v20  ;;  %v3805_v33 = vcombine.high %v3273_v3, %v3277_v46  ;;  %v3294_v46 = vld [vmem:[%s6717_s25 + $0xb0] sm:$0xff] }
0x120a   :  { %3095 = vadd.xlane.f32.xlu0 %v3094_v61  ;;  %v3284_v54 = vld [vmem:[%s6717_s25 + $0x60] sm:$0xff]  ;;  %v3281_v61 = vld [vmem:[%s6717_s25 + $0x48] sm:$0xff] }
0x120b   :  { %v3097_v63 = vsel %vm132_vm0, %v3091_v53, 0.0  ;;  %3509 = vmatprep.subr.bf16.mxu0 %v3803_v43  ;;  %3552 = vmatprep.subr.bf16.mxu1 %v3805_v33  ;;  %v3290_v43 = vld [vmem:[%s6717_s25 + $0x90] sm:$0xff] }
0x120c   :  { %3098 = vadd.xlane.f32.xlu1 %v3097_v63 }
0x1297   :  { %v3096_v5 = vpop.xlane.xlu0 %3095 }
0x1298   :  { %v3101_v13 = vmul.f32 0.015625, %v3096_v5  ;;  %v3285_v5 = vld [vmem:[%s6717_s25 + $0x68] sm:$0xff] }
0x1299   :  { %v3099_v16 = vpop.xlane.xlu1 %3098 }
0x129a   :  { %v3103_v21 = vsub.f32 %v3088_v60, %v3101_v13  ;;  %v3102_v51 = vmul.f32 0.015625, %v3099_v16  ;;  %v3802_v60 = vcombine.low %v3272_v44, %v3276_v20  ;;  %v3812_v16 = vcombine.low %v3281_v61, %v3285_v5 }
0x129c   :  { %v3104_v22 = vsub.f32 %v3091_v53, %v3102_v51  ;;  %v3105_v25 = vmul.f32 %v3103_v21, %v3103_v21  ;;  %3510 = vmatpush1.bf16.msra.mxu0 %v3802_v60  ;;  %v3280_v53 = vld [vmem:[%s6717_s25 + $0x40] sm:$0xff]  ;;  %v3291_v60 = vld [vmem:[%s6717_s25 + $0x98] sm:$0xff] }
0x129d   :  { %v3811_v63 = vcombine.high %v3280_v53, %v3284_v54  ;;  %v3810_v13 = vcombine.low %v3280_v53, %v3284_v54  ;;  %v3288_v51 = vld [vmem:[%s6717_s25 + $0x80] sm:$0xff]  ;;  %v3823_v54 = vcombine.high %v3290_v43, %v3294_v46 }
0x129e   :  { %v3107_v26 = vsel %vm132_vm0, %v3105_v25, 0.0  ;;  %v3106_v31 = vmul.f32 %v3104_v22, %v3104_v22  ;;  %v3289_v25 = vld [vmem:[%s6717_s25 + $0x88] sm:$0xff] }
0x129f   :  { %3108 = vadd.xlane.f32.xlu0 %v3107_v26  ;;  %3511 = vmatprep.subr.bf16.mxu0 %v3811_v63  ;;  %v3298_v63 = vld [vmem:[%s6717_s25 + $0xd0] sm:$0xff] }
0x12a0   :  { %v3110_v35 = vsel %vm132_vm0, %v3106_v31, 0.0  ;;  %3512 = vmatpush1.bf16.msra.mxu0 %v3810_v13  ;;  %v3293_v31 = vld [vmem:[%s6717_s25 + $0xa8] sm:$0xff]  ;;  %v3299_v13 = vld [vmem:[%s6717_s25 + $0xd8] sm:$0xff] }
0x12a1   :  { %3111 = vadd.xlane.f32.xlu1 %v3110_v35  ;;  %v3820_v36 = vcombine.low %v3289_v25, %v3293_v31  ;;  %v3821_v41 = vcombine.high %v3289_v25, %v3293_v31 }
0x132c   :  { %v3109_v50 = vpop.xlane.xlu0 %3108 }
0x132d   :  { %v3113_v55 = vmul.f32 0.015625, %v3109_v50  ;;  %v3297_v50 = vld [vmem:[%s6717_s25 + $0xc8] sm:$0xff] }
0x132e   :  { %v3112_v56 = vpop.xlane.xlu1 %3111 }
0x132f   :  { %v3115_v59 = vadd.f32 1e-05, %v3113_v55  ;;  %v3114_v40 = vmul.f32 0.015625, %v3112_v56  ;;  %v3826_v55 = vcombine.low %v3296_v45, %v3300_v47  ;;  %v3827_v56 = vcombine.high %v3296_v45, %v3300_v47  ;;  %v6787_v45 = vld [vmem:[#allocation5_spill] sm:$0xff] }
0x1331   :  { %5175 = vrsqrt.f32 %v3115_v59  ;;  %v3116_v1 = vadd.f32 1e-05, %v3114_v40  ;;  %v3301_v59 = vld [vmem:[%s6717_s25 + $0xe8] sm:$0xff]  ;;  %v3274_v40 = vld [vmem:[%s6717_s25 + $0x10] sm:$0xff] }
0x1333   :  { %5177 = vrsqrt.f32 %v3116_v1  ;;  %v3278_v1 = vld [vmem:[%s6717_s25 + $0x30] sm:$0xff] }
0x133b   :  { %v5176_v39 = vpop.eup %5175 }
0x133c   :  { %v3119_v2 = vmul.f32 %v5176_v39, %v3103_v21  ;;  %v3813_v21 = vcombine.high %v3281_v61, %v3285_v5  ;;  %v3828_v39 = vcombine.low %v3297_v50, %v3301_v59  ;;  %v3302_v5 = vld [vmem:[%s6717_s25 + $0xf0] sm:$0xff] }
0x133d   :  { %v5178_v30 = vpop.eup %5177 }
0x133e   :  { %v3128_v23 = vmul.f32 %v3792_v57, %v3119_v2  ;;  %v3120_v52 = vmul.f32 %v5178_v30, %v3104_v22  ;;  %v3292_v22 = vld [vmem:[%s6717_s25 + $0xa0] sm:$0xff]  ;;  %v3806_v2 = vcombine.low %v3274_v40, %v3278_v1  ;;  %v3807_v30 = vcombine.high %v3274_v40, %v3278_v1 }
0x133f   :  { %v3819_v26 = vcombine.high %v3288_v51, %v3292_v22  ;;  %v3818_v35 = vcombine.low %v3288_v51, %v3292_v22  ;;  %v3831_v22 = vcombine.high %v3298_v63, %v3302_v5 }
0x1340   :  { %v3129_v0 = vmul.f32 %v3792_v57, %v3120_v52  ;;  %v3137_v18 = vadd.f32 %v3793_v58, %v3128_v23  ;;  %v3829_v57 = vcombine.high %v3297_v50, %v3301_v59  ;;  %v3279_v23 = vld [vmem:[%s6717_s25 + $0x38] sm:$0xff]  ;;  %v6788_v50 = vld [vmem:[#allocation4_spill] sm:$0xff] }
0x1341   :  { %3513 = vmatprep.subr.bf16.mxu0 %v3819_v26  ;;  %v3830_v26 = vcombine.low %v3298_v63, %v3302_v5 }
0x1342   :  { %v3138_v27 = vadd.f32 %v3793_v58, %v3129_v0  ;;  %3139 = vst.msk [vmem:[%s6715_s27] sm:$0xff] %vm132_vm0, %v3137_v18  ;;  %3514 = vmatpush1.bf16.msra.mxu0 %v3818_v35  ;;  %v3275_v58 = vld [vmem:[%s6717_s25 + $0x18] sm:$0xff]  ;;  %v3320_v35 = vsub.s32 3, %v6779_v42 }
0x1343   :  { %3515 = vmatprep.subr.bf16.mxu0 %v3827_v56  ;;  %v3808_v52 = vcombine.low %v3275_v58, %v3279_v23  ;;  %v3809_v0 = vcombine.high %v3275_v58, %v3279_v23 }
0x1344   :  { %3140 = vst.msk [vmem:[%s6715_s27 + $0x8] sm:$0xff] %vm132_vm0, %v3138_v27  ;;  %v3141_v9 = vpack.c.bf16 %v3138_v27, %v3137_v18 }
0x1346   :  { %4486 = vmatmul.mubr.msk.bf16.vlgmr.msra.gmra.mrb[36].mxu1 %vm132_vm0, %v3141_v9  ;;  %3516 = vmatpush1.bf16.msra.mxu0 %v3826_v55 }
0x1347   :  { %3584 = vmatprep.mubr.bf16.mxu1 %v6785_v17  ;;  %3553 = vmatpush1.bf16.msra.mxu1 %v3804_v24  ;;  %v3295_v24 = vld [vmem:[%s6717_s25 + $0xb8] sm:$0xff] }
0x1348   :  { %3554 = vmatprep.subr.bf16.mxu1 %v3813_v21  ;;  %3595 = vmatprep.subr.bf16.mxu0 %v3807_v30  ;;  %v3825_v61 = vcombine.high %v3291_v60, %v3295_v24  ;;  %v3822_v21 = vcombine.low %v3290_v43, %v3294_v46  ;;  %v3824_v51 = vcombine.low %v3291_v60, %v3295_v24 }
0x134b   :  { %3555 = vmatpush1.bf16.msra.mxu1 %v3812_v16  ;;  %v3303_v16 = vld [vmem:[%s6717_s25 + $0xf8] sm:$0xff] }
0x134c   :  { %3556 = vmatprep.subr.bf16.mxu1 %v3821_v41  ;;  %v3833_v25 = vcombine.high %v3299_v13, %v3303_v16  ;;  %v3832_v31 = vcombine.low %v3299_v13, %v3303_v16 }
0x134f   :  { %3557 = vmatpush1.bf16.msra.mxu1 %v3820_v36  ;;  %v6786_v36 = vld [vmem:[#allocation3_spill] sm:$0xff] }
0x1350   :  { %3558 = vmatprep.subr.bf16.mxu1 %v3829_v57 }
0x1353   :  { %3559 = vmatpush1.bf16.msra.mxu1 %v3828_v39 }
0x1354   :  { %3638 = vmatprep.subr.bf16.mxu1 %v3809_v0 }
0x1419   :  { %v3218_v6 = vpop.f32.mrb[36].mxu1 }
0x141a   :  { %v3219_v4 = vadd.f32 %v3794_v37, %v3218_v6  ;;  %v4487_v15 = vpop.f32.mrb[37].mxu1 }
0x141b   :  { %v3221_v49 = vpop.f32.mrb[38].mxu1 }
0x141c   :  { %v3222_v48 = vadd.f32 %v3794_v37, %v3221_v49  ;;  %v4488_v38 = vpop.f32.mrb[39].mxu1  ;;  %v3225_v7 = vsel %vm132_vm0, %v3219_v4, 0.0  ;;  %v3800_v49 = vld [vmem:[%s6718_s23] ss:$0 sm:$0xff] }
0x141d   :  { %3226 = vadd.xlane.f32.xlu0 %v3225_v7  ;;  %v3801_v7 = vld [vmem:[%s6719_s24] ss:$0 sm:$0xff] }
0x141e   :  { %v3228_v8 = vsel %vm132_vm0, %v3222_v48, 0.0 }
0x141f   :  { %3229 = vadd.xlane.f32.xlu1 %v3228_v8 }
0x14aa   :  { %v3227_v34 = vpop.xlane.xlu0 %3226 }
0x14ab   :  { %v3231_v12 = vmul.f32 0.015625, %v3227_v34 }
0x14ac   :  { %v3230_v28 = vpop.xlane.xlu1 %3229 }
0x14ad   :  { %v6514_v32 = vsub.f32 %v3219_v4, %v3231_v12  ;;  %v3232_v29 = vmul.f32 0.015625, %v3230_v28 }
0x14af   :  { %v6516_v19 = vsub.f32 %v3222_v48, %v3232_v29  ;;  %v3235_v11 = vmul.f32 %v6514_v32, %v6514_v32 }
0x14b1   :  { %v3237_v14 = vsel %vm132_vm0, %v3235_v11, 0.0  ;;  %v3236_v10 = vmul.f32 %v6516_v19, %v6516_v19  ;;  %v3282_v11 = vld [vmem:[%s6717_s25 + $0x50] sm:$0xff] }
0x14b2   :  { %3238 = vadd.xlane.f32.xlu0 %v3237_v14  ;;  %v3286_v14 = vld [vmem:[%s6717_s25 + $0x70] sm:$0xff] }
0x14b3   :  { %v3240_v62 = vsel %vm132_vm0, %v3236_v10, 0.0  ;;  %v3287_v10 = vld [vmem:[%s6717_s25 + $0x78] sm:$0xff]  ;;  %v3815_v20 = vcombine.high %v3282_v11, %v3286_v14  ;;  %v3814_v33 = vcombine.low %v3282_v11, %v3286_v14 }
0x14b4   :  { %3241 = vadd.xlane.f32.xlu1 %v3240_v62 }
0x153f   :  { %v3239_v18 = vpop.xlane.xlu0 %3238 }
0x1540   :  { %v3243_v27 = vmul.f32 0.015625, %v3239_v18 }
0x1541   :  { %v3242_v9 = vpop.xlane.xlu1 %3241 }
0x1542   :  { %v3245_v37 = vadd.f32 1e-05, %v3243_v27  ;;  %v3244_v6 = vmul.f32 0.015625, %v3242_v9 }
0x1544   :  { %5179 = vrsqrt.f32 %v3245_v37  ;;  %v3246_v4 = vadd.f32 1e-05, %v3244_v6 }
0x1546   :  { %5181 = vrsqrt.f32 %v3246_v4  ;;  %v3324_v4 = vsub.s32 4, %v6779_v42 }
0x154e   :  { %v5180_v15 = vpop.eup %5179 }
0x154f   :  { %v3249_v48 = vmul.f32 %v5180_v15, %v6514_v32  ;;  %v3283_v32 = vld [vmem:[%s6717_s25 + $0x58] sm:$0xff]  ;;  %v3332_v15 = vsub.s32 6, %v6779_v42 }
0x1550   :  { %v5182_v38 = vpop.eup %5181  ;;  %v3817_v3 = vcombine.high %v3283_v32, %v3287_v10  ;;  %v3816_v53 = vcombine.low %v3283_v32, %v3287_v10 }
0x1551   :  { %v3258_v8 = vmul.f32 %v3800_v49, %v3249_v48  ;;  %v3250_v34 = vmul.f32 %v5182_v38, %v6516_v19  ;;  %v3336_v48 = vsub.s32 7, %v6779_v42 }
0x1553   :  { %v3259_v12 = vmul.f32 %v3800_v49, %v3250_v34  ;;  %v3267_v28 = vadd.f32 %v3801_v7, %v3258_v8  ;;  %v3328_v49 = vsub.s32 5, %v6779_v42 }
0x1555   :  { %v3268_v29 = vadd.f32 %v3801_v7, %v3259_v12  ;;  %v3269_v19 = vmax.f32 %v3267_v28, 0.0 }
0x1557   :  { %v3270_v62 = vmax.f32 %v3268_v29, 0.0 }
0x1559   :  { %v3271_v44 = vpack.c.bf16 %v3270_v62, %v3269_v19 }
0x155b   :  { %3834 = vmatmul.mubr.msk.bf16.vlgmr.msra.gmra.mrb[32].mxu0 %vm132_vm0, %v3271_v44  ;;  %3835 = vmatmul.mubr.msk.bf16.vlgmr.msra.gmra.mrb[40].mxu1 %vm132_vm0, %v3271_v44 }
0x155c   :  { %3596 = vmatpush1.bf16.msra.mxu0 %v3806_v2  ;;  %3639 = vmatpush1.bf16.msra.mxu1 %v3808_v52 }
0x155d   :  { %3597 = vmatprep.subr.bf16.mxu0 %v3815_v20  ;;  %3640 = vmatprep.subr.bf16.mxu1 %v3817_v3 }
0x155e   :  { %3627 = vmatprep.mubr.bf16.mxu0 %v6785_v17  ;;  %3670 = vmatprep.mubr.bf16.mxu1 %v6785_v17  ;;  %v3304_v17 = vld [vmem:[%s6720_s26] sm:$0xff] }
0x155f   :  { %v3309_v41 = vrot.slane %v3304_v17, %v6786_v36  ;;  %v3317_v47 = vrot.slane %v3304_v17, %v6787_v45  ;;  %v3313_v55 = vrot.slane %v3304_v17, %v6788_v50  ;;  %v3321_v56 = vrot.slane %v3304_v17, %v3320_v35 }
0x1560   :  { %3598 = vmatpush1.bf16.msra.mxu0 %v3814_v33  ;;  %3641 = vmatpush1.bf16.msra.mxu1 %v3816_v53  ;;  %v3325_v38 = vrot.slane %v3304_v17, %v3324_v4  ;;  %v3333_v7 = vrot.slane %v3304_v17, %v3332_v15  ;;  %v3329_v8 = vrot.slane %v3304_v17, %v3328_v49 }
0x1561   :  { %3599 = vmatprep.subr.bf16.mxu0 %v3823_v54  ;;  %3642 = vmatprep.subr.bf16.mxu1 %v3825_v61  ;;  %v3337_v34 = vrot.slane %v3304_v17, %v3336_v48 }
0x1564   :  { %3600 = vmatpush1.bf16.msra.mxu0 %v3822_v21  ;;  %3643 = vmatpush1.bf16.msra.mxu1 %v3824_v51 }
0x1565   :  { %3601 = vmatprep.subr.bf16.mxu0 %v3831_v22  ;;  %3644 = vmatprep.subr.bf16.mxu1 %v3833_v25 }
0x1568   :  { %3602 = vmatpush1.bf16.msra.mxu0 %v3830_v26  ;;  %3645 = vmatpush1.bf16.msra.mxu1 %v3832_v31 }
0x156b   :  { %3836 = vmatmul.mubr.msk.bf16.vlgmr.msra.gmra.mrb[36].mxu0 %vm132_vm0, %v3271_v44  ;;  %3837 = vmatmul.mubr.msk.bf16.vlgmr.msra.gmra.mrb[44].mxu1 %vm132_vm0, %v3271_v44 }
0x162e   :  { %v3543_v59 = vpop.f32.mrb[32].mxu0  ;;  %v3586_v40 = vpop.f32.mrb[40].mxu1 }
0x162f   :  { %v3544_v1 = vadd.f32 %v3543_v59, %v3309_v41  ;;  %v3587_v39 = vadd.f32 %v3586_v40, %v3317_v47  ;;  %v3545_v57 = vpop.f32.mrb[33].mxu0  ;;  %v3588_v2 = vpop.f32.mrb[41].mxu1 }
0x1630   :  { %v3546_v30 = vadd.f32 %v3545_v57, %v3313_v55  ;;  %v3589_v58 = vadd.f32 %v3588_v2, %v3321_v56  ;;  %v3547_v23 = vpop.f32.mrb[34].mxu0  ;;  %v3590_v52 = vpop.f32.mrb[42].mxu1 }
0x1631   :  { %3681 = vst [vmem:[%s6721_s28] sm:$0xff] %v3544_v1  ;;  %3683 = vst [vmem:[%s6721_s28 + $0x10] sm:$0xff] %v3587_v39  ;;  %v3548_v0 = vadd.f32 %v3547_v23, %v3309_v41  ;;  %v3591_v18 = vadd.f32 %v3590_v52, %v3317_v47  ;;  %v3549_v27 = vpop.f32.mrb[35].mxu0  ;;  %v3592_v9 = vpop.f32.mrb[43].mxu1 }
0x1632   :  { %3682 = vst [vmem:[%s6721_s28 + $0x8] sm:$0xff] %v3546_v30  ;;  %3684 = vst [vmem:[%s6721_s28 + $0x18] sm:$0xff] %v3589_v58  ;;  %v3550_v37 = vadd.f32 %v3549_v27, %v3313_v55  ;;  %v3593_v6 = vadd.f32 %v3592_v9, %v3321_v56 }
0x1633   :  { %3689 = vst [vmem:[%s6721_s28 + $0x40] sm:$0xff] %v3548_v0  ;;  %3691 = vst [vmem:[%s6721_s28 + $0x50] sm:$0xff] %v3591_v18 }
0x1634   :  { %3690 = vst [vmem:[%s6721_s28 + $0x48] sm:$0xff] %v3550_v37  ;;  %3692 = vst [vmem:[%s6721_s28 + $0x58] sm:$0xff] %v3593_v6 }
0x163e   :  { %v3629_v12 = vpop.f32.mrb[36].mxu0  ;;  %v3672_v28 = vpop.f32.mrb[44].mxu1 }
0x163f   :  { %v3630_v29 = vadd.f32 %v3629_v12, %v3325_v38  ;;  %v3673_v11 = vadd.f32 %v3672_v28, %v3333_v7  ;;  %v3631_v14 = vpop.f32.mrb[37].mxu0  ;;  %v3674_v32 = vpop.f32.mrb[45].mxu1 }
0x1640   :  { %v3632_v10 = vadd.f32 %v3631_v14, %v3329_v8  ;;  %v3675_v19 = vadd.f32 %v3674_v32, %v3337_v34  ;;  %v3633_v62 = vpop.f32.mrb[38].mxu0  ;;  %v3676_v44 = vpop.f32.mrb[46].mxu1 }
0x1641   :  { %3685 = vst [vmem:[%s6721_s28 + $0x20] sm:$0xff] %v3630_v29  ;;  %3687 = vst [vmem:[%s6721_s28 + $0x30] sm:$0xff] %v3673_v11  ;;  %v3634_v42 = vadd.f32 %v3633_v62, %v3325_v38  ;;  %v3677_v20 = vadd.f32 %v3676_v44, %v3333_v7  ;;  %v3635_v3 = vpop.f32.mrb[39].mxu0  ;;  %v3678_v43 = vpop.f32.mrb[47].mxu1 }
0x1642   :  { %3686 = vst [vmem:[%s6721_s28 + $0x28] sm:$0xff] %v3632_v10  ;;  %3688 = vst [vmem:[%s6721_s28 + $0x38] sm:$0xff] %v3675_v19  ;;  %v3636_v46 = vadd.f32 %v3635_v3, %v3329_v8  ;;  %v3679_v60 = vadd.f32 %v3678_v43, %v3337_v34 }
0x1643   :  { %3693 = vst [vmem:[%s6721_s28 + $0x60] sm:$0xff] %v3634_v42  ;;  %3695 = vst [vmem:[%s6721_s28 + $0x70] sm:$0xff] %v3677_v20 }
0x1644   :  { %3694 = vst [vmem:[%s6721_s28 + $0x68] sm:$0xff] %v3636_v46  ;;  %3696 = vst [vmem:[%s6721_s28 + $0x78] sm:$0xff] %v3679_v60 }

</bundles_post_ra>
